<compile_context>
chip_gen: v7x
topology: tpu7x:2x2x1
jax: 0.10.0
libtpu: 0.0.40
codegen_flags: <defaults>
</compile_context>

<pallas_src>
import functools

import jax
import jax.numpy as jnp
from jax.experimental import pallas as pl
from jax.experimental.pallas import tpu as pltpu


# -----------------------------------------------------------------------------
# Pallas kernel
# -----------------------------------------------------------------------------
def _relpos_attn_kernel(q_ref, k_ref, v_ref, *rest, heads, H, W, dim, TH,
                        relative):
    # q_ref: (heads, TQ, dim)   -- TQ = TH*W queries of the current q-row tile
    # k_ref: (heads, N,  dim)   -- full key set, N = H*W
    # v_ref: (heads, N,  dim)
    # rw_ref (W,  N, dim), rh_ref (TH, N, dim)  -- only when relative=True
    # o_ref: (TQ, heads*dim)    -- lane-dense, already in 'bhwnd'-compatible order
    if relative:
        rw_ref, rh_ref, o_ref = rest
        rw = rw_ref[...]                     # (W,  N, D)
        rh = rh_ref[...]                     # (TH, N, D)
    else:
        (o_ref,) = rest

    N = H * W
    TQ = TH * W
    scale = dim ** (-0.5)

    outs = []
    for h in range(heads):                   # heads is small & static -> unrolled
        qh = q_ref[h]                        # (TQ, D)
        kh = k_ref[h]                        # (N,  D)
        vh = v_ref[h]                        # (N,  D)

        # content logits: contract the D axes directly (no k.T relayout)
        logits = jax.lax.dot_general(
            qh, kh, (((1,), (1,)), ((), ())),
            preferred_element_type=jnp.float32)          # (TQ, N)

        if relative:
            q4 = qh.reshape(TH, W, dim)                  # (TH, W, D)
            # bias_h[y, x, t] = sum_d q4[y, x, d] * RH[y, t, d]   (batch y)
            bias_h = jnp.einsum('yxd,ytd->yxt', q4, rh,
                                preferred_element_type=jnp.float32)
            # bias_w[y, x, t] = sum_d q4[y, x, d] * RW[x, t, d]   (batch x)
            bias_w = jnp.einsum('yxd,xtd->yxt', q4, rw,
                                preferred_element_type=jnp.float32)
            logits = logits + (bias_h + bias_w).reshape(TQ, N)

        # q-scale folded into the (already f32) logits: identical math, keeps
        # the matmul operands un-scaled (friendlier for bf16 operands).
        logits = logits * scale

        # softmax over the N key positions (f32 math)
        m = jnp.max(logits, axis=-1, keepdims=True)
        p = jnp.exp(logits - m)
        denom = jnp.sum(p, axis=-1, keepdims=True)

        # p @ v first, then normalize the (TQ, dim) result (TQ*dim multiplies
        # instead of TQ*N divides).
        o = jnp.dot(p.astype(vh.dtype), vh, preferred_element_type=jnp.float32)
        o = o * (1.0 / denom)

        outs.append(o.astype(o_ref.dtype))

    # single lane-dense store of all heads: (TQ, heads*dim)
    o_ref[...] = jnp.concatenate(outs, axis=-1)


# -----------------------------------------------------------------------------
# Wrapper (parameter gathers, table expansion, pallas_call)
# -----------------------------------------------------------------------------
def _pick_q_rows(H, W, target_queries=512):
    """Rows of the image per query tile (TQ = rows*W queries per grid step)."""
    if H * W <= max(target_queries, 8):
        return H                                  # whole image in one tile
    best = None
    for th in range(1, H + 1):
        if H % th == 0 and th * W <= target_queries and (th * W) % 8 == 0:
            best = th
    return best if best is not None else H


def rel_pos_self_attention(q, k, v, rel_emb_w, rel_emb_h, *,
                           relative=True, fold_heads=False,
                           matmul_dtype=None, q_block_rows=None):
    bs, heads, H, W, dim = q.shape
    N = H * W
    out_dtype = q.dtype
    mmdt = jnp.dtype(matmul_dtype) if matmul_dtype is not None else jnp.dtype(q.dtype)

    # (bs, heads, N, dim) — free reshapes; cast matmul operands once here.
    qf = q.reshape(bs, heads, N, dim).astype(mmdt)
    kf = k.reshape(bs, heads, N, dim).astype(mmdt)
    vf = v.reshape(bs, heads, N, dim).astype(mmdt)

    TH = _pick_q_rows(H, W) if q_block_rows is None else q_block_rows
    assert H % TH == 0 and ((TH * W) % 8 == 0 or TH == H), (TH, H, W)
    TQ = TH * W
    n_q = H // TH

    operands = [qf, kf, vf]
    in_specs = [
        pl.BlockSpec((None, heads, TQ, dim), lambda b, i: (b, 0, i, 0)),
        pl.BlockSpec((None, heads, N, dim), lambda b, i: (b, 0, 0, 0)),
        pl.BlockSpec((None, heads, N, dim), lambda b, i: (b, 0, 0, 0)),
    ]

    if relative:
        # absolute-index gathers equivalent to rel_to_abs
        idx_w = jnp.arange(W)[None, :] - jnp.arange(W)[:, None] + (W - 1)  # (W, W)
        idx_h = jnp.arange(H)[None, :] - jnp.arange(H)[:, None] + (H - 1)  # (H, H)
        rw_abs = rel_emb_w[idx_w]                                          # (W, W, D)
        rh_abs = rel_emb_h[idx_h]                                          # (H, H, D)
        # expand over the full key axis t = p*W + x'  (lane-dense, K=D contraction)
        rw_full = jnp.tile(rw_abs, (1, H, 1)).astype(mmdt)                 # (W, N, D)
        rh_full = jnp.repeat(rh_abs, W, axis=1).astype(mmdt)               # (H, N, D)
        operands += [rw_full, rh_full]
        in_specs += [
            pl.BlockSpec((W, N, dim), lambda b, i: (0, 0, 0)),
            pl.BlockSpec((TH, N, dim), lambda b, i: (i, 0, 0)),
        ]

    # output already in (bs, N, heads*dim): the 'bhwnd' transpose becomes a free
    # reshape, and the store is lane-dense (width heads*dim).
    out_shape = jax.ShapeDtypeStruct((bs, N, heads * dim), out_dtype)
    out_specs = pl.BlockSpec((None, TQ, heads * dim), lambda b, i: (b, i, 0))

    # explicit scoped-VMEM budget: double-buffered blocks + in-kernel temps
    mm_b = jnp.dtype(mmdt).itemsize
    out_b = jnp.dtype(out_dtype).itemsize
    block_bytes = (heads * TQ * dim + 2 * heads * N * dim) * mm_b \
                  + TQ * heads * dim * out_b
    if relative:
        block_bytes += (W + TH) * N * dim * mm_b
    temp_bytes = 6 * TQ * N * 4 + 4 * TQ * heads * dim * 4
    vmem_limit = int(min(max(2 * block_bytes + temp_bytes, 16 * 1024 * 1024),
                         64 * 1024 * 1024))

    kernel = functools.partial(_relpos_attn_kernel, heads=heads, H=H, W=W,
                               dim=dim, TH=TH, relative=relative)

    out = pl.pallas_call(
        kernel,
        out_shape=out_shape,
        grid_spec=pltpu.PrefetchScalarGridSpec(
            num_scalar_prefetch=0,
            grid=(bs, n_q),
            in_specs=in_specs,
            out_specs=out_specs,
        ),
        compiler_params=pltpu.CompilerParams(
            # both axes fully parallel (no reduction axis); on v7x keep
            # bs * n_q even so both TensorCores stay busy.
            dimension_semantics=("parallel", "parallel"),
            vmem_limit_bytes=vmem_limit),
    )(*operands)

    attn = out.reshape(bs, H, W, heads, dim)          # free reshape, no transpose
    if fold_heads:
        attn = attn.reshape(bs, H, W, heads * dim)
    return attn


# -----------------------------------------------------------------------------
# Pure-JAX reference (faithful port of the PyTorch forward, incl. rel_to_abs)
# -----------------------------------------------------------------------------
def _rel_to_abs(x):
    bs, heads, length, _ = x.shape
    col_pad = jnp.zeros((bs, heads, length, 1), x.dtype)
    x = jnp.concatenate([x, col_pad], axis=3)
    flat_x = x.reshape(bs, heads, -1)
    flat_pad = jnp.zeros((bs, heads, length - 1), x.dtype)
    flat_x_padded = jnp.concatenate([flat_x, flat_pad], axis=2)
    final_x = flat_x_padded.reshape(bs, heads, length + 1, 2 * length - 1)
    return final_x[:, :, :length, length - 1:]


def _relative_logits_1d(q, rel_k, transpose_mask):
    bs, heads, h, w, dim = q.shape
    rel_logits = jnp.einsum('bhxyd,md->bhxym', q, rel_k)
    rel_logits = rel_logits.reshape(-1, heads * h, w, 2 * w - 1)
    rel_logits = _rel_to_abs(rel_logits)
    rel_logits = rel_logits.reshape(-1, heads, h, w, w)
    rel_logits = jnp.expand_dims(rel_logits, axis=3)
    rel_logits = jnp.tile(rel_logits, (1, 1, 1, h, 1, 1))
    rel_logits = rel_logits.transpose(transpose_mask)
    return rel_logits


def reference(q, k, v, rel_emb_w, rel_emb_h, relative=True, fold_heads=False):
    bs, heads, h, w, dim = q.shape
    q = q * dim ** (-0.5)
    logits = jnp.einsum('bnhwd,bnpqd->bnhwpq', q, k)
    if relative:
        rel_w = _relative_logits_1d(q, rel_emb_w, (0, 1, 2, 4, 3, 5))
        rel_h = _relative_logits_1d(q.transpose(0, 1, 3, 2, 4), rel_emb_h,
                                    (0, 1, 4, 2, 5, 3))
        logits = logits + rel_h + rel_w
    weights = logits.reshape(-1, heads, h, w, h * w)
    weights = jax.nn.softmax(weights, axis=-1)
    weights = weights.reshape(-1, heads, h, w, h, w)
    attn_out = jnp.einsum('bnhwpq,bnpqd->bhwnd', weights, v)
    if fold_heads:
        attn_out = attn_out.reshape(-1, h, w, heads * dim)
    return attn_out


# -----------------------------------------------------------------------------
if __name__ == "__main__":
    bs, heads, H, W, dim = 2, 2, 8, 8, 32

    key = jax.random.PRNGKey(0)
    kq, kk, kv, kw, kh = jax.random.split(key, 5)
    q = jax.random.normal(kq, (bs, heads, H, W, dim), jnp.float32)
    k = jax.random.normal(kk, (bs, heads, H, W, dim), jnp.float32)
    v = jax.random.normal(kv, (bs, heads, H, W, dim), jnp.float32)
    # nn.init.normal_(..., std=dim ** -0.5)
    rel_emb_w = jax.random.normal(kw, (2 * W - 1, dim), jnp.float32) * dim ** (-0.5)
    rel_emb_h = jax.random.normal(kh, (2 * H - 1, dim), jnp.float32) * dim ** (-0.5)

    ref = reference(q, k, v, rel_emb_w, rel_emb_h, relative=True, fold_heads=False)

    # 1) fp32 matmul path — tight correctness check
    out32 = rel_pos_self_attention(q, k, v, rel_emb_w, rel_emb_h,
                                   relative=True, fold_heads=False,
                                   matmul_dtype=None)
    out32 = jax.block_until_ready(out32)
    assert out32.shape == (bs, H, W, heads, dim), out32.shape
    err32 = float(jnp.max(jnp.abs(out32 - ref)))
    assert err32 < 5e-4, f"fp32 path max abs error too large: {err32}"

    # 2) bf16 matmul operands (f32 accumulation / f32 softmax) — v6e/v7x MXU path
    out16 = rel_pos_self_attention(q, k, v, rel_emb_w, rel_emb_h,
                                   relative=True, fold_heads=False,
                                   matmul_dtype=jnp.bfloat16)
    out16 = jax.block_until_ready(out16)
    err16 = float(jnp.max(jnp.abs(out16 - ref)))
    assert err16 < 7.5e-2, f"bf16 path max abs error too large: {err16}"

    # 3) relative=False specialization — bias path (tables + matmuls) fully skipped
    ref_nr = reference(q, k, v, rel_emb_w, rel_emb_h, relative=False,
                       fold_heads=False)
    out_nr = rel_pos_self_attention(q, k, v, rel_emb_w, rel_emb_h,
                                    relative=False, fold_heads=False,
                                    matmul_dtype=None)
    out_nr = jax.block_until_ready(out_nr)
    err_nr = float(jnp.max(jnp.abs(out_nr - ref_nr)))
    assert err_nr < 5e-4, f"relative=False path max abs error too large: {err_nr}"

    print("KERNEL_OK")
</pallas_src>

<mosaic_0001>
module attributes {stable_mosaic.version = 11 : i64} {
  func.func @_relpos_attn_kernel(%arg0: i32, %arg1: i32, %arg2: memref<1x2x64x32xf32, #tpu.memory_space<vmem>>, %arg3: memref<1x2x64x32xf32, #tpu.memory_space<vmem>>, %arg4: memref<1x2x64x32xf32, #tpu.memory_space<vmem>>, %arg5: memref<8x64x32xf32, #tpu.memory_space<vmem>>, %arg6: memref<8x64x32xf32, #tpu.memory_space<vmem>>, %arg7: memref<1x64x64xf32, #tpu.memory_space<vmem>>) attributes {dimension_semantics = [#tpu.dimension_semantics<parallel>, #tpu.dimension_semantics<parallel>], iteration_bounds = array<i64: 2, 1>, scalar_prefetch = 0 : i64, scratch_operands = 0 : i64, tpu.core_type = #tpu.core_type<tc>, window_params = [{transform_indices = @transform_0, window_bounds = array<i64: 1, 2, 64, 32>}, {transform_indices = @transform_1, window_bounds = array<i64: 1, 2, 64, 32>}, {transform_indices = @transform_2, window_bounds = array<i64: 1, 2, 64, 32>}, {pipeline_mode = #tpu.pipeline_mode<synchronous>, transform_indices = @transform_3, window_bounds = array<i64: 8, 64, 32>}, {transform_indices = @transform_4, window_bounds = array<i64: 8, 64, 32>}, {transform_indices = @transform_5, window_bounds = array<i64: 1, 64, 64>}]} {
    %c0 = arith.constant 0 : index
    %c0_0 = arith.constant 0 : index
    %c0_1 = arith.constant 0 : index
    %0 = vector.load %arg5[%c0, %c0_0, %c0_1] : memref<8x64x32xf32, #tpu.memory_space<vmem>>, vector<8x64x32xf32>
    %c0_2 = arith.constant 0 : index
    %c0_3 = arith.constant 0 : index
    %c0_4 = arith.constant 0 : index
    %1 = vector.load %arg6[%c0_2, %c0_3, %c0_4] : memref<8x64x32xf32, #tpu.memory_space<vmem>>, vector<8x64x32xf32>
    %c0_5 = arith.constant 0 : index
    %c0_6 = arith.constant 0 : index
    %c0_7 = arith.constant 0 : index
    %c0_8 = arith.constant 0 : index
    %2 = vector.load %arg2[%c0_5, %c0_6, %c0_7, %c0_8] : memref<1x2x64x32xf32, #tpu.memory_space<vmem>>, vector<1x1x64x32xf32>
    %3 = vector.shape_cast %2 : vector<1x1x64x32xf32> to vector<64x32xf32>
    %c0_9 = arith.constant 0 : index
    %c0_10 = arith.constant 0 : index
    %c0_11 = arith.constant 0 : index
    %c0_12 = arith.constant 0 : index
    %4 = vector.load %arg3[%c0_9, %c0_10, %c0_11, %c0_12] : memref<1x2x64x32xf32, #tpu.memory_space<vmem>>, vector<1x1x64x32xf32>
    %5 = vector.shape_cast %4 : vector<1x1x64x32xf32> to vector<64x32xf32>
    %c0_13 = arith.constant 0 : index
    %c0_14 = arith.constant 0 : index
    %c0_15 = arith.constant 0 : index
    %c0_16 = arith.constant 0 : index
    %6 = vector.load %arg4[%c0_13, %c0_14, %c0_15, %c0_16] : memref<1x2x64x32xf32, #tpu.memory_space<vmem>>, vector<1x1x64x32xf32>
    %7 = vector.shape_cast %6 : vector<1x1x64x32xf32> to vector<64x32xf32>
    %cst = arith.constant dense<0.000000e+00> : vector<64x64xf32>
    %8 = tpu.matmul %3, %5, %cst {dimension_numbers = #tpu.dot_dimension_numbers<[1], [1], [0], [0], [0, 0, 1, 0], [], []>} : vector<64x32xf32>, vector<64x32xf32>, vector<64x64xf32> -> vector<64x64xf32>
    %9 = vector.shape_cast %3 : vector<64x32xf32> to vector<8x8x32xf32>
    "tpu.trace_start"() <{level = 10 : i32, message = "yxd,ytd->yxt"}> : () -> ()
    %cst_17 = arith.constant dense<0.000000e+00> : vector<8x8x64xf32>
    %10 = tpu.matmul %9, %1, %cst_17 {dimension_numbers = #tpu.dot_dimension_numbers<[2], [2], [1], [1], [0, 0, 0, 1, 1, 1], [0], [0]>} : vector<8x8x32xf32>, vector<8x64x32xf32>, vector<8x8x64xf32> -> vector<8x8x64xf32>
    "tpu.trace_stop"() : () -> ()
    "tpu.trace_start"() <{level = 10 : i32, message = "yxd,xtd->yxt"}> : () -> ()
    %cst_18 = arith.constant dense<0.000000e+00> : vector<8x64x8xf32>
    %11 = tpu.matmul %0, %9, %cst_18 {dimension_numbers = #tpu.dot_dimension_numbers<[2], [2], [1], [0], [0, 0, 0, 1, 1, 0], [0], [1]>} : vector<8x64x32xf32>, vector<8x8x32xf32>, vector<8x64x8xf32> -> vector<8x64x8xf32>
    %12 = tpu.transpose %11, [2, 0, 1] : vector<8x64x8xf32> -> vector<8x8x64xf32>
    "tpu.trace_stop"() : () -> ()
    %13 = arith.addf %10, %12 : vector<8x8x64xf32>
    %14 = vector.shape_cast %13 : vector<8x8x64xf32> to vector<64x64xf32>
    %15 = arith.addf %8, %14 : vector<64x64xf32>
    %cst_19 = arith.constant 0.176776692 : f32
    %16 = vector.broadcast %cst_19 : f32 to vector<64x64xf32>
    %17 = arith.mulf %15, %16 : vector<64x64xf32>
    %cst_20 = arith.constant dense<0xFF800000> : vector<64xf32>
    %18 = vector.multi_reduction <maximumf>, %17, %cst_20 [1] : vector<64x64xf32> to vector<64xf32>
    %19 = vector.shape_cast %18 : vector<64xf32> to vector<64x1xf32>
    %20 = vector.broadcast %19 : vector<64x1xf32> to vector<64x64xf32>
    %21 = arith.subf %17, %20 : vector<64x64xf32>
    %22 = math.exp %21 : vector<64x64xf32>
    %cst_21 = arith.constant dense<0.000000e+00> : vector<64xf32>
    %23 = vector.multi_reduction <add>, %22, %cst_21 [1] : vector<64x64xf32> to vector<64xf32>
    %24 = vector.shape_cast %23 : vector<64xf32> to vector<64x1xf32>
    %cst_22 = arith.constant dense<0.000000e+00> : vector<64x32xf32>
    %25 = tpu.matmul %22, %7, %cst_22 {dimension_numbers = #tpu.dot_dimension_numbers<[1], [0], [0], [1], [0, 0, 1, 1], [], []>} : vector<64x64xf32>, vector<64x32xf32>, vector<64x32xf32> -> vector<64x32xf32>
    %cst_23 = arith.constant 1.000000e+00 : f32
    %26 = vector.broadcast %cst_23 : f32 to vector<64x1xf32>
    %27 = arith.divf %26, %24 : vector<64x1xf32>
    %28 = vector.broadcast %27 : vector<64x1xf32> to vector<64x32xf32>
    %29 = arith.mulf %25, %28 : vector<64x32xf32>
    %c0_24 = arith.constant 0 : index
    %c1 = arith.constant 1 : index
    %c0_25 = arith.constant 0 : index
    %c0_26 = arith.constant 0 : index
    %30 = vector.load %arg2[%c0_24, %c1, %c0_25, %c0_26] : memref<1x2x64x32xf32, #tpu.memory_space<vmem>>, vector<1x1x64x32xf32>
    %31 = vector.shape_cast %30 : vector<1x1x64x32xf32> to vector<64x32xf32>
    %c0_27 = arith.constant 0 : index
    %c1_28 = arith.constant 1 : index
    %c0_29 = arith.constant 0 : index
    %c0_30 = arith.constant 0 : index
    %32 = vector.load %arg3[%c0_27, %c1_28, %c0_29, %c0_30] : memref<1x2x64x32xf32, #tpu.memory_space<vmem>>, vector<1x1x64x32xf32>
    %33 = vector.shape_cast %32 : vector<1x1x64x32xf32> to vector<64x32xf32>
    %c0_31 = arith.constant 0 : index
    %c1_32 = arith.constant 1 : index
    %c0_33 = arith.constant 0 : index
    %c0_34 = arith.constant 0 : index
    %34 = vector.load %arg4[%c0_31, %c1_32, %c0_33, %c0_34] : memref<1x2x64x32xf32, #tpu.memory_space<vmem>>, vector<1x1x64x32xf32>
    %35 = vector.shape_cast %34 : vector<1x1x64x32xf32> to vector<64x32xf32>
    %cst_35 = arith.constant dense<0.000000e+00> : vector<64x64xf32>
    %36 = tpu.matmul %31, %33, %cst_35 {dimension_numbers = #tpu.dot_dimension_numbers<[1], [1], [0], [0], [0, 0, 1, 0], [], []>} : vector<64x32xf32>, vector<64x32xf32>, vector<64x64xf32> -> vector<64x64xf32>
    %37 = vector.shape_cast %31 : vector<64x32xf32> to vector<8x8x32xf32>
    "tpu.trace_start"() <{level = 10 : i32, message = "yxd,ytd->yxt"}> : () -> ()
    %cst_36 = arith.constant dense<0.000000e+00> : vector<8x8x64xf32>
    %38 = tpu.matmul %37, %1, %cst_36 {dimension_numbers = #tpu.dot_dimension_numbers<[2], [2], [1], [1], [0, 0, 0, 1, 1, 1], [0], [0]>} : vector<8x8x32xf32>, vector<8x64x32xf32>, vector<8x8x64xf32> -> vector<8x8x64xf32>
    "tpu.trace_stop"() : () -> ()
    "tpu.trace_start"() <{level = 10 : i32, message = "yxd,xtd->yxt"}> : () -> ()
    %cst_37 = arith.constant dense<0.000000e+00> : vector<8x64x8xf32>
    %39 = tpu.matmul %0, %37, %cst_37 {dimension_numbers = #tpu.dot_dimension_numbers<[2], [2], [1], [0], [0, 0, 0, 1, 1, 0], [0], [1]>} : vector<8x64x32xf32>, vector<8x8x32xf32>, vector<8x64x8xf32> -> vector<8x64x8xf32>
    %40 = tpu.transpose %39, [2, 0, 1] : vector<8x64x8xf32> -> vector<8x8x64xf32>
    "tpu.trace_stop"() : () -> ()
    %41 = arith.addf %38, %40 : vector<8x8x64xf32>
    %42 = vector.shape_cast %41 : vector<8x8x64xf32> to vector<64x64xf32>
    %43 = arith.addf %36, %42 : vector<64x64xf32>
    %cst_38 = arith.constant 0.176776692 : f32
    %44 = vector.broadcast %cst_38 : f32 to vector<64x64xf32>
    %45 = arith.mulf %43, %44 : vector<64x64xf32>
    %cst_39 = arith.constant dense<0xFF800000> : vector<64xf32>
    %46 = vector.multi_reduction <maximumf>, %45, %cst_39 [1] : vector<64x64xf32> to vector<64xf32>
    %47 = vector.shape_cast %46 : vector<64xf32> to vector<64x1xf32>
    %48 = vector.broadcast %47 : vector<64x1xf32> to vector<64x64xf32>
    %49 = arith.subf %45, %48 : vector<64x64xf32>
    %50 = math.exp %49 : vector<64x64xf32>
    %cst_40 = arith.constant dense<0.000000e+00> : vector<64xf32>
    %51 = vector.multi_reduction <add>, %50, %cst_40 [1] : vector<64x64xf32> to vector<64xf32>
    %52 = vector.shape_cast %51 : vector<64xf32> to vector<64x1xf32>
    %cst_41 = arith.constant dense<0.000000e+00> : vector<64x32xf32>
    %53 = tpu.matmul %50, %35, %cst_41 {dimension_numbers = #tpu.dot_dimension_numbers<[1], [0], [0], [1], [0, 0, 1, 1], [], []>} : vector<64x64xf32>, vector<64x32xf32>, vector<64x32xf32> -> vector<64x32xf32>
    %cst_42 = arith.constant 1.000000e+00 : f32
    %54 = vector.broadcast %cst_42 : f32 to vector<64x1xf32>
    %55 = arith.divf %54, %52 : vector<64x1xf32>
    %56 = vector.broadcast %55 : vector<64x1xf32> to vector<64x32xf32>
    %57 = arith.mulf %53, %56 : vector<64x32xf32>
    %58 = tpu.concatenate %29, %57 in 1 : vector<64x32xf32>, vector<64x32xf32> -> vector<64x64xf32>
    %c0_43 = arith.constant 0 : index
    %c0_44 = arith.constant 0 : index
    %c0_45 = arith.constant 0 : index
    %59 = vector.load %arg7[%c0_43, %c0_44, %c0_45] : memref<1x64x64xf32, #tpu.memory_space<vmem>>, vector<1x64x64xf32>
    %60 = vector.shape_cast %59 : vector<1x64x64xf32> to vector<64x64xf32>
    %61 = vector.shape_cast %58 : vector<64x64xf32> to vector<1x64x64xf32>
    tpu.vector_store %arg7[%c0_43, %c0_44, %c0_45], %61 {strides = array<i32>} : memref<1x64x64xf32, #tpu.memory_space<vmem>>, vector<1x64x64xf32>,
    return
  }
  func.func @transform_0(%arg0: i32, %arg1: i32) -> (i32, i32, i32, i32) {
    %c0_i32 = arith.constant 0 : i32
    %c0_i32_0 = arith.constant 0 : i32
    %c0_i32_1 = arith.constant 0 : i32
    return %arg0, %c0_i32, %arg1, %c0_i32_0 : i32, i32, i32, i32
  }
  func.func @transform_1(%arg0: i32, %arg1: i32) -> (i32, i32, i32, i32) {
    %c0_i32 = arith.constant 0 : i32
    %c0_i32_0 = arith.constant 0 : i32
    %c0_i32_1 = arith.constant 0 : i32
    %c0_i32_2 = arith.constant 0 : i32
    return %arg0, %c0_i32, %c0_i32_0, %c0_i32_1 : i32, i32, i32, i32
  }
  func.func @transform_2(%arg0: i32, %arg1: i32) -> (i32, i32, i32, i32) {
    %c0_i32 = arith.constant 0 : i32
    %c0_i32_0 = arith.constant 0 : i32
    %c0_i32_1 = arith.constant 0 : i32
    %c0_i32_2 = arith.constant 0 : i32
    return %arg0, %c0_i32, %c0_i32_0, %c0_i32_1 : i32, i32, i32, i32
  }
  func.func @transform_3(%arg0: i32, %arg1: i32) -> (i32, i32, i32) {
    %c0_i32 = arith.constant 0 : i32
    %c0_i32_0 = arith.constant 0 : i32
    %c0_i32_1 = arith.constant 0 : i32
    %c0_i32_2 = arith.constant 0 : i32
    return %c0_i32, %c0_i32_0, %c0_i32_1 : i32, i32, i32
  }
  func.func @transform_4(%arg0: i32, %arg1: i32) -> (i32, i32, i32) {
    %c0_i32 = arith.constant 0 : i32
    %c0_i32_0 = arith.constant 0 : i32
    %c0_i32_1 = arith.constant 0 : i32
    return %arg1, %c0_i32, %c0_i32_0 : i32, i32, i32
  }
  func.func @transform_5(%arg0: i32, %arg1: i32) -> (i32, i32, i32) {
    %c0_i32 = arith.constant 0 : i32
    %c0_i32_0 = arith.constant 0 : i32
    return %arg0, %arg1, %c0_i32 : i32, i32, i32
  }
}

</mosaic_0001>

<bundles_post_ra>
// kernel: tpu_custom_call.1
= control target key start
LH: loop header
LB: loop body
LE: loop exit
PB: predicated region body
PF: predicated region fallthrough
CT: control target
= control target key end

     0   :  { %10 = vsyncpa [#allocation3], 0  ;;  %s15378_s0 = inlined_call_operand.vmem [shape: f32[2,2,64,32], index: 0, kind: input, shape index: {}]   ;;  %s15379_s1 = inlined_call_operand.vmem [shape: f32[2,2,64,32], index: 1, kind: input, shape index: {}]   ;;  %s15380_s2 = inlined_call_operand.vmem [shape: f32[2,2,64,32], index: 2, kind: input, shape index: {}]   ;;  %s15381_s3 = inlined_call_operand.vmem [shape: f32[8,64,32], index: 3, kind: input, shape index: {}]   ;;  %s15382_s4 = inlined_call_operand.vmem [shape: f32[8,64,32], index: 4, kind: input, shape index: {}]   ;;  %s15383_s5 = inlined_call_operand.hbm [shape: f32[2,64,64], index: 5, kind: output, shape index: {}]  }
   0x1   :  { %12 = vsyncpa [#allocation3 + $0x1], 0  ;;  %s12450_s18 = smov 0   ;;  %s12452_s19 = smov 0  }
   0x2   :  { %s12454_s20 = smov 0   ;;  %s12456_s21 = smov 0  }
   0x3   :  { %s12458_s22 = smov 0   ;;  %s12460_s23 = smov 0  }
   0x4 LB: > { %s10158_s24 = sadd.s32 4294967295, %s12409_s23   ;;  %s10159_s25 = sadd.s32 4294967294, %s12409_s23   ;;  %s12409_s23 = sphi %s12460_s23, %s18_s23   ;;  %s12405_s22 = sphi %s12458_s22, %s15547_s22   ;;  %s12401_s21 = sphi %s12456_s21, %s15546_s21   ;;  %s12397_s20 = sphi %s12454_s20, %s15545_s20   ;;  %s12393_s19 = sphi %s12452_s19, %s15544_s19   ;;  %s12389_s18 = sphi %s12450_s18, %s15543_s18  }
   0x5   : > { %s30_s26 = sadd.s32 1, %s12405_s22  ;;  %s166_s27 = sadd.s32 1, %s12397_s20 }
   0x6   : > { %p32_p0 = scmp.ge.s32.totalorder %s30_s26, 2  ;;  %p176_p1 = scmp.ne.s32.totalorder %s12397_s20, %s12393_s19 }
   0x7   : > { %p177_p2 = scmp.eq.s32.totalorder %s10158_s24, 1  ;;  %p182_p3 = scmp.ne.s32.totalorder %s12393_s19, %s12389_s18 }
   0x8   : > { %s15549_s26 = smov (%p32_p0, %s30_s26), 0  ;;  %p183_p5 = scmp.eq.s32.totalorder %s10159_s25, 1 }
   0x9   : > { %p12490_p4 = por %p177_p2, %p176_p1  ;;  %s161_s29 = ssub.s32 %s12405_s22, %s15549_s26 }
   0xa   : > { %p10163_p6 = scmp.ge.s32.totalorder %s12409_s23, 1  ;;  %p164_p7 = scmp.eq.s32.totalorder %s161_s29, 0 }
   0xb   : > { %p12497_p8 = por %p183_p5, %p182_p3  ;;  %p243_p9 = scmp.lt.s32.totalorder %s12409_s23, 3 }
   0xc   : > { %s12503_s6 = scalar_select %p164_p7, %s12397_s20, %s166_s27  }
   0xd   : > { %p244_p10 = pnand %p10163_p6, %p243_p9 }
   0xf   : > { %247 = sbr.rel (%p244_p10) target bundleno = 2070 (0x816), region = 40 }
  0x16   : > { %p292_p11 = scmp.lt.s32.totalorder %s12401_s21, 1  ;;  %v12411_v28 = vmov 1983009808   ;;  %v732_v30 = vlaneseq  ;;  %v12412_v38 = vmov 1934713408   ;;  %vm2839_vm0 = vcmask 261120  }
  0x17   : > { %v730_v29 = vunpack.c.l.s4 %v12411_v28  ;;  %v794_v39 = vunpack.c.l.s4 %v12412_v38  ;;  %vm13417_vm1 = vmpackc.low %vm2839_vm0, %vm2839_vm0  ;;  %vm12414_vm2 = vmmov 0   ;;  %vm5177_vm3 = vcmask 523264   ;;  %s10523_s9 = sshll.u32 %s12401_s21, 10  ;;  %s12417_s17 = smov [#allocation2]  }
  0x18   : > { %s293_s7 = scalar_select %p292_p11, %s12401_s21, 1  ;;  %v733_v34 = vshrl.u32 %v732_v30, 7 }
  0x19   : > { %v731_v33 = vunpack.c.0.s8 %v730_v29  ;;  %v795_v45 = vunpack.c.0.s8 %v794_v39  ;;  %s15320_s14 = scalar_lea.hbm %s15383_s5, %s10523_s9  ;;  %s12335_s24 = sshll.u32 %s12417_s17, 4  ;;  %s12336_s24 = int_to_ptr.vmem [resolvable:$false] %s12335_s24 }
  0x1a   : > { %s12507_s8 = sshll.u32 %s293_s7, 7  ;;  %s12337_s25 = scalar_lea.vmem %s12336_s24, 2048 }
  0x1b   : > { %s12513_s11 = scalar_lea.vmem %s15378_s0, %s12507_s8  ;;  %v12559_v40 = vsub.s32 %v731_v33, %v733_v34  ;;  %v12565_v55 = vsub.s32 %v795_v45, %v733_v34  ;;  %s14015_s15 = scalar_lea.vmem %s15379_s1, %s12507_s8 }
  0x1c   : > { %v449_v0 = vld [vmem:[%s12513_s11 + $0x10] sm:$0xff]  ;;  %v447_v1 = vld [vmem:[%s12513_s11] sm:$0xff]  ;;  %v450_v2 = vld [vmem:[%s12513_s11 + $0x18] sm:$0xff]  ;;  %s14093_s13 = scalar_lea.vmem %s15380_s2, %s12507_s8 }
  0x1d   : > { %535 = vxpose.xlu1.b32.start.end [1/1] (short) (narrow) %v449_v0, 32  ;;  %471 = vxpose.xlu0.b32.start.end [1/1] (short) (narrow) %v447_v1, 32  ;;  %v448_v3 = vld [vmem:[%s12513_s11 + $0x8] sm:$0xff]  ;;  %v451_v5 = vld [vmem:[%s12513_s11 + $0x20] sm:$0xff]  ;;  %v454_v6 = vld [vmem:[%s12513_s11 + $0x38] sm:$0xff]  ;;  %15432 = vst [vmem:[#allocation5_spill] sm:$0xff] %v12559_v40 }
  0x1e   : > { %v452_v4 = vld [vmem:[%s12513_s11 + $0x28] sm:$0xff]  ;;  %v453_v7 = vld [vmem:[%s12513_s11 + $0x30] sm:$0xff] }
  0x2a   : > { %567 = vxpose.xlu1.b32.start.end [1/1] (short) (narrow) %v450_v2, 32  ;;  %503 = vxpose.xlu0.b32.start.end [1/1] (short) (narrow) %v448_v3, 32 }
  0x37   : > { %631 = vxpose.xlu1.b32.start.end [1/1] (short) (narrow) %v452_v4, 32  ;;  %599 = vxpose.xlu0.b32.start.end [1/1] (short) (narrow) %v451_v5, 32 }
  0x44   : > { %695 = vxpose.xlu1.b32.start.end [1/1] (short) (narrow) %v454_v6, 32  ;;  %663 = vxpose.xlu0.b32.start.end [1/1] (short) (narrow) %v453_v7, 32 }
  0x9d   : > { %v551_v8 = vpop.trf.xlu1  ;;  %v487_v9 = vpop.trf.xlu0 }
  0x9e   : > { %v727_v41 = vcombine.low %v487_v9, %v551_v8  ;;  %v728_v56 = vcombine.high %v487_v9, %v551_v8 }
  0xa0   : > { %v735_v48 = vrot.slane %v727_v41, %v12559_v40  ;;  %v742_v3 = vrot.slane %v728_v56, %v12559_v40 }
  0xa1   : > { %v12523_v10 = vpop.trf.xlu1  ;;  %v12525_v11 = vpop.trf.xlu0 }
  0xa5   : > { %v12527_v12 = vpop.trf.xlu1  ;;  %v12529_v13 = vpop.trf.xlu0 }
  0xa9   : > { %v12531_v14 = vpop.trf.xlu1  ;;  %v12533_v15 = vpop.trf.xlu0 }
  0xad   : > { %v583_v16 = vpop.trf.xlu1  ;;  %v519_v17 = vpop.trf.xlu0 }
  0xae   : > { %v743_v35 = vcombine.low %v519_v17, %v583_v16  ;;  %v744_v53 = vcombine.high %v519_v17, %v583_v16 }
  0xb0   : > { %v751_v42 = vrot.slane %v743_v35, %v12559_v40  ;;  %v758_v63 = vrot.slane %v744_v53, %v12559_v40 }
  0xb1   : > { %v12535_v18 = vpop.trf.xlu1  ;;  %v12537_v19 = vpop.trf.xlu0 }
  0xb2   : > { %v791_v54 = vcombine.low %v735_v48, %v751_v42  ;;  %v792_v2 = vcombine.high %v735_v48, %v751_v42  ;;  %v879_v16 = vcombine.low %v12537_v19, %v12535_v18  ;;  %v808_v41 = vcombine.high %v742_v3, %v758_v63 }
  0xb4   : > { %v799_v0 = vrot.slane %v791_v54, %v12565_v55  ;;  %v806_v17 = vrot.slane %v792_v2, %v12565_v55  ;;  %v887_v38 = vrot.slane %v879_v16, %v12559_v40 }
  0xb5   : > { %v12539_v20 = vpop.trf.xlu1  ;;  %v12541_v21 = vpop.trf.xlu0 }
  0xb6   : > { %v1015_v2 = vcombine.low %v12541_v21, %v12539_v20 }
  0xb9   : > { %v12543_v22 = vpop.trf.xlu1  ;;  %v12545_v23 = vpop.trf.xlu0 }
  0xbd   : > { %v647_v24 = vpop.trf.xlu1  ;;  %v615_v25 = vpop.trf.xlu0 }
  0xc1   : > { %v12547_v26 = vpop.trf.xlu1  ;;  %v12549_v27 = vpop.trf.xlu0 }
  0xc5   : > { %v12551_v31 = vpop.trf.xlu1  ;;  %v12553_v32 = vpop.trf.xlu0 }
  0xc9   : > { %v12555_v36 = vpop.trf.xlu1  ;;  %v12557_v37 = vpop.trf.xlu0 }
  0xcd   : > { %v711_v43 = vpop.trf.xlu1  ;;  %v679_v44 = vpop.trf.xlu0 }
  0xce   : > { %v775_v46 = vcombine.low %v647_v24, %v711_v43  ;;  %v759_v47 = vcombine.low %v615_v25, %v679_v44  ;;  %v776_v49 = vcombine.high %v647_v24, %v711_v43  ;;  %v760_v50 = vcombine.high %v615_v25, %v679_v44 }
  0xcf   : > { %v807_v24 = vcombine.low %v742_v3, %v758_v63  ;;  %v863_v25 = vcombine.low %v12525_v11, %v12523_v10 }
  0xd0   : > { %v783_v51 = vrot.slane %v775_v46, %v12559_v40  ;;  %v767_v52 = vrot.slane %v759_v47, %v12559_v40  ;;  %v790_v57 = vrot.slane %v776_v49, %v12559_v40  ;;  %v774_v58 = vrot.slane %v760_v50, %v12559_v40 }
  0xd1   : > { %v712_v59 = vpop.trf.xlu1  ;;  %v680_v60 = vpop.trf.xlu0  ;;  %v815_v39 = vrot.slane %v807_v24, %v12565_v55  ;;  %v871_v42 = vrot.slane %v863_v25, %v12559_v40  ;;  %v880_v49 = vcombine.high %v12537_v19, %v12535_v18  ;;  %v822_v50 = vrot.slane %v808_v41, %v12565_v55 }
  0xd2   : > { %v823_v61 = vcombine.low %v767_v52, %v783_v51  ;;  %v824_v62 = vcombine.high %v767_v52, %v783_v51  ;;  %v911_v4 = vcombine.low %v12547_v26, %v712_v59  ;;  %v895_v5 = vcombine.low %v12549_v27, %v680_v60 }
  0xd3   : > { %v839_v9 = vcombine.low %v774_v58, %v790_v57  ;;  %v840_v29 = vcombine.high %v774_v58, %v790_v57  ;;  %v912_v43 = vcombine.high %v12547_v26, %v712_v59  ;;  %v896_v44 = vcombine.high %v12549_v27, %v680_v60 }
  0xd4   : > { %v831_v1 = vrot.slane %v823_v61, %v12565_v55  ;;  %v838_v8 = vrot.slane %v824_v62, %v12565_v55  ;;  %v919_v28 = vrot.slane %v911_v4, %v12559_v40  ;;  %v903_v30 = vrot.slane %v895_v5, %v12559_v40 }
  0xd5   : > { %v847_v35 = vrot.slane %v839_v9, %v12565_v55  ;;  %v854_v47 = vrot.slane %v840_v29, %v12565_v55  ;;  %v927_v51 = vcombine.low %v871_v42, %v887_v38  ;;  %v864_v52 = vcombine.high %v12525_v11, %v12523_v10  ;;  %v713_v53 = vpop.trf.xlu1  ;;  %v681_v54 = vpop.trf.xlu0 }
  0xd6   : > { %v856_v6 = vcombine.high %v799_v0, %v831_v1  ;;  %v855_v7 = vcombine.low %v799_v0, %v831_v1  ;;  %v858_v33 = vcombine.high %v806_v17, %v838_v8  ;;  %v857_v34 = vcombine.low %v806_v17, %v838_v8 }
  0xd7   : > { %v860_v45 = vcombine.high %v815_v39, %v847_v35  ;;  %v859_v46 = vcombine.low %v815_v39, %v847_v35  ;;  %v959_v48 = vcombine.low %v903_v30, %v919_v28  ;;  %v926_v26 = vrot.slane %v912_v43, %v12559_v40 }
  0xd8   : > { %1303 = vxpose.xlu1.b32.start.end [1/1] (short) (narrow) %v856_v6, 8  ;;  %1271 = vxpose.xlu0.b32.start.end [1/1] (short) (narrow) %v855_v7, 8  ;;  %v910_v27 = vrot.slane %v896_v44, %v12559_v40  ;;  %v862_v56 = vcombine.high %v822_v50, %v854_v47  ;;  %v861_v57 = vcombine.low %v822_v50, %v854_v47 }
  0xd9   : > { %v967_v58 = vrot.slane %v959_v48, %v12565_v55  ;;  %v960_v59 = vcombine.high %v903_v30, %v919_v28  ;;  %v894_v18 = vrot.slane %v880_v49, %v12559_v40  ;;  %v935_v19 = vrot.slane %v927_v51, %v12565_v55 }
  0xda   : > { %v928_v60 = vcombine.high %v871_v42, %v887_v38  ;;  %v878_v10 = vrot.slane %v864_v52, %v12559_v40  ;;  %v1047_v11 = vcombine.low %v12551_v31, %v713_v53  ;;  %v1031_v61 = vcombine.low %v12553_v32, %v681_v54 }
  0xdb   : > { %v992_v62 = vcombine.high %v935_v19, %v967_v58  ;;  %v991_v63 = vcombine.low %v935_v19, %v967_v58  ;;  %v974_v0 = vrot.slane %v960_v59, %v12565_v55  ;;  %v975_v1 = vcombine.low %v910_v27, %v926_v26 }
  0xdc   : > { %1367 = vxpose.xlu1.b32.start.end [1/1] (short) (narrow) %v858_v33, 8  ;;  %1335 = vxpose.xlu0.b32.start.end [1/1] (short) (narrow) %v857_v34, 8  ;;  %v942_v3 = vrot.slane %v928_v60, %v12565_v55  ;;  %v943_v4 = vcombine.low %v878_v10, %v894_v18  ;;  %v999_v5 = vcombine.low %v12529_v13, %v12527_v12 }
  0xdd   : > { %v1055_v6 = vrot.slane %v1047_v11, %v12559_v40  ;;  %v1039_v7 = vrot.slane %v1031_v61, %v12559_v40  ;;  %v983_v16 = vrot.slane %v975_v1, %v12565_v55  ;;  %v976_v17 = vcombine.high %v910_v27, %v926_v26 }
  0xde   : > { %v994_v8 = vcombine.high %v942_v3, %v974_v0  ;;  %v993_v9 = vcombine.low %v942_v3, %v974_v0  ;;  %v1023_v24 = vrot.slane %v1015_v2, %v12559_v40  ;;  %v951_v25 = vrot.slane %v943_v4, %v12565_v55 }
  0xdf   : > { %v944_v28 = vcombine.high %v878_v10, %v894_v18  ;;  %v1007_v29 = vrot.slane %v999_v5, %v12559_v40  ;;  %v1048_v30 = vcombine.high %v12551_v31, %v713_v53  ;;  %v1032_v33 = vcombine.high %v12553_v32, %v681_v54 }
  0xe0   : > { %1431 = vxpose.xlu1.b32.start.end [1/1] (short) (narrow) %v860_v45, 8  ;;  %1399 = vxpose.xlu0.b32.start.end [1/1] (short) (narrow) %v859_v46, 8  ;;  %v996_v34 = vcombine.high %v951_v25, %v983_v16  ;;  %v995_v35 = vcombine.low %v951_v25, %v983_v16  ;;  %v990_v38 = vrot.slane %v976_v17, %v12565_v55  ;;  %v714_v45 = vpop.trf.xlu1  ;;  %v682_v46 = vpop.trf.xlu0 }
  0xe1   : > { %v1095_v39 = vcombine.low %v1039_v7, %v1055_v6  ;;  %v1016_v41 = vcombine.high %v12541_v21, %v12539_v20  ;;  %v958_v42 = vrot.slane %v944_v28, %v12565_v55  ;;  %v1063_v43 = vcombine.low %v1007_v29, %v1023_v24 }
  0xe2   : > { %v1000_v44 = vcombine.high %v12529_v13, %v12527_v12  ;;  %v1062_v31 = vrot.slane %v1048_v30, %v12559_v40  ;;  %v1046_v32 = vrot.slane %v1032_v33, %v12559_v40  ;;  %v1096_v50 = vcombine.high %v1039_v7, %v1055_v6 }
  0xe3   : > { %v998_v47 = vcombine.high %v958_v42, %v990_v38  ;;  %v997_v48 = vcombine.low %v958_v42, %v990_v38  ;;  %v1103_v49 = vrot.slane %v1095_v39, %v12565_v55  ;;  %v1030_v20 = vrot.slane %v1016_v41, %v12559_v40 }
  0xe4   : > { %1495 = vxpose.xlu1.b32.start.end [1/1] (short) (narrow) %v862_v56, 8  ;;  %1463 = vxpose.xlu0.b32.start.end [1/1] (short) (narrow) %v861_v57, 8  ;;  %v1071_v21 = vrot.slane %v1063_v43, %v12565_v55  ;;  %v1064_v51 = vcombine.high %v1007_v29, %v1023_v24  ;;  %v1014_v12 = vrot.slane %v1000_v44, %v12559_v40 }
  0xe5   : > { %v1183_v13 = vcombine.low %v12555_v36, %v714_v45  ;;  %v1167_v52 = vcombine.low %v12557_v37, %v682_v46  ;;  %v1110_v53 = vrot.slane %v1096_v50, %v12565_v55  ;;  %v1111_v54 = vcombine.low %v1046_v32, %v1062_v31 }
  0xe6   : > { %v1128_v26 = vcombine.high %v1071_v21, %v1103_v49  ;;  %v1127_v27 = vcombine.low %v1071_v21, %v1103_v49  ;;  %v1151_v56 = vcombine.low %v12545_v23, %v12543_v22  ;;  %v1078_v57 = vrot.slane %v1064_v51, %v12565_v55  ;;  %v10332_v21 = vld [vmem:[%s12513_s11 + $0x48] sm:$0xff]  ;;  %v10334_v51 = vld [vmem:[%s12513_s11 + $0x58] sm:$0xff] }
  0xe7   : > { %v1079_v58 = vcombine.low %v1014_v12, %v1030_v20  ;;  %v1135_v59 = vcombine.low %v12533_v15, %v12531_v14  ;;  %v1191_v18 = vrot.slane %v1183_v13, %v12559_v40  ;;  %v1175_v19 = vrot.slane %v1167_v52, %v12559_v40  ;;  %v319_v13 = vld [vmem:[%s15381_s3] sm:$0xff] }
  0xe8   : > { %1559 = vxpose.xlu1.b32.start.end [1/1] (short) (narrow) %v992_v62, 8  ;;  %1527 = vxpose.xlu0.b32.start.end [1/1] (short) (narrow) %v991_v63, 8  ;;  %v1130_v60 = vcombine.high %v1078_v57, %v1110_v53  ;;  %v1129_v10 = vcombine.low %v1078_v57, %v1110_v53  ;;  %v1119_v11 = vrot.slane %v1111_v54, %v12565_v55  ;;  %v327_v52 = vld [vmem:[%s15381_s3 + $0x40] sm:$0xff]  ;;  %v10338_v53 = vld [vmem:[%s12513_s11 + $0x78] sm:$0xff]  ;;  %v10337_v54 = vld [vmem:[%s12513_s11 + $0x70] sm:$0xff] }
  0xe9   : > { %v1112_v61 = vcombine.high %v1046_v32, %v1062_v31  ;;  %v1159_v62 = vrot.slane %v1151_v56, %v12559_v40  ;;  %v1087_v63 = vrot.slane %v1079_v58, %v12565_v55  ;;  %v1080_v0 = vcombine.high %v1014_v12, %v1030_v20  ;;  %v10331_v20 = vld [vmem:[%s12513_s11 + $0x40] sm:$0xff]  ;;  %v10333_v12 = vld [vmem:[%s12513_s11 + $0x50] sm:$0xff]  ;;  %10932 = vmatprep.mubr.msk.f32.mxu0 %vm2839_vm0, %v319_v13 }
  0xea   : > { %v1143_v1 = vrot.slane %v1135_v59, %v12559_v40  ;;  %v1184_v2 = vcombine.high %v12555_v36, %v714_v45  ;;  %v1168_v3 = vcombine.high %v12557_v37, %v682_v46  ;;  %v1231_v7 = vcombine.low %v1175_v19, %v1191_v18  ;;  %10952 = vmatprep.mubr.msk.f32.mxu1 %vm2839_vm0, %v327_v52 }
  0xeb   : > { %v1132_v4 = vcombine.high %v1087_v63, %v1119_v11  ;;  %v1131_v5 = vcombine.low %v1087_v63, %v1119_v11  ;;  %v1126_v6 = vrot.slane %v1112_v61, %v12565_v55  ;;  %v1136_v17 = vcombine.high %v12533_v15, %v12531_v14 }
  0xec   : > { %1623 = vxpose.xlu1.b32.start.end [1/1] (short) (narrow) %v994_v8, 8  ;;  %1591 = vxpose.xlu0.b32.start.end [1/1] (short) (narrow) %v993_v9, 8  ;;  %v1152_v8 = vcombine.high %v12545_v23, %v12543_v22  ;;  %v1094_v9 = vrot.slane %v1080_v0, %v12565_v55  ;;  %v1199_v16 = vcombine.low %v1143_v1, %v1159_v62 }
  0xed   : > { %v1198_v36 = vrot.slane %v1184_v2, %v12559_v40  ;;  %v1182_v37 = vrot.slane %v1168_v3, %v12559_v40  ;;  %v1239_v28 = vrot.slane %v1231_v7, %v12565_v55  ;;  %v1232_v29 = vcombine.high %v1175_v19, %v1191_v18 }
  0xee   : > { %v1134_v24 = vcombine.high %v1094_v9, %v1126_v6  ;;  %v1133_v25 = vcombine.low %v1094_v9, %v1126_v6  ;;  %v1166_v30 = vrot.slane %v1152_v8, %v12559_v40  ;;  %v1207_v22 = vrot.slane %v1199_v16, %v12565_v55 }
  0xef   : > { %v1200_v23 = vcombine.high %v1143_v1, %v1159_v62  ;;  %v1150_v33 = vrot.slane %v1136_v17, %v12559_v40  ;;  %v1246_v15 = vrot.slane %v1232_v29, %v12565_v55  ;;  %v1248_v44 = vcombine.high %v1182_v37, %v1198_v36 }
  0xf0   : > { %1687 = vxpose.xlu1.b32.start.end [1/1] (short) (narrow) %v996_v34, 8  ;;  %1655 = vxpose.xlu0.b32.start.end [1/1] (short) (narrow) %v995_v35, 8  ;;  %v1264_v34 = vcombine.high %v1207_v22, %v1239_v28  ;;  %v1263_v14 = vcombine.low %v1207_v22, %v1239_v28  ;;  %v1247_v35 = vcombine.low %v1182_v37, %v1198_v36 }
  0xf1   : > { %v1214_v38 = vrot.slane %v1200_v23, %v12565_v55  ;;  %v1215_v39 = vcombine.low %v1150_v33, %v1166_v30  ;;  %v1216_v32 = vcombine.high %v1150_v33, %v1166_v30 }
  0xf2   : > { %v1255_v43 = vrot.slane %v1247_v35, %v12565_v55 }
  0xf3   : > { %v1266_v41 = vcombine.high %v1214_v38, %v1246_v15  ;;  %v1265_v42 = vcombine.low %v1214_v38, %v1246_v15  ;;  %v1223_v31 = vrot.slane %v1215_v39, %v12565_v55 }
  0xf4   : > { %1751 = vxpose.xlu1.b32.start.end [1/1] (short) (narrow) %v998_v47, 8  ;;  %1719 = vxpose.xlu0.b32.start.end [1/1] (short) (narrow) %v997_v48, 8  ;;  %v1262_v47 = vrot.slane %v1248_v44, %v12565_v55  ;;  %v1230_v48 = vrot.slane %v1216_v32, %v12565_v55 }
  0xf5   : > { %v1268_v45 = vcombine.high %v1223_v31, %v1255_v43  ;;  %v1267_v46 = vcombine.low %v1223_v31, %v1255_v43 }
  0xf6   : > { %v1270_v49 = vcombine.high %v1230_v48, %v1262_v47  ;;  %v1269_v50 = vcombine.low %v1230_v48, %v1262_v47 }
  0xf8   : > { %1815 = vxpose.xlu1.b32.start.end [1/1] (short) (narrow) %v1128_v26, 8  ;;  %1783 = vxpose.xlu0.b32.start.end [1/1] (short) (narrow) %v1127_v27, 8  ;;  %v10336_v26 = vld [vmem:[%s12513_s11 + $0x68] sm:$0xff]  ;;  %v10335_v27 = vld [vmem:[%s12513_s11 + $0x60] sm:$0xff] }
  0xfc   : > { %1879 = vxpose.xlu1.b32.start.end [1/1] (short) (narrow) %v1130_v60, 8  ;;  %1847 = vxpose.xlu0.b32.start.end [1/1] (short) (narrow) %v1129_v10, 8 }
 0x100   : > { %1943 = vxpose.xlu1.b32.start.end [1/1] (short) (narrow) %v1132_v4, 8  ;;  %1911 = vxpose.xlu0.b32.start.end [1/1] (short) (narrow) %v1131_v5, 8 }
 0x104   : > { %2007 = vxpose.xlu1.b32.start.end [1/1] (short) (narrow) %v1134_v24, 8  ;;  %1975 = vxpose.xlu0.b32.start.end [1/1] (short) (narrow) %v1133_v25, 8 }
 0x108   : > { %2071 = vxpose.xlu1.b32.start.end [1/1] (short) (narrow) %v1264_v34, 8  ;;  %2039 = vxpose.xlu0.b32.start.end [1/1] (short) (narrow) %v1263_v14, 8 }
 0x10c   : > { %2135 = vxpose.xlu1.b32.start.end [1/1] (short) (narrow) %v1266_v41, 8  ;;  %2103 = vxpose.xlu0.b32.start.end [1/1] (short) (narrow) %v1265_v42, 8 }
 0x110   : > { %2199 = vxpose.xlu1.b32.start.end [1/1] (short) (narrow) %v1268_v45, 8  ;;  %2167 = vxpose.xlu0.b32.start.end [1/1] (short) (narrow) %v1267_v46, 8 }
 0x114   : > { %2263 = vxpose.xlu1.b32.start.end [1/1] (short) (narrow) %v1270_v49, 8  ;;  %2231 = vxpose.xlu0.b32.start.end [1/1] (short) (narrow) %v1269_v50, 8 }
 0x118   : > { %5430 = vxpose.xlu1.b32.start.end [1/1] (short) (narrow) %v10331_v20, 32  ;;  %5462 = vxpose.xlu0.b32.start.end [1/1] (short) (narrow) %v10332_v21, 32 }
 0x125   : > { %5526 = vxpose.xlu1.b32.start.end [1/1] (short) (narrow) %v10334_v51, 32  ;;  %5494 = vxpose.xlu0.b32.start.end [1/1] (short) (narrow) %v10333_v12, 32 }
 0x132   : > { %5590 = vxpose.xlu1.b32.start.end [1/1] (short) (narrow) %v10336_v26, 32  ;;  %5558 = vxpose.xlu0.b32.start.end [1/1] (short) (narrow) %v10335_v27, 32 }
 0x13f   : > { %5654 = vxpose.xlu1.b32.start.end [1/1] (short) (narrow) %v10338_v53, 32  ;;  %5622 = vxpose.xlu0.b32.start.end [1/1] (short) (narrow) %v10337_v54, 32 }
 0x158   : > { %v12679_v56 = vpop.trf.xlu1  ;;  %v12681_v57 = vpop.trf.xlu0 }
 0x15c   : > { %v12683_v58 = vpop.trf.xlu1  ;;  %v12685_v59 = vpop.trf.xlu0 }
 0x15d   : > { %v2311_v2 = vcombine.low %v12679_v56, %v12683_v58  ;;  %v2295_v3 = vcombine.low %v12681_v57, %v12685_v59  ;;  %v2312_v13 = vcombine.high %v12679_v56, %v12683_v58  ;;  %v2296_v52 = vcombine.high %v12681_v57, %v12685_v59 }
 0x15f   : > { %v12726_v16 = vrot.slane %v2311_v2, %v12559_v40  ;;  %v12729_v17 = vrot.slane %v2295_v3, %v12559_v40  ;;  %v12800_v56 = vrot.slane %v2312_v13, %v12559_v40  ;;  %v12807_v59 = vrot.slane %v2296_v52, %v12559_v40 }
 0x160   : > { %v12687_v18 = vpop.trf.xlu1  ;;  %v12689_v19 = vpop.trf.xlu0 }
 0x161   : > { %v2359_v14 = vcombine.low %v12729_v17, %v12726_v16 }
 0x163   : > { %v2367_v43 = vrot.slane %v2359_v14, %v12565_v55 }
 0x164   : > { %v12691_v60 = vpop.trf.xlu1  ;;  %v12693_v10 = vpop.trf.xlu0 }
 0x165   : > { %v2343_v0 = vcombine.low %v12687_v18, %v12691_v60  ;;  %v2327_v1 = vcombine.low %v12689_v19, %v12693_v10  ;;  %v2344_v26 = vcombine.high %v12687_v18, %v12691_v60  ;;  %v2328_v27 = vcombine.high %v12689_v19, %v12693_v10 }
 0x167   : > { %v12720_v8 = vrot.slane %v2343_v0, %v12559_v40  ;;  %v12723_v9 = vrot.slane %v2327_v1, %v12559_v40  ;;  %v12810_v18 = vrot.slane %v2344_v26, %v12559_v40  ;;  %v12817_v10 = vrot.slane %v2328_v27, %v12559_v40 }
 0x168   : > { %v12695_v11 = vpop.trf.xlu1  ;;  %v12697_v61 = vpop.trf.xlu0 }
 0x169   : > { %v2391_v30 = vcombine.low %v12723_v9, %v12720_v8  ;;  %v2392_v2 = vcombine.high %v12723_v9, %v12720_v8 }
 0x16b   : > { %v2399_v38 = vrot.slane %v2391_v30, %v12565_v55 }
 0x16c   : > { %v12699_v62 = vpop.trf.xlu1  ;;  %v12701_v63 = vpop.trf.xlu0 }
 0x16d   : > { %v2447_v4 = vcombine.low %v12695_v11, %v12699_v62  ;;  %v2431_v5 = vcombine.low %v12697_v61, %v12701_v63  ;;  %v2423_v31 = vcombine.low %v2367_v43, %v2399_v38  ;;  %v2424_v45 = vcombine.high %v2367_v43, %v2399_v38 }
 0x16e   : > { %v2432_v30 = vcombine.high %v12697_v61, %v12701_v63  ;;  %v2375_v61 = vcombine.low %v12807_v59, %v12800_v56 }
 0x16f   : > { %v12732_v36 = vrot.slane %v2447_v4, %v12559_v40  ;;  %v12735_v37 = vrot.slane %v2431_v5, %v12559_v40 }
 0x170   : > { %v12715_v6 = vpop.trf.xlu1  ;;  %v12717_v7 = vpop.trf.xlu0  ;;  %v12886_v13 = vrot.slane %v2375_v61, %v12565_v55 }
 0x171   : > { %v2495_v15 = vcombine.low %v12735_v37, %v12732_v36 }
 0x173   : > { %v2503_v44 = vrot.slane %v2495_v15, %v12565_v55 }
 0x174   : > { %v12737_v24 = vpop.trf.xlu1  ;;  %v12739_v25 = vpop.trf.xlu0 }
 0x175   : > { %v2479_v28 = vcombine.low %v12715_v6, %v12737_v24  ;;  %v2463_v29 = vcombine.low %v12717_v7, %v12739_v25  ;;  %v2480_v14 = vcombine.high %v12715_v6, %v12737_v24  ;;  %v2464_v8 = vcombine.high %v12717_v7, %v12739_v25 }
 0x176   : > { %v2407_v6 = vcombine.low %v12817_v10, %v12810_v18  ;;  %v2496_v7 = vcombine.high %v12735_v37, %v12732_v36 }
 0x177   : > { %v12748_v22 = vrot.slane %v2479_v28, %v12559_v40  ;;  %v12751_v23 = vrot.slane %v2463_v29, %v12559_v40  ;;  %v2448_v29 = vcombine.high %v12695_v11, %v12699_v62  ;;  %v2360_v11 = vcombine.high %v12729_v17, %v12726_v16 }
 0x178   : > { %v12753_v33 = vpop.trf.xlu1  ;;  %v12755_v34 = vpop.trf.xlu0  ;;  %v2406_v16 = vrot.slane %v2392_v2, %v12565_v55  ;;  %v12873_v37 = vrot.slane %v2480_v14, %v12559_v40 }
 0x179   : > { %v2527_v35 = vcombine.low %v12751_v23, %v12748_v22  ;;  %v2528_v9 = vcombine.high %v12751_v23, %v12748_v22  ;;  %v12863_v17 = vrot.slane %v2448_v29, %v12559_v40  ;;  %v12866_v23 = vrot.slane %v2432_v30, %v12559_v40 }
 0x17b   : > { %v2535_v39 = vrot.slane %v2527_v35, %v12565_v55 }
 0x17c   : > { %v12765_v41 = vpop.trf.xlu1  ;;  %v12767_v42 = vpop.trf.xlu0 }
 0x17d   : > { %v2559_v32 = vcombine.low %v2503_v44, %v2535_v39  ;;  %v2560_v46 = vcombine.high %v2503_v44, %v2535_v39  ;;  %v2583_v57 = vcombine.low %v12753_v33, %v12765_v41  ;;  %v2567_v58 = vcombine.low %v12755_v34, %v12767_v42 }
 0x17e   : > { %v12876_v39 = vrot.slane %v2464_v8, %v12559_v40  ;;  %v2542_v44 = vrot.slane %v2528_v9, %v12565_v55 }
 0x17f   : > { %v11660_v49 = vpack.c.bf16 %v2559_v32, %v2423_v31  ;;  %v11668_v50 = vpack.c.bf16 %v2560_v46, %v2424_v45  ;;  %v12842_v15 = vrot.slane %v2583_v57, %v12559_v40  ;;  %v2575_v35 = vrot.slane %v2567_v58, %v12559_v40 }
 0x180   : > { %v12771_v47 = vpop.trf.xlu1  ;;  %v12773_v48 = vpop.trf.xlu0  ;;  %v2374_v46 = vrot.slane %v2360_v11, %v12565_v55  ;;  %v12893_v57 = vrot.slane %v2407_v6, %v12565_v55  ;;  %v2511_v58 = vcombine.low %v12866_v23, %v12863_v17 }
 0x181   : > { %11661 = vmatprep.subr.bf16.mxu0 %v11660_v49  ;;  %11669 = vmatprep.subr.bf16.mxu1 %v11668_v50  ;;  %v2631_v43 = vcombine.low %v2575_v35, %v12842_v15  ;;  %v2632_v9 = vcombine.high %v2575_v35, %v12842_v15 }
 0x182   : > { %11663 = vmatpush3.bf16.msra.mxu0 %v11660_v49  ;;  %11671 = vmatpush3.bf16.msra.mxu1 %v11668_v50  ;;  %v2510_v50 = vrot.slane %v2496_v7, %v12565_v55  ;;  %v2426_v61 = vcombine.high %v2374_v46, %v2406_v16 }
 0x184   : > { %v12775_v20 = vpop.trf.xlu1  ;;  %v12777_v21 = vpop.trf.xlu0  ;;  %v2561_v2 = vcombine.low %v2510_v50, %v2542_v44  ;;  %v2562_v6 = vcombine.high %v2510_v50, %v2542_v44 }
 0x185   : > { %v2615_v53 = vcombine.low %v12771_v47, %v12775_v20  ;;  %v2599_v54 = vcombine.low %v12773_v48, %v12777_v21  ;;  %v2616_v50 = vcombine.high %v12771_v47, %v12775_v20  ;;  %v328_v47 = vld [vmem:[%s15381_s3 + $0x48] sm:$0xff]  ;;  %v2568_v20 = vcombine.high %v12755_v34, %v12767_v42 }
 0x187   : > { %v12822_v3 = vrot.slane %v2615_v53, %v12559_v40  ;;  %v12825_v4 = vrot.slane %v2599_v54, %v12559_v40  ;;  %v2425_v54 = vcombine.low %v2374_v46, %v2406_v16  ;;  %v12960_v34 = vrot.slane %v2616_v50, %v12559_v40 }
 0x188   : > { %v12779_v51 = vpop.trf.xlu1  ;;  %v12781_v12 = vpop.trf.xlu0 }
 0x189   : > { %v2663_v24 = vcombine.low %v12825_v4, %v12822_v3  ;;  %v2664_v29 = vcombine.high %v12825_v4, %v12822_v3  ;;  %v2584_v3 = vcombine.high %v12753_v33, %v12765_v41  ;;  %v11676_v4 = vpack.c.bf16 %v2561_v2, %v2425_v54  ;;  %v329_v2 = vld [vmem:[%s15381_s3 + $0x50] sm:$0xff] }
 0x18a   : > { %v11684_v33 = vpack.c.bf16 %v2562_v6, %v2426_v61  ;;  %v2646_v41 = vrot.slane %v2632_v9, %v12565_v55  ;;  %v330_v9 = vld [vmem:[%s15381_s3 + $0x58] sm:$0xff]  ;;  %v2428_v61 = vcombine.high %v12886_v13, %v12893_v57 }
 0x18b   : > { %v2671_v49 = vrot.slane %v2663_v24, %v12565_v55  ;;  %v2678_v16 = vrot.slane %v2664_v29, %v12565_v55  ;;  %v12990_v6 = vrot.slane %v2584_v3, %v12559_v40  ;;  %v323_v3 = vld [vmem:[%s15381_s3 + $0x20] sm:$0xff] }
 0x18c   : > { %v12795_v0 = vpop.trf.xlu1  ;;  %v12797_v1 = vpop.trf.xlu0 }
 0x18d   : > { %v2719_v19 = vcombine.low %v12779_v51, %v12795_v0  ;;  %v2703_v60 = vcombine.low %v12781_v12, %v12797_v1 }
 0x18f   : > { %v2727_v62 = vrot.slane %v2719_v19, %v12559_v40  ;;  %v2711_v63 = vrot.slane %v2703_v60, %v12559_v40  ;;  %v2543_v19 = vcombine.low %v12876_v39, %v12873_v37  ;;  %v2639_v60 = vrot.slane %v2631_v43, %v12565_v55 }
 0x190   : > { %v12827_v5 = vpop.trf.xlu1  ;;  %v12829_v28 = vpop.trf.xlu0 }
 0x191   : > { %v2767_v31 = vcombine.low %v2711_v63, %v2727_v62  ;;  %v2768_v30 = vcombine.high %v2711_v63, %v2727_v62  ;;  %v2695_v11 = vcombine.low %v2639_v60, %v2671_v49  ;;  %v12913_v62 = vrot.slane %v2511_v58, %v12565_v55 }
 0x192   : > { %v12916_v15 = vrot.slane %v2543_v19, %v12565_v55 }
 0x193   : > { %v2775_v14 = vrot.slane %v2767_v31, %v12565_v55  ;;  %v2782_v44 = vrot.slane %v2768_v30, %v12565_v55 }
 0x194   : > { %v12857_v25 = vpop.trf.xlu1  ;;  %v12859_v22 = vpop.trf.xlu0 }
 0x195   : > { %v2751_v38 = vcombine.low %v12827_v5, %v12857_v25  ;;  %v2735_v36 = vcombine.low %v12829_v28, %v12859_v22  ;;  %v2752_v31 = vcombine.high %v12827_v5, %v12857_v25  ;;  %v2600_v5 = vcombine.high %v12773_v48, %v12777_v21 }
 0x196   : > { %v2704_v25 = vcombine.high %v12781_v12, %v12797_v1  ;;  %v2697_v48 = vcombine.low %v2646_v41, %v2678_v16  ;;  %v2698_v21 = vcombine.high %v2646_v41, %v2678_v16  ;;  %v2564_v1 = vcombine.high %v12913_v62, %v12916_v15  ;;  %v325_v16 = vld [vmem:[%s15381_s3 + $0x30] sm:$0xff] }
 0x197   : > { %v2759_v32 = vrot.slane %v2751_v38, %v12559_v40  ;;  %v2743_v45 = vrot.slane %v2735_v36, %v12559_v40  ;;  %v2696_v36 = vcombine.high %v2639_v60, %v2671_v49  ;;  %v321_v60 = vld [vmem:[%s15381_s3 + $0x10] sm:$0xff]  ;;  %v12971_v29 = vrot.slane %v2600_v5, %v12559_v40 }
 0x198   : > { %v12888_v52 = vpop.trf.xlu1  ;;  %v12890_v26 = vpop.trf.xlu0  ;;  %v2376_v5 = vcombine.high %v12807_v59, %v12800_v56  ;;  %v336_v59 = vld [vmem:[%s15381_s3 + $0x88] sm:$0xff] }
 0x199   : > { %v2799_v27 = vcombine.low %v2743_v45, %v2759_v32  ;;  %v2800_v53 = vcombine.high %v2743_v45, %v2759_v32  ;;  %v2736_v45 = vcombine.high %v12829_v28, %v12859_v22  ;;  %v2720_v28 = vcombine.high %v12779_v51, %v12795_v0  ;;  %v320_v22 = vld [vmem:[%s15381_s3 + $0x8] sm:$0xff] }
 0x19a   : > { %v12946_v51 = vrot.slane %v2752_v31, %v12559_v40  ;;  %v2563_v0 = vcombine.low %v12913_v62, %v12916_v15  ;;  %v2679_v62 = vcombine.low %v12971_v29, %v12960_v34  ;;  %v2544_v31 = vcombine.high %v12876_v39, %v12873_v37  ;;  %v326_v39 = vld [vmem:[%s15381_s3 + $0x38] sm:$0xff] }
 0x19b   : > { %v2807_v8 = vrot.slane %v2799_v27, %v12565_v55  ;;  %v2814_v32 = vrot.slane %v2800_v53, %v12565_v55  ;;  %v12949_v12 = vrot.slane %v2736_v45, %v12559_v40  ;;  %v12974_v30 = vrot.slane %v2720_v28, %v12559_v40 }
 0x19c   : > { %v12905_v7 = vpop.trf.xlu1  ;;  %v12907_v24 = vpop.trf.xlu0  ;;  %v2512_v37 = vcombine.high %v12866_v23, %v12863_v17  ;;  %v335_v17 = vld [vmem:[%s15381_s3 + $0x80] sm:$0xff] }
 0x19d   : > { %v2831_v38 = vcombine.low %v2775_v14, %v2807_v8  ;;  %v2832_v43 = vcombine.high %v2775_v14, %v2807_v8  ;;  %v2833_v27 = vcombine.low %v2782_v44, %v2814_v32  ;;  %v2834_v53 = vcombine.high %v2782_v44, %v2814_v32  ;;  %v322_v8 = vld [vmem:[%s15381_s3 + $0x18] sm:$0xff]  ;;  %v333_v44 = vld [vmem:[%s15381_s3 + $0x70] sm:$0xff]  ;;  %v343_v23 = vld [vmem:[%s15381_s3 + $0xc0] sm:$0xff] }
 0x19e   : > { %v12977_v14 = vrot.slane %v2704_v25, %v12559_v40 }
 0x19f   : > { %v11664_v35 = vpack.c.bf16 %v2831_v38, %v2695_v11  ;;  %v11672_v63 = vpack.c.bf16 %v2832_v43, %v2696_v36  ;;  %v11680_v42 = vpack.c.bf16 %v2833_v27, %v2697_v48  ;;  %v11688_v19 = vpack.c.bf16 %v2834_v53, %v2698_v21  ;;  %v334_v53 = vld [vmem:[%s15381_s3 + $0x78] sm:$0xff]  ;;  %v344_v21 = vld [vmem:[%s15381_s3 + $0xc8] sm:$0xff] }
 0x1a0   : > { %v12925_v46 = vpop.trf.xlu1  ;;  %v12927_v49 = vpop.trf.xlu0  ;;  %v2427_v11 = vcombine.low %v12886_v13, %v12893_v57  ;;  %v12993_v38 = vrot.slane %v2568_v20, %v12559_v40  ;;  %v2815_v36 = vcombine.low %v12949_v12, %v12946_v51  ;;  %v13007_v57 = vpack.c.bf16 %v2564_v1, %v2428_v61 }
 0x1a1   : > { %11665 = vmatprep.subr.bf16.mxu0 %v11664_v35  ;;  %11673 = vmatprep.subr.bf16.mxu1 %v11672_v63  ;;  %v2783_v15 = vcombine.low %v12977_v14, %v12974_v30  ;;  %v2408_v27 = vcombine.high %v12817_v10, %v12810_v18  ;;  %v2687_v18 = vrot.slane %v2679_v62, %v12565_v55 }
 0x1a2   : > { %11667 = vmatpush3.bf16.msra.mxu0 %v11664_v35  ;;  %11675 = vmatpush3.bf16.msra.mxu1 %v11672_v63  ;;  %v13005_v13 = vpack.c.bf16 %v2563_v0, %v2427_v11  ;;  %v324_v35 = vld [vmem:[%s15381_s3 + $0x28] sm:$0xff]  ;;  %v2647_v45 = vcombine.low %v12993_v38, %v12990_v6 }
 0x1a3   : > { %11677 = vmatprep.subr.bf16.mxu0 %v11676_v4  ;;  %11685 = vmatprep.subr.bf16.mxu1 %v11684_v33  ;;  %v332_v63 = vld [vmem:[%s15381_s3 + $0x68] sm:$0xff]  ;;  %v2791_v10 = vrot.slane %v2783_v15, %v12565_v55  ;;  %v2422_v56 = vrot.slane %v2408_v27, %v12565_v55 }
 0x1a4   : > { %v12955_v54 = vpop.trf.xlu1  ;;  %v12957_v58 = vpop.trf.xlu0  ;;  %v2655_v28 = vrot.slane %v2647_v45, %v12565_v55 }
 0x1a5   : > { %10933 = vmatmul.mubr.msk.f32.vlgmr.msra.gmra.mrb[0].mxu0 %vm2839_vm0, %v320_v22  ;;  %10953 = vmatmul.mubr.msk.f32.vlgmr.msra.gmra.mrb[0].mxu1 %vm2839_vm0, %v328_v47  ;;  %v2558_v47 = vrot.slane %v2544_v31, %v12565_v55 }
 0x1a6   : > { %11679 = vmatpush3.bf16.msra.mxu0 %v11676_v4  ;;  %11687 = vmatpush3.bf16.msra.mxu1 %v11684_v33  ;;  %v331_v4 = vld [vmem:[%s15381_s3 + $0x60] sm:$0xff]  ;;  %v2823_v33 = vrot.slane %v2815_v36, %v12565_v55  ;;  %v2699_v0 = vcombine.low %v2655_v28, %v2687_v18  ;;  %v2700_v1 = vcombine.high %v2655_v28, %v2687_v18  ;;  %v337_v36 = vld [vmem:[%s15381_s3 + $0x90] sm:$0xff] }
 0x1a7   : > { %11681 = vmatprep.subr.bf16.mxu0 %v11680_v42  ;;  %11689 = vmatprep.subr.bf16.mxu1 %v11688_v19  ;;  %v349_v28 = vld [vmem:[%s15381_s3 + $0xf0] sm:$0xff] }
 0x1a8   : > { %10935 = vmatprep.mubr.msk.f32.mxu0 %vm2839_vm0, %v321_v60  ;;  %10955 = vmatprep.mubr.msk.f32.mxu1 %vm2839_vm0, %v329_v2  ;;  %v12999_v43 = vpop.trf.xlu1  ;;  %v13001_v32 = vpop.trf.xlu0  ;;  %v2835_v25 = vcombine.low %v2791_v10, %v2823_v33  ;;  %v2836_v22 = vcombine.high %v2791_v10, %v2823_v33 }
 0x1a9   : > { %10936 = vmatmul.mubr.msk.f32.gmra.mrb[2].mxu0 %vm2839_vm0, %v322_v8  ;;  %10956 = vmatmul.mubr.msk.f32.gmra.mrb[2].mxu1 %vm2839_vm0, %v330_v9 }
 0x1aa   : > { %11683 = vmatpush3.bf16.msra.mxu0 %v11680_v42  ;;  %11691 = vmatpush3.bf16.msra.mxu1 %v11688_v19  ;;  %v2526_v42 = vrot.slane %v2512_v37, %v12565_v55  ;;  %v2390_v19 = vrot.slane %v2376_v5, %v12565_v55  ;;  %v11696_v60 = vpack.c.bf16 %v2835_v25, %v2699_v0 }
 0x1ab   : > { %11693 = vmatprep.subr.bf16.mxu0 %v13005_v13  ;;  %11701 = vmatprep.subr.bf16.mxu1 %v13007_v57  ;;  %v11704_v2 = vpack.c.bf16 %v2836_v22, %v2700_v1  ;;  %v2816_v37 = vcombine.high %v12949_v12, %v12946_v51  ;;  %v340_v51 = vld [vmem:[%s15381_s3 + $0xa8] sm:$0xff]  ;;  %v2680_v5 = vcombine.high %v12971_v29, %v12960_v34  ;;  %v342_v22 = vld [vmem:[%s15381_s3 + $0xb8] sm:$0xff] }
 0x1ac   : > { %10938 = vmatprep.mubr.msk.f32.mxu0 %vm2839_vm0, %v323_v3  ;;  %10958 = vmatprep.mubr.msk.f32.mxu1 %vm2839_vm0, %v331_v4  ;;  %v13040_v41 = vpop.trf.xlu1  ;;  %v13042_v50 = vpop.trf.xlu0  ;;  %v2565_v8 = vcombine.low %v2526_v42, %v2558_v47  ;;  %v2566_v9 = vcombine.high %v2526_v42, %v2558_v47  ;;  %v345_v3 = vld [vmem:[%s15381_s3 + $0xd0] sm:$0xff]  ;;  %v348_v12 = vld [vmem:[%s15381_s3 + $0xe8] sm:$0xff]  ;;  %v350_v47 = vld [vmem:[%s15381_s3 + $0xf8] sm:$0xff]  ;;  %v5702_v0 = vcombine.low %v12890_v26, %v12999_v43 }
 0x1ad   : > { %10939 = vmatmul.mubr.msk.f32.gmra.mrb[4].mxu0 %vm2839_vm0, %v324_v35  ;;  %10959 = vmatmul.mubr.msk.f32.gmra.mrb[4].mxu1 %vm2839_vm0, %v332_v63  ;;  %v338_v35 = vld [vmem:[%s15381_s3 + $0x98] sm:$0xff]  ;;  %v5686_v1 = vcombine.low %v12888_v52, %v13001_v32 }
 0x1ae   : > { %10941 = vmatprep.mubr.msk.f32.mxu0 %vm2839_vm0, %v325_v16  ;;  %10961 = vmatprep.mubr.msk.f32.mxu1 %vm2839_vm0, %v333_v44  ;;  %v346_v63 = vld [vmem:[%s15381_s3 + $0xd8] sm:$0xff]  ;;  %v2429_v16 = vcombine.low %v2390_v19, %v2422_v56  ;;  %v2430_v44 = vcombine.high %v2390_v19, %v2422_v56  ;;  %v2694_v56 = vrot.slane %v2680_v5, %v12565_v55  ;;  %v396_v5 = vld [vmem:[%s15382_s4 + $0x68] sm:$0xff] }
 0x1b0   : > { %v13070_v20 = vpop.trf.xlu1  ;;  %v13072_v48 = vpop.trf.xlu0 }
 0x1b1   : > { %10942 = vmatmul.mubr.msk.f32.gmra.mrb[6].mxu0 %vm2839_vm0, %v326_v39  ;;  %10962 = vmatmul.mubr.msk.f32.gmra.mrb[6].mxu1 %vm2839_vm0, %v334_v53  ;;  %v339_v39 = vld [vmem:[%s15381_s3 + $0xa0] sm:$0xff] }
 0x1b2   : > { %10972 = vmatprep.mubr.msk.f32.mxu0 %vm2839_vm0, %v335_v17  ;;  %10992 = vmatprep.mubr.msk.f32.mxu1 %vm2839_vm0, %v343_v23  ;;  %v347_v53 = vld [vmem:[%s15381_s3 + $0xe0] sm:$0xff]  ;;  %v2784_v17 = vcombine.high %v12977_v14, %v12974_v30  ;;  %v341_v23 = vld [vmem:[%s15381_s3 + $0xb0] sm:$0xff]  ;;  %v2648_v30 = vcombine.high %v12993_v38, %v12990_v6  ;;  %v2830_v14 = vrot.slane %v2816_v37, %v12565_v55 }
 0x1b3   : > { %v351_v6 = vld [vmem:[%s15381_s3 + $0x100] sm:$0xff] }
 0x1b4   : > { %v5545_v11 = vpop.trf.xlu1  ;;  %v5513_v61 = vpop.trf.xlu0  ;;  %v359_v38 = vld [vmem:[%s15381_s3 + $0x140] sm:$0xff] }
 0x1b5   : > { %10973 = vmatmul.mubr.msk.f32.vlgmr.msra.gmra.mrb[8].mxu0 %vm2839_vm0, %v336_v59  ;;  %10993 = vmatmul.mubr.msk.f32.vlgmr.msra.gmra.mrb[8].mxu1 %vm2839_vm0, %v344_v21  ;;  %v6110_v4 = vcombine.low %v12957_v58, %v5545_v11  ;;  %v6111_v62 = vcombine.high %v12957_v58, %v5545_v11  ;;  %v6094_v15 = vcombine.low %v12955_v54, %v5513_v61  ;;  %v352_v21 = vld [vmem:[%s15381_s3 + $0x108] sm:$0xff] }
 0x1b6   : > { %11695 = vmatpush3.bf16.msra.mxu0 %v13005_v13  ;;  %11703 = vmatpush3.bf16.msra.mxu1 %v13007_v57  ;;  %v6095_v13 = vcombine.high %v12955_v54, %v5513_v61  ;;  %v13115_v57 = vpack.c.bf16 %v2565_v8, %v2429_v16  ;;  %v13128_v54 = vpack.c.bf16 %v2566_v9, %v2430_v44  ;;  %v384_v11 = vld [vmem:[%s15382_s4 + $0x8] sm:$0xff]  ;;  %v385_v61 = vld [vmem:[%s15382_s4 + $0x10] sm:$0xff]  ;;  %v391_v44 = vld [vmem:[%s15382_s4 + $0x40] sm:$0xff] }
 0x1b7   : > { %11697 = vmatprep.subr.bf16.mxu0 %v11696_v60  ;;  %11705 = vmatprep.subr.bf16.mxu1 %v11704_v2  ;;  %v13107_v58 = vrot.slane %v6110_v4, %v12559_v40  ;;  %v13110_v31 = vrot.slane %v6111_v62, %v12559_v40  ;;  %v13118_v45 = vrot.slane %v6094_v15, %v12559_v40  ;;  %v387_v15 = vld [vmem:[%s15382_s4 + $0x20] sm:$0xff] }
 0x1b8   : > { %10975 = vmatprep.mubr.msk.f32.mxu0 %vm2839_vm0, %v337_v36  ;;  %10995 = vmatprep.mubr.msk.f32.mxu1 %vm2839_vm0, %v345_v3  ;;  %v13120_v33 = vpop.trf.xlu1  ;;  %v13122_v27 = vpop.trf.xlu0  ;;  %v13137_v18 = vrot.slane %v6095_v13, %v12559_v40  ;;  %v2798_v59 = vrot.slane %v2784_v17, %v12565_v55  ;;  %v386_v36 = vld [vmem:[%s15382_s4 + $0x18] sm:$0xff]  ;;  %v360_v3 = vld [vmem:[%s15381_s3 + $0x148] sm:$0xff]  ;;  %v5703_v4 = vcombine.high %v12890_v26, %v12999_v43 }
 0x1b9   : > { %10976 = vmatmul.mubr.msk.f32.gmra.mrb[10].mxu0 %vm2839_vm0, %v338_v35  ;;  %10996 = vmatmul.mubr.msk.f32.gmra.mrb[10].mxu1 %vm2839_vm0, %v346_v63  ;;  %v6159_v10 = vcombine.high %v13118_v45, %v13107_v58  ;;  %v5687_v62 = vcombine.high %v12888_v52, %v13001_v32  ;;  %v388_v35 = vld [vmem:[%s15382_s4 + $0x28] sm:$0xff]  ;;  %v393_v52 = vld [vmem:[%s15382_s4 + $0x50] sm:$0xff]  ;;  %v13239_v43 = vrot.slane %v5702_v0, %v12559_v40  ;;  %v355_v0 = vld [vmem:[%s15381_s3 + $0x120] sm:$0xff] }
 0x1ba   : > { %11699 = vmatpush3.bf16.msra.mxu0 %v11696_v60  ;;  %11707 = vmatpush3.bf16.msra.mxu1 %v11704_v2  ;;  %v6175_v25 = vcombine.high %v13137_v18, %v13110_v31  ;;  %v383_v60 = vld [vmem:[%s15382_s4] sm:$0xff]  ;;  %v2662_v2 = vrot.slane %v2648_v30, %v12565_v55  ;;  %v2837_v8 = vcombine.low %v2798_v59, %v2830_v14  ;;  %v392_v26 = vld [vmem:[%s15382_s4 + $0x48] sm:$0xff]  ;;  %v361_v30 = vld [vmem:[%s15381_s3 + $0x150] sm:$0xff] }
 0x1bb   : > { %11709 = vmatprep.subr.bf16.mxu0 %v13115_v57  ;;  %11717 = vmatprep.subr.bf16.mxu1 %v13128_v54  ;;  %v2838_v9 = vcombine.high %v2798_v59, %v2830_v14  ;;  %v13242_v32 = vrot.slane %v5686_v1, %v12559_v40  ;;  %v13269_v14 = vpack.c.bf16 %v388_v35, %v387_v15  ;;  %v357_v35 = vld [vmem:[%s15381_s3 + $0x130] sm:$0xff] }
 0x1bc   : > { %10978 = vmatprep.mubr.msk.f32.mxu0 %vm2839_vm0, %v339_v39  ;;  %10998 = vmatprep.mubr.msk.f32.mxu1 %vm2839_vm0, %v347_v53  ;;  %v13163_v34 = vpop.trf.xlu1  ;;  %v13165_v29 = vpop.trf.xlu0  ;;  %v2701_v63 = vcombine.low %v2662_v2, %v2694_v56  ;;  %v2702_v16 = vcombine.high %v2662_v2, %v2694_v56  ;;  %v13248_v39 = vpack.c.bf16 %v384_v11, %v383_v60  ;;  %v362_v11 = vld [vmem:[%s15381_s3 + $0x158] sm:$0xff] }
 0x1bd   : > { %10979 = vmatmul.mubr.msk.f32.gmra.mrb[12].mxu0 %vm2839_vm0, %v340_v51  ;;  %10999 = vmatmul.mubr.msk.f32.gmra.mrb[12].mxu1 %vm2839_vm0, %v348_v12  ;;  %v13250_v53 = vpack.c.bf16 %v386_v36, %v385_v61  ;;  %v394_v51 = vld [vmem:[%s15382_s4 + $0x58] sm:$0xff]  ;;  %v395_v12 = vld [vmem:[%s15382_s4 + $0x60] sm:$0xff]  ;;  %15435 = vst [vmem:[#allocation8_spill] sm:$0xff] %v13269_v14  ;;  %v5751_v56 = vcombine.high %v13242_v32, %v13239_v43 }
 0x1be   : > { %10981 = vmatprep.mubr.msk.f32.mxu0 %vm2839_vm0, %v341_v23  ;;  %11001 = vmatprep.mubr.msk.f32.mxu1 %vm2839_vm0, %v349_v28  ;;  %15433 = vst [vmem:[#allocation6_spill] sm:$0xff] %v13248_v39  ;;  %v11712_v17 = vpack.c.bf16 %v2837_v8, %v2701_v63  ;;  %v11720_v23 = vpack.c.bf16 %v2838_v9, %v2702_v16  ;;  %v353_v28 = vld [vmem:[%s15381_s3 + $0x110] sm:$0xff]  ;;  %v363_v63 = vld [vmem:[%s15381_s3 + $0x160] sm:$0xff] }
 0x1bf   : > { %15434 = vst [vmem:[#allocation7_spill] sm:$0xff] %v13250_v53  ;;  %v5838_v59 = vcombine.low %v12907_v24, %v13040_v41  ;;  %v5750_v2 = vcombine.low %v13242_v32, %v13239_v43 }
 0x1c0   : > { %v13195_v42 = vpop.trf.xlu1  ;;  %v13197_v19 = vpop.trf.xlu0 }
 0x1c1   : > { %10982 = vmatmul.mubr.msk.f32.gmra.mrb[14].mxu0 %vm2839_vm0, %v342_v22  ;;  %11002 = vmatmul.mubr.msk.f32.gmra.mrb[14].mxu1 %vm2839_vm0, %v350_v47  ;;  %v13274_v22 = vrot.slane %v5703_v4, %v12559_v40  ;;  %v13277_v47 = vrot.slane %v5687_v62, %v12559_v40  ;;  %v13332_v16 = vrot.slane %v5838_v59, %v12559_v40 }
 0x1c2   : > { %11012 = vmatprep.mubr.msk.f32.mxu0 %vm2839_vm0, %v351_v6  ;;  %11032 = vmatprep.mubr.msk.f32.mxu1 %vm2839_vm0, %v359_v38  ;;  %v354_v6 = vld [vmem:[%s15381_s3 + $0x118] sm:$0xff]  ;;  %v13282_v38 = vpack.c.bf16 %v392_v26, %v391_v44  ;;  %v5823_v26 = vcombine.high %v12905_v7, %v13042_v50 }
 0x1c3   : > { %v5766_v61 = vcombine.low %v13277_v47, %v13274_v22  ;;  %v5767_v36 = vcombine.high %v13277_v47, %v13274_v22  ;;  %v367_v22 = vld [vmem:[%s15381_s3 + $0x180] sm:$0xff] }
 0x1c4   : > { %v13244_v13 = vpop.trf.xlu1  ;;  %v13246_v37 = vpop.trf.xlu0  ;;  %15436 = vst [vmem:[#allocation9_spill] sm:$0xff] %v13282_v38 }
 0x1c5   : > { %11013 = vmatmul.mubr.msk.f32.vlgmr.msra.gmra.mrb[16].mxu0 %vm2839_vm0, %v352_v21  ;;  %11033 = vmatmul.mubr.msk.f32.vlgmr.msra.gmra.mrb[16].mxu1 %vm2839_vm0, %v360_v3  ;;  %v5839_v21 = vcombine.high %v12907_v24, %v13040_v41  ;;  %v5822_v3 = vcombine.low %v12905_v7, %v13042_v50  ;;  %v364_v7 = vld [vmem:[%s15381_s3 + $0x168] sm:$0xff] }
 0x1c6   : > { %11711 = vmatpush3.bf16.msra.mxu0 %v13115_v57  ;;  %11719 = vmatpush3.bf16.msra.mxu1 %v13128_v54  ;;  %v13286_v57 = vpack.c.bf16 %v394_v51, %v393_v52  ;;  %v13288_v54 = vpack.c.bf16 %v396_v5, %v395_v12  ;;  %v15386_v52 = vmov 0.0|0.0   ;;  %v5758_v5 = vrot.slane %v5750_v2, %v12565_v55 }
 0x1c7   : > { %11713 = vmatprep.subr.bf16.mxu0 %v11712_v17  ;;  %11721 = vmatprep.subr.bf16.mxu1 %v11720_v23  ;;  %v13335_v44 = vrot.slane %v5839_v21, %v12559_v40  ;;  %v13352_v50 = vrot.slane %v5822_v3, %v12559_v40  ;;  %v365_v21 = vld [vmem:[%s15381_s3 + $0x170] sm:$0xff]  ;;  %v5975_v3 = vcombine.high %v12927_v49, %v13070_v20 }
 0x1c8   : > { %15437 = vst [vmem:[#allocation10_spill] sm:$0xff] %v13286_v57  ;;  %15438 = vst [vmem:[#allocation11_spill] sm:$0xff] %v13288_v54  ;;  %11015 = vmatprep.mubr.msk.f32.mxu0 %vm2839_vm0, %v353_v28  ;;  %v5670_v1 = vpop.trf.xlu1  ;;  %v5638_v60 = vpop.trf.xlu0  ;;  %11035 = vmatprep.mubr.msk.f32.mxu1 %vm2839_vm0, %v361_v30 }
 0x1c9   : > { %11016 = vmatmul.mubr.msk.f32.gmra.mrb[18].mxu0 %vm2839_vm0, %v354_v6  ;;  %v5734_v8 = vcombine.low %v13120_v33, %v5670_v1  ;;  %v5735_v9 = vcombine.high %v13120_v33, %v5670_v1  ;;  %v5718_v24 = vcombine.low %v13122_v27, %v5638_v60  ;;  %v5719_v41 = vcombine.high %v13122_v27, %v5638_v60  ;;  %v356_v33 = vld [vmem:[%s15381_s3 + $0x128] sm:$0xff] }
 0x1ca   : > { %11715 = vmatpush3.bf16.msra.mxu0 %v11712_v17  ;;  %11723 = vmatpush3.bf16.msra.mxu1 %v11720_v23  ;;  %v358_v23 = vld [vmem:[%s15381_s3 + $0x138] sm:$0xff]  ;;  %v13368_v6 = vrot.slane %v5751_v56, %v12565_v55 }
 0x1cb   : > { %11018 = vmatprep.mubr.msk.f32.mxu0 %vm2839_vm0, %v355_v0  ;;  %v5742_v27 = vrot.slane %v5734_v8, %v12559_v40  ;;  %v13321_v4 = vrot.slane %v5735_v9, %v12559_v40  ;;  %v5726_v62 = vrot.slane %v5718_v24, %v12559_v40  ;;  %v5733_v15 = vrot.slane %v5719_v41, %v12559_v40  ;;  %v366_v41 = vld [vmem:[%s15381_s3 + $0x178] sm:$0xff] }
 0x1cc   : > { %11036 = vmatmul.mubr.msk.f32.gmra.mrb[18].mxu1 %vm2839_vm0, %v362_v11  ;;  %11724 = vmatprep.subr.bf16.mxu0 %v15386_v52  ;;  %v13341_v43 = vpop.trf.xlu1  ;;  %v13343_v32 = vpop.trf.xlu0  ;;  %v13377_v0 = vrot.slane %v5766_v61, %v12565_v55  ;;  %v13392_v8 = vrot.slane %v5823_v26, %v12559_v40  ;;  %v13399_v11 = vrot.slane %v5767_v36, %v12565_v55  ;;  %v375_v36 = vld [vmem:[%s15381_s3 + $0x1c0] sm:$0xff] }
 0x1cd   : > { %11019 = vmatmul.mubr.msk.f32.gmra.mrb[20].mxu0 %vm2839_vm0, %v356_v33  ;;  %v5783_v51 = vcombine.high %v5726_v62, %v5742_v27  ;;  %v5798_v12 = vcombine.low %v5733_v15, %v13321_v4  ;;  %v5782_v17 = vcombine.low %v5726_v62, %v5742_v27  ;;  %11038 = vmatprep.mubr.msk.f32.mxu1 %vm2839_vm0, %v363_v63  ;;  %v368_v27 = vld [vmem:[%s15381_s3 + $0x188] sm:$0xff] }
 0x1ce   : > { %11021 = vmatprep.mubr.msk.f32.mxu0 %vm2839_vm0, %v357_v35  ;;  %v5870_v28 = vcombine.low %v13163_v34, %v13341_v43  ;;  %v5854_v30 = vcombine.low %v13165_v29, %v13343_v32  ;;  %11740 = vmatprep.subr.bf16.mxu1 %v15386_v52  ;;  %v5799_v1 = vcombine.high %v5733_v15, %v13321_v4  ;;  %v15439_v4 = vmov 0  ;;  %v369_v15 = vld [vmem:[%s15381_s3 + $0x190] sm:$0xff] }
 0x1cf   : > { %v5790_v47 = vrot.slane %v5782_v17, %v12565_v55  ;;  %v13371_v59 = vrot.slane %v5783_v51, %v12565_v55  ;;  %v13389_v2 = vrot.slane %v5798_v12, %v12565_v55  ;;  %v5974_v61 = vcombine.low %v12927_v49, %v13070_v20  ;;  %v376_v12 = vld [vmem:[%s15381_s3 + $0x1c8] sm:$0xff] }
 0x1d0   : > { %11039 = vmatmul.mubr.msk.f32.gmra.mrb[20].mxu1 %vm2839_vm0, %v364_v7  ;;  %v13383_v60 = vrot.slane %v5870_v28, %v12559_v40  ;;  %v13386_v56 = vrot.slane %v5854_v30, %v12559_v40  ;;  %v5958_v33 = vcombine.low %v12925_v46, %v13072_v48  ;;  %v15440_v4 = vsel %vm13417_vm1, 4294967295, %v15439_v4  ;;  %v13430_v35 = vpop.trf.xlu1  ;;  %v371_v28 = vld [vmem:[%s15381_s3 + $0x1a0] sm:$0xff]  ;;  %v13483_v30 = vpop.trf.xlu0 }
 0x1d1   : > { %11022 = vmatmul.mubr.msk.f32.gmra.mrb[22].mxu0 %vm2839_vm0, %v358_v23  ;;  %v5814_v9 = vcombine.low %v5758_v5, %v5790_v47  ;;  %v5815_v24 = vcombine.high %v5758_v5, %v5790_v47  ;;  %11041 = vmatprep.mubr.msk.f32.mxu1 %vm2839_vm0, %v365_v21  ;;  %15441 = vst [vmem:[#allocation12_spill] sm:$0xff] %v15440_v4 }
 0x1d2   : > { %11052 = vmatprep.mubr.msk.f32.mxu0 %vm2839_vm0, %v367_v22  ;;  %v5816_v49 = vcombine.low %v13368_v6, %v13371_v59  ;;  %v5871_v20 = vcombine.high %v13163_v34, %v13341_v43  ;;  %v5855_v62 = vcombine.high %v13165_v29, %v13343_v32  ;;  %v5886_v63 = vcombine.low %v13352_v50, %v13332_v16 }
 0x1d3   : > { %6230 = vxpose.xlu0.b32.start.end [1/1] (short) (narrow) %v5814_v9, 8  ;;  %6262 = vxpose.xlu1.b32.start.end [1/1] (short) (narrow) %v5815_v24, 8  ;;  %v5918_v26 = vcombine.low %v13386_v56, %v13383_v60  ;;  %v5819_v34 = vcombine.high %v13377_v0, %v13389_v2  ;;  %v13440_v43 = vrot.slane %v5799_v1, %v12565_v55 }
 0x1d4   : > { %11042 = vmatmul.mubr.msk.f32.gmra.mrb[22].mxu1 %vm2839_vm0, %v366_v41  ;;  %v5887_v29 = vcombine.high %v13352_v50, %v13332_v16  ;;  %v5902_v32 = vcombine.low %v13392_v8, %v13335_v44  ;;  %v5959_v51 = vcombine.high %v12925_v46, %v13072_v48  ;;  %v13454_v5 = vrot.slane %v5974_v61, %v12559_v40  ;;  %v370_v48 = vld [vmem:[%s15381_s3 + $0x198] sm:$0xff]  ;;  %v377_v16 = vld [vmem:[%s15381_s3 + $0x1d0] sm:$0xff]  ;;  %v5673_v22 = vpop.trf.xlu1  ;;  %v379_v41 = vld [vmem:[%s15381_s3 + $0x1e0] sm:$0xff] }
 0x1d5   : > { %11053 = vmatmul.mubr.msk.f32.vlgmr.msra.gmra.mrb[24].mxu0 %vm2839_vm0, %v368_v27  ;;  %11072 = vmatprep.mubr.msk.f32.mxu1 %vm2839_vm0, %v375_v36  ;;  %v13457_v17 = vrot.slane %v5958_v33, %v12559_v40  ;;  %v5919_v46 = vcombine.high %v13386_v56, %v13383_v60  ;;  %v5817_v7 = vcombine.high %v13368_v6, %v13371_v59  ;;  %v378_v56 = vld [vmem:[%s15381_s3 + $0x1d8] sm:$0xff]  ;;  %v373_v33 = vld [vmem:[%s15381_s3 + $0x1b0] sm:$0xff] }
 0x1d6   : > { %11727 = vmatpush3.bf16.xpose.msk.msra.mxu0 %vm13417_vm1, %v13248_v39  ;;  %11055 = vmatprep.mubr.msk.f32.mxu0 %vm2839_vm0, %v369_v15  ;;  %v13475_v50 = vrot.slane %v5871_v20, %v12559_v40  ;;  %v13478_v23 = vrot.slane %v5855_v62, %v12559_v40  ;;  %v5821_v47 = vcombine.high %v13399_v11, %v13440_v43 }
 0x1d7   : > { %11728 = vmatprep.subr.bf16.mxu0 %v15386_v52  ;;  %6294 = vxpose.xlu0.b32.start.end [1/1] (short) (narrow) %v5816_v49, 8  ;;  %v13488_v21 = vrot.slane %v5886_v63, %v12565_v55  ;;  %v13491_v6 = vrot.slane %v5918_v26, %v12565_v55  ;;  %v5903_v59 = vcombine.high %v13392_v8, %v13335_v44  ;;  %v372_v44 = vld [vmem:[%s15381_s3 + $0x1a8] sm:$0xff]  ;;  %v5641_v49 = vpop.trf.xlu0 }
 0x1d8   : > { %6390 = vxpose.xlu1.b32.start.end [1/1] (short) (narrow) %v5819_v34, 8  ;;  %11073 = vmatmul.mubr.msk.f32.vlgmr.msra.gmra.mrb[24].mxu1 %vm2839_vm0, %v376_v12  ;;  %v13497_v1 = vrot.slane %v5975_v3, %v12559_v40  ;;  %v13500_v60 = vrot.slane %v5959_v51, %v12559_v40  ;;  %v13512_v8 = vrot.slane %v5887_v29, %v12565_v55  ;;  %v380_v26 = vld [vmem:[%s15381_s3 + $0x1e8] sm:$0xff] }
 0x1d9   : > { %11056 = vmatmul.mubr.msk.f32.gmra.mrb[26].mxu0 %vm2839_vm0, %v370_v48  ;;  %11075 = vmatprep.mubr.msk.f32.mxu1 %vm2839_vm0, %v377_v16  ;;  %v13515_v9 = vrot.slane %v5919_v46, %v12565_v55  ;;  %v6142_v24 = vcombine.low %v13244_v13, %v5673_v22  ;;  %v5934_v61 = vcombine.low %v13478_v23, %v13475_v50 }
 0x1da   : > { %11058 = vmatprep.mubr.msk.f32.mxu0 %vm2839_vm0, %v371_v28  ;;  %11743 = vmatpush3.bf16.xpose.msk.msra.mxu1 %vm13417_vm1, %v13282_v38  ;;  %v5818_v3 = vcombine.low %v13377_v0, %v13389_v2  ;;  %v6006_v27 = vcombine.low %v13195_v42, %v13430_v35  ;;  %v5990_v36 = vcombine.low %v13197_v19, %v13483_v30 }
 0x1db   : > { %6326 = vxpose.xlu0.b32.start.end [1/1] (short) (narrow) %v5817_v7, 8  ;;  %v6022_v20 = vcombine.low %v13457_v17, %v13454_v5  ;;  %v5951_v62 = vcombine.high %v13488_v21, %v13491_v6  ;;  %v13540_v0 = vrot.slane %v5902_v32, %v12565_v55  ;;  %v5935_v2 = vcombine.high %v13478_v23, %v13475_v50  ;;  %v381_v50 = vld [vmem:[%s15381_s3 + $0x1f0] sm:$0xff] }
 0x1dc   : > { %6454 = vxpose.xlu1.b32.start.end [1/1] (short) (narrow) %v5821_v47, 8  ;;  %11076 = vmatmul.mubr.msk.f32.gmra.mrb[26].mxu1 %vm2839_vm0, %v378_v56  ;;  %v5820_v15 = vcombine.low %v13399_v11, %v13440_v43  ;;  %v6143_v63 = vcombine.high %v13244_v13, %v5673_v22  ;;  %v5953_v34 = vcombine.high %v13512_v8, %v13515_v9  ;;  %v374_v11 = vld [vmem:[%s15381_s3 + $0x1b8] sm:$0xff]  ;;  %v15384_v23 = vmov 0.0  }
 0x1dd   : > { %11059 = vmatmul.mubr.msk.f32.gmra.mrb[28].mxu0 %vm2839_vm0, %v372_v44  ;;  %11078 = vmatprep.mubr.msk.f32.mxu1 %vm2839_vm0, %v379_v41  ;;  %v13563_v13 = vrot.slane %v6142_v24, %v12559_v40  ;;  %v6126_v43 = vcombine.low %v13246_v37, %v5641_v49  ;;  %v13568_v29 = vrot.slane %v6006_v27, %v12559_v40  ;;  %v390_v24 = vld [vmem:[%s15382_s4 + $0x38] sm:$0xff] }
 0x1de   : > { %11731 = vmatpush3.bf16.xpose.msk.msra.mxu0 %vm13417_vm1, %v13250_v53  ;;  %11061 = vmatprep.mubr.msk.f32.mxu0 %vm2839_vm0, %v373_v33  ;;  %v13571_v32 = vrot.slane %v5990_v36, %v12559_v40  ;;  %v13574_v51 = vrot.slane %v5934_v61, %v12565_v55  ;;  %v13577_v12 = vrot.slane %v6143_v63, %v12559_v40 }
 0x1df   : > { %11732 = vmatprep.subr.bf16.mxu0 %v15386_v52  ;;  %6358 = vxpose.xlu0.b32.start.end [1/1] (short) (narrow) %v5818_v3, 8  ;;  %v6127_v46 = vcombine.high %v13246_v37, %v5641_v49  ;;  %v13581_v48 = vrot.slane %v6126_v43, %v12559_v40  ;;  %v6023_v16 = vcombine.high %v13457_v17, %v13454_v5  ;;  %v466_v49 = vld [vmem:[%s14093_s13 + $0x18] sm:$0xff] }
 0x1e0   : > { %6518 = vxpose.xlu1.b32.start.end [1/1] (short) (narrow) %v5951_v62, 8  ;;  %11079 = vmatmul.mubr.msk.f32.gmra.mrb[28].mxu1 %vm2839_vm0, %v380_v26  ;;  %v13588_v7 = vrot.slane %v5903_v59, %v12565_v55  ;;  %v13598_v37 = vrot.slane %v6159_v10, %v12565_v55  ;;  %v6007_v5 = vcombine.high %v13195_v42, %v13430_v35  ;;  %v382_v10 = vld [vmem:[%s15381_s3 + $0x1f8] sm:$0xff] }
 0x1e1   : > { %11062 = vmatmul.mubr.msk.f32.gmra.mrb[30].mxu0 %vm2839_vm0, %v374_v11  ;;  %11744 = vmatprep.subr.bf16.mxu1 %v15386_v52  ;;  %v5991_v17 = vcombine.high %v13197_v19, %v13483_v30  ;;  %v13607_v28 = vrot.slane %v6127_v46, %v12559_v40  ;;  %v6191_v22 = vcombine.high %v13581_v48, %v13563_v13  ;;  %v397_v11 = vld [vmem:[%s15382_s4 + $0x70] sm:$0xff] }
 0x1e2   : > { %11100 = vmatprep.mubr.msk.f32.mxu0 %vm12414_vm2, %v15384_v23  ;;  %v5950_v42 = vcombine.low %v13488_v21, %v13491_v6  ;;  %v5949_v19 = vrot.slane %v5935_v2, %v12565_v55  ;;  %11747 = vmatpush3.bf16.xpose.msk.msra.mxu1 %vm13417_vm1, %v13286_v57  ;;  %v13624_v35 = vrot.slane %v6175_v25, %v12565_v55 }
 0x1e3   : > { %6422 = vxpose.xlu0.b32.start.end [1/1] (short) (narrow) %v5820_v15, 8  ;;  %v6054_v30 = vcombine.low %v13571_v32, %v13568_v29  ;;  %v5955_v47 = vcombine.high %v13540_v0, %v13574_v51  ;;  %v6207_v21 = vcombine.high %v13607_v28, %v13577_v12  ;;  %11081 = vmatprep.mubr.msk.f32.mxu1 %vm2839_vm0, %v381_v50 }
 0x1e4   : > { %15442 = vst [vmem:[#allocation13_spill] sm:$0xff] %v13624_v35  ;;  %6582 = vxpose.xlu1.b32.start.end [1/1] (short) (narrow) %v5953_v34, 8  ;;  %v5952_v6 = vcombine.low %v13512_v8, %v13515_v9  ;;  %v13636_v59 = vrot.slane %v6022_v20, %v12565_v55  ;;  %11082 = vmatmul.mubr.msk.f32.gmra.mrb[30].mxu1 %vm2839_vm0, %v382_v10  ;;  %v389_v9 = vld [vmem:[%s15382_s4 + $0x30] sm:$0xff] }
 0x1e5   : > { %11748 = vmatprep.subr.bf16.mxu1 %v15386_v52  ;;  %v13641_v25 = vrot.slane %v6191_v22, %v12565_v55  ;;  %v6021_v56 = vrot.slane %v6007_v5, %v12559_v40  ;;  %v6005_v44 = vrot.slane %v5991_v17, %v12559_v40  ;;  %v13649_v8 = vrot.slane %v6207_v21, %v12565_v55 }
 0x1e6   : > { %11735 = vmatpush3.bf16.xpose.msk.msra.mxu0 %vm13417_vm1, %v13269_v14  ;;  %11119 = vmatprep.mubr.msk.f32.mxu1 %vm12414_vm2, %v15384_v23  ;;  %v6055_v41 = vcombine.high %v13571_v32, %v13568_v29  ;;  %v5957_v33 = vcombine.high %v13588_v7, %v5949_v19  ;;  %v6062_v27 = vrot.slane %v6054_v30, %v12565_v55  ;;  %v399_v29 = vld [vmem:[%s15382_s4 + $0x80] sm:$0xff]  ;;  %v400_v32 = vld [vmem:[%s15382_s4 + $0x88] sm:$0xff] }
 0x1e7   : > { %15443 = vst [vmem:[#allocation14_spill] sm:$0xff] %v13649_v8  ;;  %11736 = vmatprep.subr.bf16.mxu0 %v15386_v52  ;;  %6486 = vxpose.xlu0.b32.start.end [1/1] (short) (narrow) %v5950_v42, 8  ;;  %v13672_v20 = vpack.c.bf16 %v390_v24, %v389_v9  ;;  %v6038_v62 = vcombine.low %v13500_v60, %v13497_v1  ;;  %v13728_v30 = vld [vmem:[%s12513_s11] sm:$0xff]  ;;  %v13751_v9 = vld [vmem:[%s12513_s11 + $0x8] sm:$0xff] }
 0x1e8   : > { %6646 = vxpose.xlu1.b32.start.end [1/1] (short) (narrow) %v5955_v47, 8  ;;  %v5954_v2 = vcombine.low %v13540_v0, %v13574_v51  ;;  %v6037_v15 = vrot.slane %v6023_v16, %v12565_v55  ;;  %v6070_v63 = vcombine.low %v6005_v44, %v6021_v56  ;;  %v6087_v26 = vcombine.high %v13636_v59, %v6062_v27  ;;  %v398_v0 = vld [vmem:[%s15382_s4 + $0x78] sm:$0xff] }
 0x1e9   : > { %15444 = vst [vmem:[#allocation15_spill] sm:$0xff] %v13672_v20  ;;  %v6069_v34 = vrot.slane %v6055_v41, %v12565_v55  ;;  %v6039_v43 = vcombine.high %v13500_v60, %v13497_v1  ;;  %v5956_v51 = vcombine.low %v13588_v7, %v5949_v19  ;;  %v13704_v46 = vpack.c.bf16 %v398_v0, %v397_v11  ;;  %v411_v11 = vld [vmem:[%s15382_s4 + $0xe0] sm:$0xff]  ;;  %v412_v0 = vld [vmem:[%s15382_s4 + $0xe8] sm:$0xff] }
 0x1ea   : > { %11751 = vmatpush3.bf16.xpose.msk.msra.mxu1 %vm13417_vm1, %v13288_v54  ;;  %v6071_v16 = vcombine.high %v6005_v44, %v6021_v56  ;;  %v6046_v1 = vrot.slane %v6038_v62, %v12565_v55  ;;  %v6078_v60 = vrot.slane %v6070_v63, %v12565_v55  ;;  %v13708_v5 = vpack.c.bf16 %v400_v32, %v399_v29  ;;  %v403_v62 = vld [vmem:[%s15382_s4 + $0xa0] sm:$0xff]  ;;  %v406_v29 = vld [vmem:[%s15382_s4 + $0xb8] sm:$0xff] }
 0x1eb   : > { %6550 = vxpose.xlu0.b32.start.end [1/1] (short) (narrow) %v5952_v6, 8  ;;  %11752 = vmatprep.subr.bf16.mxu1 %v15386_v52  ;;  %15445 = vst [vmem:[#allocation16_spill] sm:$0xff] %v13704_v46  ;;  %v6089_v50 = vcombine.high %v6037_v15, %v6069_v34  ;;  %v6158_v17 = vcombine.low %v13118_v45, %v13107_v58  ;;  %v407_v58 = vld [vmem:[%s15382_s4 + $0xc0] sm:$0xff]  ;;  %v408_v45 = vld [vmem:[%s15382_s4 + $0xc8] sm:$0xff] }
 0x1ec   : > { %6710 = vxpose.xlu1.b32.start.end [1/1] (short) (narrow) %v5957_v33, 8  ;;  %15446 = vst [vmem:[#allocation17_spill] sm:$0xff] %v13708_v5  ;;  %v6086_v22 = vcombine.low %v13636_v59, %v6062_v27  ;;  %v6053_v7 = vrot.slane %v6039_v43, %v12565_v55  ;;  %v6190_v10 = vcombine.low %v13581_v48, %v13563_v13  ;;  %v401_v13 = vld [vmem:[%s15382_s4 + $0x90] sm:$0xff]  ;;  %v402_v48 = vld [vmem:[%s15382_s4 + $0x98] sm:$0xff] }
 0x1ed   : > { %v6091_v42 = vcombine.high %v6046_v1, %v6078_v60  ;;  %v6085_v19 = vrot.slane %v6071_v16, %v12565_v55  ;;  %v6088_v47 = vcombine.low %v6037_v15, %v6069_v34  ;;  %v13744_v21 = vpack.c.bf16 %v408_v45, %v407_v58  ;;  %v409_v33 = vld [vmem:[%s15382_s4 + $0xd0] sm:$0xff]  ;;  %v410_v27 = vld [vmem:[%s15382_s4 + $0xd8] sm:$0xff] }
 0x1ee   : > { %11739 = vmatpush3.bf16.xpose.msk.msra.mxu0 %vm13417_vm1, %v13672_v20  ;;  %v6166_v59 = vrot.slane %v6158_v17, %v12565_v55  ;;  %v6198_v56 = vrot.slane %v6190_v10, %v12565_v55  ;;  %v13748_v44 = vpack.c.bf16 %v402_v48, %v401_v13  ;;  %v6090_v24 = vcombine.low %v6046_v1, %v6078_v60  ;;  %v405_v43 = vld [vmem:[%s15382_s4 + $0xb0] sm:$0xff]  ;;  %v415_v1 = vld [vmem:[%s15382_s4 + $0x100] sm:$0xff]  ;;  %v416_v60 = vld [vmem:[%s15382_s4 + $0x108] sm:$0xff] }
 0x1ef   : > { %11756 = vmatprep.subr.bf16.mxu0 %v15386_v52  ;;  %6614 = vxpose.xlu0.b32.start.end [1/1] (short) (narrow) %v5954_v2, 8  ;;  %15447 = vst [vmem:[#allocation18_spill] sm:$0xff] %v13744_v21  ;;  %v6093_v6 = vcombine.high %v6053_v7, %v6085_v19  ;;  %v404_v2 = vld [vmem:[%s15382_s4 + $0xa8] sm:$0xff]  ;;  %v6092_v15 = vcombine.low %v6053_v7, %v6085_v19  ;;  %v413_v16 = vld [vmem:[%s15382_s4 + $0xf0] sm:$0xff]  ;;  %v423_v7 = vld [vmem:[%s15382_s4 + $0x140] sm:$0xff] }
 0x1f0   : > { %6774 = vxpose.xlu1.b32.start.end [1/1] (short) (narrow) %v6087_v26, 8  ;;  %15448 = vst [vmem:[#allocation19_spill] sm:$0xff] %v13748_v44  ;;  %v6223_v41 = vcombine.high %v6166_v59, %v6198_v56  ;;  %v13777_v63 = vpack.c.bf16 %v410_v27, %v409_v33  ;;  %v13779_v26 = vpack.c.bf16 %v404_v2, %v403_v62  ;;  %v424_v10 = vld [vmem:[%s15382_s4 + $0x148] sm:$0xff]  ;;  %v417_v19 = vld [vmem:[%s15382_s4 + $0x110] sm:$0xff]  ;;  %v418_v58 = vld [vmem:[%s15382_s4 + $0x118] sm:$0xff] }
 0x1f1   : > { %v6222_v34 = vcombine.low %v6166_v59, %v6198_v56  ;;  %v13801_v32 = vpack.c.bf16 %v412_v0, %v411_v11  ;;  %v13856_v45 = vpack.c.bf16 %v424_v10, %v423_v7  ;;  %v13858_v13 = vpack.c.bf16 %v418_v58, %v417_v19  ;;  %v13861_v48 = vld [vmem:[%s12513_s11 + $0x18] sm:$0xff]  ;;  %v419_v59 = vld [vmem:[%s15382_s4 + $0x120] sm:$0xff]  ;;  %v420_v56 = vld [vmem:[%s15382_s4 + $0x128] sm:$0xff] }
 0x1f2   : > { %11755 = vmatpush3.bf16.xpose.msk.msra.mxu1 %vm13417_vm1, %v13704_v46  ;;  %15449 = vst [vmem:[#allocation20_spill] sm:$0xff] %v13777_v63  ;;  %15450 = vst [vmem:[#allocation21_spill] sm:$0xff] %v13779_v26  ;;  %v427_v33 = vld [vmem:[%s15382_s4 + $0x160] sm:$0xff]  ;;  %v428_v27 = vld [vmem:[%s15382_s4 + $0x168] sm:$0xff] }
 0x1f3   : > { %6678 = vxpose.xlu0.b32.start.end [1/1] (short) (narrow) %v5956_v51, 8  ;;  %11772 = vmatprep.subr.bf16.mxu1 %v15386_v52  ;;  %15451 = vst [vmem:[#allocation22_spill] sm:$0xff] %v13801_v32  ;;  %v13803_v51 = vpack.c.bf16 %v406_v29, %v405_v43  ;;  %15455 = vst [vmem:[#allocation26_spill] sm:$0xff] %v13856_v45  ;;  %v421_v62 = vld [vmem:[%s15382_s4 + $0x130] sm:$0xff]  ;;  %v422_v2 = vld [vmem:[%s15382_s4 + $0x138] sm:$0xff] }
 0x1f4   : > { %6838 = vxpose.xlu1.b32.start.end [1/1] (short) (narrow) %v6089_v50, 8  ;;  %v414_v50 = vld [vmem:[%s15382_s4 + $0xf8] sm:$0xff]  ;;  %15456 = vst [vmem:[#allocation27_spill] sm:$0xff] %v13858_v13  ;;  %v429_v11 = vld [vmem:[%s15382_s4 + $0x170] sm:$0xff]  ;;  %v431_v43 = vld [vmem:[%s15382_s4 + $0x180] sm:$0xff] }
 0x1f5   : > { %11101 = vmatmul.mubr.msk.f32.vlgmr.msra.gmra.mrb[32].mxu0 %vm2839_vm0, %v13728_v30  ;;  %15452 = vst [vmem:[#allocation23_spill] sm:$0xff] %v13803_v51  ;;  %v13825_v17 = vpack.c.bf16 %v414_v50, %v413_v16  ;;  %v430_v0 = vld [vmem:[%s15382_s4 + $0x178] sm:$0xff]  ;;  %v432_v29 = vld [vmem:[%s15382_s4 + $0x188] sm:$0xff]  ;;  %v13950_v7 = vld [vmem:[%s12513_s11 + $0x20] sm:$0xff] }
 0x1f6   : > { %11759 = vmatpush3.bf16.xpose.msk.msra.mxu0 %vm13417_vm1, %v13708_v5  ;;  %11138 = vmatprep.mubr.msk.f32.mxu0 %vm12414_vm2, %v15384_v23  ;;  %v13935_v16 = vpack.c.bf16 %v430_v0, %v429_v11  ;;  %v13937_v50 = vpack.c.bf16 %v432_v29, %v431_v43  ;;  %v433_v10 = vld [vmem:[%s15382_s4 + $0x190] sm:$0xff]  ;;  %v434_v19 = vld [vmem:[%s15382_s4 + $0x198] sm:$0xff]  ;;  %v443_v11 = vld [vmem:[%s15382_s4 + $0x1e0] sm:$0xff] }
 0x1f7   : > { %11760 = vmatprep.subr.bf16.mxu0 %v15386_v52  ;;  %6742 = vxpose.xlu0.b32.start.end [1/1] (short) (narrow) %v6086_v22, 8  ;;  %15453 = vst [vmem:[#allocation24_spill] sm:$0xff] %v13825_v17  ;;  %v13827_v22 = vpack.c.bf16 %v416_v60, %v415_v1  ;;  %v439_v1 = vld [vmem:[%s15382_s4 + $0x1c0] sm:$0xff]  ;;  %v440_v60 = vld [vmem:[%s15382_s4 + $0x1c8] sm:$0xff]  ;;  %v437_v43 = vld [vmem:[%s15382_s4 + $0x1b0] sm:$0xff] }
 0x1f8   : > { %6902 = vxpose.xlu1.b32.start.end [1/1] (short) (narrow) %v6091_v42, 8  ;;  %v13840_v42 = vld [vmem:[%s12513_s11 + $0x10] sm:$0xff]  ;;  %15461 = vst [vmem:[#allocation32_spill] sm:$0xff] %v13935_v16  ;;  %15462 = vst [vmem:[#allocation33_spill] sm:$0xff] %v13937_v50  ;;  %v13966_v58 = vpack.c.bf16 %v440_v60, %v439_v1  ;;  %v444_v0 = vld [vmem:[%s15382_s4 + $0x1e8] sm:$0xff] }
 0x1f9   : > { %11120 = vmatmul.mubr.msk.f32.vlgmr.msra.gmra.mrb[32].mxu1 %vm2839_vm0, %v13751_v9  ;;  %15454 = vst [vmem:[#allocation25_spill] sm:$0xff] %v13827_v22  ;;  %v438_v29 = vld [vmem:[%s15382_s4 + $0x1b8] sm:$0xff]  ;;  %v14027_v1 = vpack.c.bf16 %v444_v0, %v443_v11  ;;  %v455_v60 = vld [vmem:[%s14015_s15] sm:$0xff]  ;;  %v457_v11 = vld [vmem:[%s14015_s15 + $0x10] sm:$0xff] }
 0x1fa   : > { %11775 = vmatpush3.bf16.xpose.msk.msra.mxu1 %vm13417_vm1, %v13744_v21  ;;  %11157 = vmatprep.mubr.msk.f32.mxu1 %vm12414_vm2, %v15384_v23  ;;  %15463 = vst [vmem:[#allocation34_spill] sm:$0xff] %v13966_v58  ;;  %v458_v0 = vld [vmem:[%s14015_s15 + $0x18] sm:$0xff] }
 0x1fb   : > { %6806 = vxpose.xlu0.b32.start.end [1/1] (short) (narrow) %v6088_v47, 8  ;;  %11776 = vmatprep.subr.bf16.mxu1 %v15386_v52  ;;  %v425_v47 = vld [vmem:[%s15382_s4 + $0x150] sm:$0xff]  ;;  %15467 = vst [vmem:[#allocation38_spill] sm:$0xff] %v14027_v1 }
 0x1fc   : > { %6966 = vxpose.xlu1.b32.start.end [1/1] (short) (narrow) %v6093_v6, 8  ;;  %v426_v6 = vld [vmem:[%s15382_s4 + $0x158] sm:$0xff] }
 0x1fe   : > { %11763 = vmatpush3.bf16.xpose.msk.msra.mxu0 %vm13417_vm1, %v13748_v44 }
 0x1ff   : > { %11764 = vmatprep.subr.bf16.mxu0 %v15386_v52  ;;  %6870 = vxpose.xlu0.b32.start.end [1/1] (short) (narrow) %v6090_v24, 8  ;;  %v13887_v24 = vpack.c.bf16 %v426_v6, %v425_v47  ;;  %v13968_v47 = vpack.c.bf16 %v434_v19, %v433_v10  ;;  %v13971_v6 = vld [vmem:[%s12513_s11 + $0x28] sm:$0xff]  ;;  %v14031_v19 = vpack.c.bf16 %v438_v29, %v437_v43  ;;  %v12257_v29 = vld [vmem:[%s12513_s11 + $0x30] sm:$0xff] }
 0x200   : > { %7030 = vxpose.xlu1.b32.start.end [1/1] (short) (narrow) %v6223_v41, 8  ;;  %v13889_v41 = vpack.c.bf16 %v420_v56, %v419_v59  ;;  %v441_v59 = vld [vmem:[%s15382_s4 + $0x1d0] sm:$0xff]  ;;  %v442_v56 = vld [vmem:[%s15382_s4 + $0x1d8] sm:$0xff]  ;;  %v456_v10 = vld [vmem:[%s14015_s15 + $0x8] sm:$0xff]  ;;  %v11858_v43 = vpack.c.bf16 %v458_v0, %v457_v11 }
 0x201   : > { %15457 = vst [vmem:[#allocation28_spill] sm:$0xff] %v13887_v24  ;;  %15464 = vst [vmem:[#allocation35_spill] sm:$0xff] %v13968_v47  ;;  %v461_v11 = vld [vmem:[%s14015_s15 + $0x30] sm:$0xff] }
 0x202   : > { %11779 = vmatpush3.bf16.xpose.msk.msra.mxu1 %vm13417_vm1, %v13777_v63  ;;  %15458 = vst [vmem:[#allocation29_spill] sm:$0xff] %v13889_v41  ;;  %15468 = vst [vmem:[#allocation39_spill] sm:$0xff] %v14031_v19 }
 0x203   : > { %6934 = vxpose.xlu0.b32.start.end [1/1] (short) (narrow) %v6092_v15, 8  ;;  %11780 = vmatprep.subr.bf16.mxu1 %v15386_v52  ;;  %v13911_v15 = vpack.c.bf16 %v428_v27, %v427_v33  ;;  %v435_v33 = vld [vmem:[%s15382_s4 + $0x1a0] sm:$0xff]  ;;  %v436_v27 = vld [vmem:[%s15382_s4 + $0x1a8] sm:$0xff] }
 0x205   : > { %15459 = vst [vmem:[#allocation30_spill] sm:$0xff] %v13911_v15 }
 0x206   : > { %11767 = vmatpush3.bf16.xpose.msk.msra.mxu0 %vm13417_vm1, %v13779_v26 }
 0x207   : > { %11768 = vmatprep.subr.bf16.mxu0 %v15386_v52  ;;  %6998 = vxpose.xlu0.b32.start.end [1/1] (short) (narrow) %v6222_v34, 8  ;;  %v13913_v34 = vpack.c.bf16 %v422_v2, %v421_v62  ;;  %v13997_v62 = vpack.c.bf16 %v442_v56, %v441_v59  ;;  %v13999_v2 = vpack.c.bf16 %v436_v27, %v435_v33  ;;  %v445_v56 = vld [vmem:[%s15382_s4 + $0x1f0] sm:$0xff]  ;;  %v446_v33 = vld [vmem:[%s15382_s4 + $0x1f8] sm:$0xff] }
 0x208   : > { %v11852_v59 = vpack.c.bf16 %v456_v10, %v455_v60  ;;  %v14048_v27 = vpack.c.bf16 %v446_v33, %v445_v56  ;;  %v459_v60 = vld [vmem:[%s14015_s15 + $0x20] sm:$0xff]  ;;  %v460_v10 = vld [vmem:[%s14015_s15 + $0x28] sm:$0xff]  ;;  %v12258_v56 = vld [vmem:[%s12513_s11 + $0x38] sm:$0xff] }
 0x209   : > { %15460 = vst [vmem:[#allocation31_spill] sm:$0xff] %v13913_v34  ;;  %15465 = vst [vmem:[#allocation36_spill] sm:$0xff] %v13997_v62  ;;  %v11864_v33 = vpack.c.bf16 %v460_v10, %v459_v60 }
 0x20a   : > { %11783 = vmatpush3.bf16.xpose.msk.msra.mxu1 %vm13417_vm1, %v13801_v32  ;;  %15466 = vst [vmem:[#allocation37_spill] sm:$0xff] %v13999_v2  ;;  %15469 = vst [vmem:[#allocation40_spill] sm:$0xff] %v14048_v27 }
 0x20b   : > { %11784 = vmatprep.subr.bf16.mxu1 %v15386_v52 }
 0x20e   : > { %11771 = vmatpush3.bf16.xpose.msk.msra.mxu0 %vm13417_vm1, %v13803_v51 }
 0x20f   : > { %11788 = vmatprep.subr.bf16.mxu0 %v15386_v52 }
 0x212   : > { %11787 = vmatpush3.bf16.xpose.msk.msra.mxu1 %vm13417_vm1, %v13825_v17 }
 0x213   : > { %11804 = vmatprep.subr.bf16.mxu1 %v15386_v52 }
 0x215   : > { %11139 = vmatmul.mubr.msk.f32.vlgmr.msra.gmra.mrb[34].mxu0 %vm2839_vm0, %v13840_v42 }
 0x216   : > { %11791 = vmatpush3.bf16.xpose.msk.msra.mxu0 %vm13417_vm1, %v13827_v22  ;;  %11176 = vmatprep.mubr.msk.f32.mxu0 %vm12414_vm2, %v15384_v23 }
 0x217   : > { %11792 = vmatprep.subr.bf16.mxu0 %v15386_v52 }
 0x219   : > { %11158 = vmatmul.mubr.msk.f32.vlgmr.msra.gmra.mrb[34].mxu1 %vm2839_vm0, %v13861_v48 }
 0x21a   : > { %11807 = vmatpush3.bf16.xpose.msk.msra.mxu1 %vm13417_vm1, %v13856_v45  ;;  %11195 = vmatprep.mubr.msk.f32.mxu1 %vm12414_vm2, %v15384_v23 }
 0x21b   : > { %11808 = vmatprep.subr.bf16.mxu1 %v15386_v52 }
 0x21e   : > { %11795 = vmatpush3.bf16.xpose.msk.msra.mxu0 %vm13417_vm1, %v13858_v13 }
 0x21f   : > { %11796 = vmatprep.subr.bf16.mxu0 %v15386_v52 }
 0x222   : > { %11811 = vmatpush3.bf16.xpose.msk.msra.mxu1 %vm13417_vm1, %v13887_v24 }
 0x223   : > { %11812 = vmatprep.subr.bf16.mxu1 %v15386_v52 }
 0x226   : > { %11799 = vmatpush3.bf16.xpose.msk.msra.mxu0 %vm13417_vm1, %v13889_v41 }
 0x227   : > { %11800 = vmatprep.subr.bf16.mxu0 %v15386_v52 }
 0x22a   : > { %11815 = vmatpush3.bf16.xpose.msk.msra.mxu1 %vm13417_vm1, %v13911_v15 }
 0x22b   : > { %11816 = vmatprep.subr.bf16.mxu1 %v15386_v52 }
 0x22e   : > { %11803 = vmatpush3.bf16.xpose.msk.msra.mxu0 %vm13417_vm1, %v13913_v34 }
 0x22f   : > { %11820 = vmatprep.subr.bf16.mxu0 %v15386_v52 }
 0x232   : > { %11819 = vmatpush3.bf16.xpose.msk.msra.mxu1 %vm13417_vm1, %v13935_v16 }
 0x233   : > { %11836 = vmatprep.subr.bf16.mxu1 %v15386_v52 }
 0x235   : > { %11177 = vmatmul.mubr.msk.f32.vlgmr.msra.gmra.mrb[36].mxu0 %vm2839_vm0, %v13950_v7 }
 0x236   : > { %11823 = vmatpush3.bf16.xpose.msk.msra.mxu0 %vm13417_vm1, %v13937_v50  ;;  %11214 = vmatprep.mubr.msk.f32.mxu0 %vm12414_vm2, %v15384_v23 }
 0x237   : > { %11824 = vmatprep.subr.bf16.mxu0 %v15386_v52 }
 0x239   : > { %11196 = vmatmul.mubr.msk.f32.vlgmr.msra.gmra.mrb[36].mxu1 %vm2839_vm0, %v13971_v6 }
 0x23a   : > { %11839 = vmatpush3.bf16.xpose.msk.msra.mxu1 %vm13417_vm1, %v13966_v58  ;;  %11233 = vmatprep.mubr.msk.f32.mxu1 %vm12414_vm2, %v15384_v23 }
 0x23b   : > { %11840 = vmatprep.subr.bf16.mxu1 %v15386_v52 }
 0x23e   : > { %11827 = vmatpush3.bf16.xpose.msk.msra.mxu0 %vm13417_vm1, %v13968_v47 }
 0x23f   : > { %11828 = vmatprep.subr.bf16.mxu0 %v15386_v52 }
 0x242   : > { %11843 = vmatpush3.bf16.xpose.msk.msra.mxu1 %vm13417_vm1, %v13997_v62  ;;  %v470_v62 = vld [vmem:[%s14093_s13 + $0x38] sm:$0xff] }
 0x243   : > { %11844 = vmatprep.subr.bf16.mxu1 %v15386_v52 }
 0x246   : > { %11831 = vmatpush3.bf16.xpose.msk.msra.mxu0 %vm13417_vm1, %v13999_v2 }
 0x247   : > { %11832 = vmatprep.subr.bf16.mxu0 %v15386_v52 }
 0x24a   : > { %11847 = vmatpush3.bf16.xpose.msk.msra.mxu1 %vm13417_vm1, %v14027_v1 }
 0x24b   : > { %11848 = vmatprep.subr.bf16.mxu1 %v15386_v52 }
 0x24e   : > { %11835 = vmatpush3.bf16.xpose.msk.msra.mxu0 %vm13417_vm1, %v14031_v19  ;;  %v468_v19 = vld [vmem:[%s14093_s13 + $0x28] sm:$0xff] }
 0x24f   : > { %11854 = vmatprep.subr.msk.bf16.mxu0 %vm13417_vm1, %v11852_v59 }
 0x252   : > { %11851 = vmatpush3.bf16.xpose.msk.msra.mxu1 %vm13417_vm1, %v14048_v27  ;;  %v467_v27 = vld [vmem:[%s14093_s13 + $0x20] sm:$0xff] }
 0x253   : > { %v6278_v23 = vpop.trf.xlu1 }
 0x255   : > { %11215 = vmatmul.mubr.msk.f32.vlgmr.msra.gmra.mrb[38].mxu0 %vm2839_vm0, %v12257_v29 }
 0x256   : > { %11857 = vmatpush3.bf16.xpose.msk.msra.mxu0 %vm13417_vm1, %v11852_v59  ;;  %11252 = vmatprep.mubr.msk.f32.mxu0 %vm2839_vm0, %v13728_v30  ;;  %v462_v59 = vld [vmem:[%s14015_s15 + $0x38] sm:$0xff] }
 0x257   : > { %11860 = vmatprep.subr.msk.bf16.mxu0 %vm13417_vm1, %v11858_v43  ;;  %v11870_v0 = vpack.c.bf16 %v462_v59, %v461_v11 }
 0x259   : > { %11234 = vmatmul.mubr.msk.f32.vlgmr.msra.gmra.mrb[38].mxu1 %vm2839_vm0, %v12258_v56 }
 0x25e   : > { %11863 = vmatpush3.bf16.xpose.msk.msra.mxu0 %vm13417_vm1, %v11858_v43 }
 0x25f   : > { %11866 = vmatprep.subr.msk.bf16.mxu0 %vm13417_vm1, %v11864_v33 }
 0x266   : > { %11869 = vmatpush3.bf16.xpose.msk.msra.mxu0 %vm13417_vm1, %v11864_v33  ;;  %v6246_v33 = vpop.trf.xlu0 }
 0x267   : > { %11872 = vmatprep.subr.msk.bf16.mxu0 %vm13417_vm1, %v11870_v0 }
 0x26e   : > { %11875 = vmatpush3.bf16.xpose.msk.msra.mxu0 %vm13417_vm1, %v11870_v0 }
 0x275   : > { %11253 = vmatmul.mubr.msk.f32.vlgmr.msra.gmra.mrb[40].mxu0 %vm2839_vm0, %v13751_v9 }
 0x276   : > { %11255 = vmatprep.mubr.msk.f32.mxu0 %vm2839_vm0, %v13840_v42  ;;  %v6310_v42 = vpop.trf.xlu0 }
 0x278   : > { %v10934_v30 = vpop.f32.mrb[0].mxu0  ;;  %v10954_v43 = vpop.f32.mrb[0].mxu1 }
 0x279   : > { %v2930_v60 = vpop.f32.mrb[1].mxu0  ;;  %v3059_v10 = vpop.f32.mrb[1].mxu1  ;;  %11256 = vmatmul.mubr.msk.f32.gmra.mrb[42].mxu0 %vm2839_vm0, %v13861_v48  ;;  %v7254_v48 = vcombine.low %v6246_v33, %v6310_v42 }
 0x27a   : > { %3904 = vxpose.xlu1.b32.start [1/8] (short) (narrow) %v3059_v10, 8  ;;  %3872 = vxpose.xlu0.b32.start [1/8] (short) (narrow) %v2930_v60, 8  ;;  %v463_v60 = vld [vmem:[%s14093_s13] sm:$0xff] }
 0x27b   : > { %11258 = vmatprep.mubr.msk.f32.mxu0 %vm2839_vm0, %v13950_v7  ;;  %v7255_v7 = vcombine.high %v6246_v33, %v6310_v42  ;;  %v6342_v33 = vpop.trf.xlu0  ;;  %v6406_v42 = vpop.trf.xlu1 }
 0x27c   : > { %v10957_v11 = vpop.f32.mrb[2].mxu1  ;;  %v10937_v59 = vpop.f32.mrb[2].mxu0  ;;  %v7270_v2 = vcombine.low %v6278_v23, %v6342_v33 }
 0x27d   : > { %v3069_v9 = vpop.f32.mrb[3].mxu1  ;;  %v2940_v0 = vpop.f32.mrb[3].mxu0  ;;  %11259 = vmatmul.mubr.msk.f32.gmra.mrb[44].mxu0 %vm2839_vm0, %v13971_v6  ;;  %v464_v6 = vld [vmem:[%s14093_s13 + $0x8] sm:$0xff]  ;;  %v14111_v1 = vrot.slane %v7255_v7, %v12559_v40 }
 0x27e   : > { %3905 = vxpose.xlu1.b32.cont [2/8] (short) (narrow) %v10954_v43, 8  ;;  %3873 = vxpose.xlu0.b32.cont [2/8] (short) (narrow) %v10934_v30, 8  ;;  %v465_v30 = vld [vmem:[%s14093_s13 + $0x10] sm:$0xff]  ;;  %v11876_v52 = vpack.c.bf16 %v464_v6, %v463_v60  ;;  %v7271_v60 = vcombine.high %v6278_v23, %v6342_v33  ;;  %v14122_v7 = vrot.slane %v7270_v2, %v12559_v40 }
 0x27f   : > { %11261 = vmatprep.mubr.msk.f32.mxu0 %vm2839_vm0, %v12257_v29  ;;  %v11880_v61 = vpack.c.bf16 %v466_v49, %v465_v30  ;;  %v14106_v29 = vrot.slane %v7254_v48, %v12559_v40  ;;  %v12259_v49 = vld [vmem:[%s15381_s3 + $0x40] sm:$0xff]  ;;  %v11884_v6 = vpack.c.bf16 %v468_v19, %v467_v27  ;;  %v6374_v30 = vpop.trf.xlu0  ;;  %v6470_v33 = vpop.trf.xlu1 }
 0x280   : > { %v14099_v43 = vpop.f32.mrb[4].mxu1  ;;  %v14101_v10 = vpop.f32.mrb[4].mxu0  ;;  %11877 = vmatprep.subr.bf16.mxu1 %v11876_v52  ;;  %v14125_v23 = vrot.slane %v7271_v60, %v12559_v40  ;;  %v7302_v19 = vcombine.low %v6406_v42, %v6470_v33  ;;  %v7303_v27 = vcombine.high %v6406_v42, %v6470_v33 }
 0x281   : > { %v3079_v36 = vpop.f32.mrb[5].mxu1  ;;  %v2950_v3 = vpop.f32.mrb[5].mxu0  ;;  %11262 = vmatmul.mubr.msk.f32.gmra.mrb[46].mxu0 %vm2839_vm0, %v12258_v56  ;;  %11879 = vmatpush3.bf16.msra.mxu1 %v11876_v52  ;;  %v7318_v26 = vcombine.low %v14106_v29, %v14122_v7 }
 0x282   : > { %3906 = vxpose.xlu1.b32.cont [3/8] (short) (narrow) %v3069_v9, 8  ;;  %3874 = vxpose.xlu0.b32.cont [3/8] (short) (narrow) %v2940_v0, 8  ;;  %v14142_v52 = vrot.slane %v7302_v19, %v12559_v40  ;;  %v14145_v2 = vrot.slane %v7303_v27, %v12559_v40 }
 0x283   : > { %11320 = vmatprep.mubr.msk.f32.mxu0 %vm2839_vm0, %v12259_v49  ;;  %11881 = vmatprep.subr.bf16.mxu1 %v11880_v61  ;;  %v469_v49 = vld [vmem:[%s14093_s13 + $0x30] sm:$0xff]  ;;  %v6438_v47 = vpop.trf.xlu0  ;;  %v6534_v16 = vpop.trf.xlu1 }
 0x284   : > { %v14117_v56 = vpop.f32.mrb[6].mxu1  ;;  %v14119_v9 = vpop.f32.mrb[6].mxu0  ;;  %v11888_v50 = vpack.c.bf16 %v470_v62, %v469_v49  ;;  %v7286_v34 = vcombine.low %v6374_v30, %v6438_v47  ;;  %v7287_v15 = vcombine.high %v6374_v30, %v6438_v47 }
 0x285   : > { %v3089_v0 = vpop.f32.mrb[7].mxu1  ;;  %v2960_v48 = vpop.f32.mrb[7].mxu0  ;;  %11883 = vmatpush3.bf16.msra.mxu1 %v11880_v61 }
 0x286   : > { %3907 = vxpose.xlu1.b32.cont [4/8] (short) (narrow) %v10957_v11, 8  ;;  %3875 = vxpose.xlu0.b32.cont [4/8] (short) (narrow) %v10937_v59, 8 }
 0x287   : > { %11885 = vmatprep.subr.bf16.mxu1 %v11884_v6  ;;  %v6502_v47 = vpop.trf.xlu0  ;;  %v6598_v30 = vpop.trf.xlu1 }
 0x288   : > { %v14135_v58 = vpop.f32.mrb[8].mxu1  ;;  %v14137_v60 = vpop.f32.mrb[8].mxu0  ;;  %v7406_v19 = vcombine.low %v6534_v16, %v6598_v30  ;;  %v7407_v27 = vcombine.high %v6534_v16, %v6598_v30 }
 0x289   : > { %v14139_v11 = vpop.f32.mrb[9].mxu1  ;;  %v3188_v59 = vpop.f32.mrb[9].mxu0  ;;  %11887 = vmatpush3.bf16.msra.mxu1 %v11884_v6 }
 0x28a   : > { %3908 = vxpose.xlu1.b32.cont [5/8] (short) (narrow) %v3079_v36, 8  ;;  %3876 = vxpose.xlu0.b32.cont [5/8] (short) (narrow) %v2950_v3, 8  ;;  %v14156_v3 = vrot.slane %v7286_v34, %v12559_v40  ;;  %v14159_v36 = vrot.slane %v7287_v15, %v12559_v40  ;;  %v14178_v33 = vrot.slane %v7406_v19, %v12559_v40 }
 0x28b   : > { %11889 = vmatprep.subr.bf16.mxu1 %v11888_v50  ;;  %v6566_v6 = vpop.trf.xlu0  ;;  %v6662_v24 = vpop.trf.xlu1  ;;  %v14181_v34 = vrot.slane %v7407_v27, %v12559_v40 }
 0x28c   : > { %v14147_v41 = vpop.f32.mrb[10].mxu1  ;;  %v14149_v61 = vpop.f32.mrb[10].mxu0  ;;  %v7390_v13 = vcombine.low %v6502_v47, %v6566_v6  ;;  %v7391_v45 = vcombine.high %v6502_v47, %v6566_v6  ;;  %v7350_v6 = vcombine.low %v14156_v3, %v14142_v52 }
 0x28d   : > { %v14151_v42 = vpop.f32.mrb[11].mxu1  ;;  %v14153_v62 = vpop.f32.mrb[11].mxu0  ;;  %11891 = vmatpush3.bf16.msra.mxu1 %v11888_v50 }
 0x28e   : > { %3909 = vxpose.xlu1.b32.cont [6/8] (short) (narrow) %v14099_v43, 8  ;;  %3877 = vxpose.xlu0.b32.cont [6/8] (short) (narrow) %v14101_v10, 8 }
 0x28f   : > { %v6630_v19 = vpop.trf.xlu0  ;;  %v6726_v47 = vpop.trf.xlu1 }
 0x290   : > { %v14169_v49 = vpop.f32.mrb[12].mxu1  ;;  %v14171_v15 = vpop.f32.mrb[12].mxu0  ;;  %v7439_v32 = vcombine.high %v6662_v24, %v6726_v47 }
 0x291   : > { %v14173_v43 = vpop.f32.mrb[13].mxu1  ;;  %v14175_v10 = vpop.f32.mrb[13].mxu0 }
 0x292   : > { %3910 = vxpose.xlu1.b32.cont [7/8] (short) (narrow) %v3089_v0, 8  ;;  %3878 = vxpose.xlu0.b32.cont [7/8] (short) (narrow) %v2960_v48, 8  ;;  %v14192_v0 = vrot.slane %v7390_v13, %v12559_v40  ;;  %v14195_v48 = vrot.slane %v7391_v45, %v12559_v40  ;;  %v7438_v45 = vcombine.low %v6662_v24, %v6726_v47 }
 0x293   : > { %v6694_v27 = vpop.trf.xlu0  ;;  %v6790_v63 = vpop.trf.xlu1  ;;  %v14224_v47 = vrot.slane %v7439_v32, %v12559_v40 }
 0x294   : > { %v14183_v22 = vpop.f32.mrb[14].mxu1  ;;  %v14185_v16 = vpop.f32.mrb[14].mxu0  ;;  %v7454_v17 = vcombine.low %v14192_v0, %v14178_v33  ;;  %v14221_v24 = vrot.slane %v7438_v45, %v12559_v40  ;;  %v7422_v44 = vcombine.low %v6630_v19, %v6694_v27  ;;  %v7423_v21 = vcombine.high %v6630_v19, %v6694_v27 }
 0x295   : > { %v14187_v50 = vpop.f32.mrb[15].mxu1  ;;  %v14189_v30 = vpop.f32.mrb[15].mxu0 }
 0x296   : > { %3911 = vxpose.xlu1.b32.end [8/8] (short) (narrow) %v14117_v56, 8  ;;  %3879 = vxpose.xlu0.b32.end [8/8] (short) (narrow) %v14119_v9, 8  ;;  %v14233_v20 = vrot.slane %v7422_v44, %v12559_v40  ;;  %v14236_v54 = vrot.slane %v7423_v21, %v12559_v40  ;;  %v7462_v32 = vrot.slane %v7454_v17, %v12565_v55 }
 0x297   : > { %v6758_v19 = vpop.trf.xlu0  ;;  %v6854_v27 = vpop.trf.xlu1 }
 0x298   : > { %v14205_v13 = vpop.f32.mrb[16].mxu1  ;;  %v14207_v51 = vpop.f32.mrb[16].mxu0  ;;  %v7487_v44 = vcombine.high %v14233_v20, %v14221_v24  ;;  %v7542_v17 = vcombine.low %v6790_v63, %v6854_v27  ;;  %v7543_v14 = vcombine.high %v6790_v63, %v6854_v27 }
 0x299   : > { %v14209_v56 = vpop.f32.mrb[17].mxu1  ;;  %v14211_v9 = vpop.f32.mrb[17].mxu0 }
 0x29a   : > { %3968 = vxpose.xlu1.b32.start [1/8] (short) (narrow) %v14139_v11, 8  ;;  %3936 = vxpose.xlu0.b32.start [1/8] (short) (narrow) %v3188_v59, 8  ;;  %v7326_v11 = vrot.slane %v7318_v26, %v12565_v55  ;;  %v7358_v59 = vrot.slane %v7350_v6, %v12565_v55  ;;  %v7486_v26 = vcombine.low %v14233_v20, %v14221_v24 }
 0x29b   : > { %v14261_v20 = vrot.slane %v7542_v17, %v12559_v40  ;;  %v14264_v24 = vrot.slane %v7543_v14, %v12559_v40  ;;  %v6918_v21 = vpop.trf.xlu1 }
 0x29c   : > { %v14226_v5 = vpop.f32.mrb[18].mxu0  ;;  %v7494_v53 = vrot.slane %v7486_v26, %v12565_v55  ;;  %v7383_v38 = vcombine.high %v7326_v11, %v7358_v59  ;;  %v7382_v4 = vcombine.low %v7326_v11, %v7358_v59 }
 0x29d   : > { %v14228_v46 = vpop.f32.mrb[19].mxu0 }
 0x29e   : > { %3969 = vxpose.xlu1.b32.cont [2/8] (short) (narrow) %v14135_v58, 8  ;;  %3937 = vxpose.xlu0.b32.cont [2/8] (short) (narrow) %v14137_v60, 8  ;;  %v6822_v58 = vpop.trf.xlu0  ;;  %v7519_v63 = vcombine.high %v7462_v32, %v7494_v53  ;;  %v7518_v27 = vcombine.low %v7462_v32, %v7494_v53 }
 0x29f   : > { %v14241_v45 = vpop.f32.mrb[18].mxu1  ;;  %v7526_v8 = vcombine.low %v6758_v19, %v6822_v58  ;;  %v7527_v26 = vcombine.high %v6758_v19, %v6822_v58  ;;  %v6982_v32 = vpop.trf.xlu1 }
 0x2a0   : > { %v14251_v6 = vpop.f32.mrb[19].mxu1  ;;  %v14253_v60 = vpop.f32.mrb[20].mxu0  ;;  %v14274_v59 = vpack.c.bf16 %v7518_v27, %v7382_v4  ;;  %v7575_v27 = vcombine.high %v6918_v21, %v6982_v32 }
 0x2a1   : > { %v14255_v57 = vpop.f32.mrb[21].mxu0  ;;  %v14277_v14 = vrot.slane %v7526_v8, %v12559_v40  ;;  %v14280_v17 = vrot.slane %v7527_v26, %v12559_v40  ;;  %v15473_v8 = vcombine.low %v14111_v1, %v14125_v23 }
 0x2a2   : > { %3970 = vxpose.xlu1.b32.cont [3/8] (short) (narrow) %v14151_v42, 8  ;;  %3938 = vxpose.xlu0.b32.cont [3/8] (short) (narrow) %v14153_v62, 8  ;;  %v11900_v62 = vpack.c.bf16 %v7519_v63, %v7383_v38  ;;  %15470 = vst [vmem:[#allocation41_spill] sm:$0xff] %v14274_v59  ;;  %v6886_v53 = vpop.trf.xlu0  ;;  %v7574_v63 = vcombine.low %v6918_v21, %v6982_v32 }
 0x2a3   : > { %v14266_v39 = vpop.f32.mrb[20].mxu1  ;;  %11893 = vmatprep.subr.bf16.mxu1 %v14274_v59  ;;  %v15472_v38 = vcombine.high %v14106_v29, %v14122_v7  ;;  %v7342_v59 = vrot.slane %v15473_v8, %v12565_v55  ;;  %v15475_v21 = vcombine.high %v14156_v3, %v14142_v52  ;;  %v15476_v7 = vcombine.high %v14192_v0, %v14178_v33 }
 0x2a4   : > { %v14268_v35 = vpop.f32.mrb[21].mxu1  ;;  %v14270_v11 = vpop.f32.mrb[22].mxu0  ;;  %11901 = vmatprep.subr.bf16.mxu0 %v11900_v62  ;;  %v15479_v33 = vcombine.low %v14159_v36, %v14145_v2 }
 0x2a5   : > { %v14272_v42 = vpop.f32.mrb[23].mxu0  ;;  %11903 = vmatpush3.bf16.msra.mxu0 %v11900_v62  ;;  %v7333_v4 = vrot.slane %v15472_v38, %v12565_v55  ;;  %v15474_v62 = vcombine.high %v14111_v1, %v14125_v23  ;;  %v7365_v29 = vrot.slane %v15475_v21, %v12565_v55  ;;  %v7469_v32 = vrot.slane %v15476_v7, %v12565_v55 }
 0x2a6   : > { %3971 = vxpose.xlu1.b32.cont [4/8] (short) (narrow) %v14147_v41, 8  ;;  %3939 = vxpose.xlu0.b32.cont [4/8] (short) (narrow) %v14149_v61, 8  ;;  %v7501_v38 = vrot.slane %v7487_v44, %v12565_v55  ;;  %v6950_v8 = vpop.trf.xlu0  ;;  %v14327_v1 = vrot.slane %v7574_v63, %v12559_v40  ;;  %v14330_v23 = vrot.slane %v7575_v27, %v12559_v40 }
 0x2a7   : > { %v14284_v19 = vpop.f32.mrb[22].mxu1  ;;  %v7374_v0 = vrot.slane %v15479_v33, %v12565_v55  ;;  %v15480_v44 = vcombine.high %v14159_v36, %v14145_v2  ;;  %v15481_v27 = vcombine.low %v14195_v48, %v14181_v34  ;;  %v15485_v2 = vcombine.high %v14236_v54, %v14224_v47 }
 0x2a8   : > { %v14293_v58 = vpop.f32.mrb[24].mxu0  ;;  %v14295_v41 = vpop.f32.mrb[23].mxu1 }
 0x2a9   : > { %15471 = vst [vmem:[#allocation42_spill] sm:$0xff] %v14293_v58  ;;  %v14299_v26 = vpop.f32.mrb[25].mxu0  ;;  %v7349_v58 = vrot.slane %v15474_v62, %v12565_v55  ;;  %v7381_v63 = vrot.slane %v15480_v44, %v12565_v55  ;;  %v7478_v62 = vrot.slane %v15481_v27, %v12565_v55  ;;  %v7517_v36 = vrot.slane %v15485_v2, %v12565_v55 }
 0x2aa   : > { %3972 = vxpose.xlu1.b32.cont [5/8] (short) (narrow) %v14173_v43, 8  ;;  %3940 = vxpose.xlu0.b32.cont [5/8] (short) (narrow) %v14175_v10, 8  ;;  %v7558_v43 = vcombine.low %v6886_v53, %v6950_v8  ;;  %v7559_v10 = vcombine.high %v6886_v53, %v6950_v8  ;;  %v15482_v53 = vcombine.low %v14236_v54, %v14224_v47 }
 0x2ab   : > { %v14324_v61 = vpop.f32.mrb[24].mxu1  ;;  %v15484_v8 = vcombine.high %v14195_v48, %v14181_v34 }
 0x2ac   : > { %15477 = vst [vmem:[#allocation43_spill] sm:$0xff] %v14324_v61  ;;  %v14332_v52 = vpop.f32.mrb[26].mxu0  ;;  %v14334_v3 = vpop.f32.mrb[25].mxu1  ;;  %v7510_v21 = vrot.slane %v15482_v53, %v12565_v55  ;;  %v7566_v44 = vrot.slane %v7558_v43, %v12559_v40  ;;  %v7573_v27 = vrot.slane %v7559_v10, %v12559_v40  ;;  %v7384_v53 = vcombine.low %v7333_v4, %v7365_v29 }
 0x2ad   : > { %15478 = vst [vmem:[#allocation44_spill] sm:$0xff] %v14332_v52  ;;  %v14352_v7 = vpop.f32.mrb[27].mxu0  ;;  %v7485_v33 = vrot.slane %v15484_v8, %v12565_v55  ;;  %v7520_v52 = vcombine.low %v7469_v32, %v7501_v38  ;;  %v7385_v61 = vcombine.high %v7333_v4, %v7365_v29  ;;  %v7386_v8 = vcombine.low %v7342_v59, %v7374_v0 }
 0x2ae   : > { %15483 = vst [vmem:[#allocation45_spill] sm:$0xff] %v14352_v7  ;;  %3973 = vxpose.xlu1.b32.cont [6/8] (short) (narrow) %v14169_v49, 8  ;;  %3941 = vxpose.xlu0.b32.cont [6/8] (short) (narrow) %v14171_v15, 8  ;;  %v7622_v34 = vcombine.low %v7566_v44, %v14327_v1  ;;  %v7623_v48 = vcombine.high %v7566_v44, %v14327_v1 }
 0x2af   : > { %v14366_v7 = vpop.f32.mrb[26].mxu1  ;;  %v7638_v54 = vcombine.low %v7573_v27, %v14330_v23  ;;  %v7639_v47 = vcombine.high %v7573_v27, %v14330_v23  ;;  %v14376_v49 = vpack.c.bf16 %v7520_v52, %v7384_v53  ;;  %v7521_v15 = vcombine.high %v7469_v32, %v7501_v38 }
 0x2b0   : > { %v14372_v43 = vpop.f32.mrb[28].mxu0  ;;  %v14374_v10 = vpop.f32.mrb[27].mxu1  ;;  %v7522_v2 = vcombine.low %v7478_v62, %v7510_v21  ;;  %v7387_v23 = vcombine.high %v7342_v59, %v7374_v0  ;;  %v7523_v27 = vcombine.high %v7478_v62, %v7510_v21  ;;  %v7388_v40 = vcombine.low %v7349_v58, %v7381_v63 }
 0x2b1   : > { %15486 = vst [vmem:[#allocation46_spill] sm:$0xff] %v14372_v43  ;;  %15487 = vst [vmem:[#allocation47_spill] sm:$0xff] %v14376_v49  ;;  %v14378_v4 = vpop.f32.mrb[29].mxu0  ;;  %v14382_v29 = vpack.c.bf16 %v7521_v15, %v7385_v61  ;;  %v7524_v52 = vcombine.low %v7485_v33, %v7517_v36  ;;  %v7389_v53 = vcombine.high %v7349_v58, %v7381_v63 }
 0x2b2   : > { %3974 = vxpose.xlu1.b32.cont [7/8] (short) (narrow) %v14187_v50, 8  ;;  %3942 = vxpose.xlu0.b32.cont [7/8] (short) (narrow) %v14189_v30, 8  ;;  %v14384_v1 = vpack.c.bf16 %v7522_v2, %v7386_v8  ;;  %v7525_v49 = vcombine.high %v7485_v33, %v7517_v36  ;;  %v14394_v50 = vpack.c.bf16 %v7523_v27, %v7387_v23  ;;  %v14515_v27 = vpop.trf.xlu1 }
 0x2b3   : > { %v14386_v44 = vpop.f32.mrb[28].mxu1  ;;  %v14396_v30 = vpack.c.bf16 %v7524_v52, %v7388_v40  ;;  %v15488_v40 = vcombine.low %v14277_v14, %v14261_v20 }
 0x2b4   : > { %v14388_v32 = vpop.f32.mrb[30].mxu0  ;;  %v14390_v38 = vpop.f32.mrb[29].mxu1  ;;  %v14400_v59 = vpack.c.bf16 %v7525_v49, %v7389_v53 }
 0x2b5   : > { %v14392_v43 = vpop.f32.mrb[31].mxu0 }
 0x2b6   : > { %3975 = vxpose.xlu1.b32.end [8/8] (short) (narrow) %v14183_v22, 8  ;;  %3943 = vxpose.xlu0.b32.end [8/8] (short) (narrow) %v14185_v16, 8  ;;  %v14414_v22 = vrot.slane %v15488_v40, %v12565_v55  ;;  %v15489_v16 = vcombine.high %v14277_v14, %v14261_v20  ;;  %v14446_v20 = vrot.slane %v7639_v47, %v12565_v55 }
 0x2b7   : > { %v14402_v61 = vpop.f32.mrb[30].mxu1 }
 0x2b8   : > { %v3863_v58 = vpop.f32.mrb[31].mxu1 }
 0x2ba   : > { %4032 = vxpose.xlu1.b32.start [1/8] (short) (narrow) %v14209_v56, 8  ;;  %4000 = vxpose.xlu0.b32.start [1/8] (short) (narrow) %v14211_v9, 8  ;;  %v15490_v56 = vcombine.low %v14280_v17, %v14264_v24 }
 0x2bc   : > { %v14434_v9 = vrot.slane %v15490_v56, %v12565_v55 }
 0x2be   : > { %4033 = vxpose.xlu1.b32.cont [2/8] (short) (narrow) %v14205_v13, 8  ;;  %4001 = vxpose.xlu0.b32.cont [2/8] (short) (narrow) %v14207_v51, 8  ;;  %v14422_v13 = vrot.slane %v15489_v16, %v12565_v55  ;;  %v14425_v51 = vrot.slane %v7622_v34, %v12565_v55 }
 0x2c0   : > { %v7654_v63 = vcombine.low %v14414_v22, %v14425_v51 }
 0x2c2   : > { %4034 = vxpose.xlu1.b32.cont [3/8] (short) (narrow) %v14251_v6, 8  ;;  %4002 = vxpose.xlu0.b32.cont [3/8] (short) (narrow) %v14228_v46, 8  ;;  %v14428_v46 = vrot.slane %v7623_v48, %v12565_v55  ;;  %v14443_v6 = vrot.slane %v7638_v54, %v12565_v55  ;;  %v6174_v48 = vcombine.low %v13137_v18, %v13110_v31  ;;  %v15493_v31 = vld [vmem:[#allocation42_spill] sm:$0xff]  ;;  %v15494_v18 = vld [vmem:[#allocation45_spill] sm:$0xff] }
 0x2c3   : > { %v6206_v54 = vcombine.low %v13607_v28, %v13577_v12  ;;  %v15495_v12 = vld [vmem:[#allocation43_spill] sm:$0xff]  ;;  %v15496_v28 = vld [vmem:[#allocation44_spill] sm:$0xff] }
 0x2c4   : > { %v7657_v62 = vcombine.high %v14422_v13, %v14428_v46  ;;  %v7658_v21 = vcombine.low %v14434_v9, %v14443_v6  ;;  %v6182_v47 = vrot.slane %v6174_v48, %v12565_v55 }
 0x2c6   : > { %4035 = vxpose.xlu1.b32.cont [4/8] (short) (narrow) %v14241_v45, 8  ;;  %4003 = vxpose.xlu0.b32.cont [4/8] (short) (narrow) %v14226_v5, 8  ;;  %v15491_v5 = vcombine.high %v14280_v17, %v14264_v24  ;;  %v7655_v24 = vcombine.high %v14414_v22, %v14425_v51  ;;  %v7656_v17 = vcombine.low %v14422_v13, %v14428_v46  ;;  %v15507_v46 = vld [vmem:[#allocation47_spill] sm:$0xff] }
 0x2c8   : > { %v14440_v45 = vrot.slane %v15491_v5, %v12565_v55  ;;  %v14448_v14 = vpop.f32.mrb[32].mxu0 }
 0x2c9   : > { %v11102_v0 = vpop.f32.mrb[33].mxu0 }
 0x2ca   : > { %4036 = vxpose.xlu1.b32.cont [5/8] (short) (narrow) %v14268_v35, 8  ;;  %4004 = vxpose.xlu0.b32.cont [5/8] (short) (narrow) %v14255_v57, 8  ;;  %v7659_v35 = vcombine.high %v14434_v9, %v14443_v6  ;;  %v15505_v22 = vcombine.low %v14440_v45, %v14446_v20  ;;  %v12261_v9 = vld [vmem:[%s15381_s3 + $0x8] sm:$0xff]  ;;  %v12263_v6 = vld [vmem:[%s15381_s3 + $0x10] sm:$0xff] }
 0x2cc   : > { %v14468_v36 = vpop.f32.mrb[32].mxu1 }
 0x2cd   : > { %v11121_v34 = vpop.f32.mrb[33].mxu1 }
 0x2ce   : > { %4037 = vxpose.xlu1.b32.cont [6/8] (short) (narrow) %v14266_v39, 8  ;;  %4005 = vxpose.xlu0.b32.cont [6/8] (short) (narrow) %v14253_v60, 8  ;;  %v6214_v39 = vrot.slane %v6206_v54, %v12565_v55  ;;  %v15492_v60 = vcombine.high %v13598_v37, %v13641_v25 }
 0x2d0   : > { %v6226_v49 = vcombine.low %v6182_v47, %v6214_v39 }
 0x2d2   : > { %4038 = vxpose.xlu1.b32.cont [7/8] (short) (narrow) %v14295_v41, 8  ;;  %4006 = vxpose.xlu0.b32.cont [7/8] (short) (narrow) %v14272_v42, 8  ;;  %v6227_v42 = vcombine.high %v6182_v47, %v6214_v39 }
 0x2d6   : > { %4039 = vxpose.xlu1.b32.end [8/8] (short) (narrow) %v14284_v19, 8  ;;  %4007 = vxpose.xlu0.b32.end [8/8] (short) (narrow) %v14270_v11, 8 }
 0x2da   : > { %7094 = vxpose.xlu1.b32.start.end [1/1] (short) (narrow) %v15492_v60, 8  ;;  %4064 = vxpose.xlu0.b32.start [1/8] (short) (narrow) %v14299_v26, 8  ;;  %v15497_v26 = vld [vmem:[#allocation46_spill] sm:$0xff] }
 0x2de   : > { %7158 = vxpose.xlu1.b32.start.end [1/1] (short) (narrow) %v6227_v42, 8  ;;  %4065 = vxpose.xlu0.b32.cont [2/8] (short) (narrow) %v15493_v31, 8 }
 0x2e2   : > { %4096 = vxpose.xlu1.b32.start [1/8] (short) (narrow) %v14334_v3, 8  ;;  %4066 = vxpose.xlu0.b32.cont [3/8] (short) (narrow) %v15494_v18, 8 }
 0x2e6   : > { %4097 = vxpose.xlu1.b32.cont [2/8] (short) (narrow) %v15495_v12, 8  ;;  %4067 = vxpose.xlu0.b32.cont [4/8] (short) (narrow) %v15496_v28, 8  ;;  %v15499_v12 = vld [vmem:[#allocation5_spill] sm:$0xff] }
 0x2e8   : > { %v14491_v11 = vpop.f32.mrb[34].mxu0 }
 0x2e9   : > { %v11140_v19 = vpop.f32.mrb[35].mxu0 }
 0x2ea   : > { %4098 = vxpose.xlu1.b32.cont [3/8] (short) (narrow) %v14374_v10, 8  ;;  %4068 = vxpose.xlu0.b32.cont [5/8] (short) (narrow) %v14378_v4, 8  ;;  %v15498_v10 = vcombine.low %v13598_v37, %v13641_v25  ;;  %v14517_v37 = vpop.trf.xlu0 }
 0x2ec   : > { %v14495_v41 = vpop.f32.mrb[34].mxu1 }
 0x2ed   : > { %v11159_v3 = vpop.f32.mrb[35].mxu1 }
 0x2ee   : > { %4099 = vxpose.xlu1.b32.cont [4/8] (short) (narrow) %v14366_v7, 8  ;;  %4069 = vxpose.xlu0.b32.cont [6/8] (short) (narrow) %v15497_v26, 8 }
 0x2f2   : > { %4100 = vxpose.xlu1.b32.cont [5/8] (short) (narrow) %v14390_v38, 8  ;;  %4070 = vxpose.xlu0.b32.cont [7/8] (short) (narrow) %v14392_v43, 8 }
 0x2f6   : > { %4101 = vxpose.xlu1.b32.cont [6/8] (short) (narrow) %v14386_v44, 8  ;;  %4071 = vxpose.xlu0.b32.end [8/8] (short) (narrow) %v14388_v32, 8 }
 0x2fa   : > { %4102 = vxpose.xlu1.b32.cont [7/8] (short) (narrow) %v3863_v58, 8  ;;  %7062 = vxpose.xlu0.b32.start.end [1/1] (short) (narrow) %v15498_v10, 8  ;;  %v3920_v53 = vpop.trf.xlu1  ;;  %v3888_v38 = vpop.trf.xlu0 }
 0x2fe   : > { %4103 = vxpose.xlu1.b32.end [8/8] (short) (narrow) %v14402_v61, 8  ;;  %7126 = vxpose.xlu0.b32.start.end [1/1] (short) (narrow) %v6226_v49, 8 }
 0x308   : > { %v14507_v7 = vpop.f32.mrb[36].mxu0 }
 0x309   : > { %v11178_v15 = vpop.f32.mrb[37].mxu0 }
 0x30c   : > { %v14509_v8 = vpop.f32.mrb[36].mxu1 }
 0x30d   : > { %v11197_v2 = vpop.f32.mrb[37].mxu1 }
 0x31a   : > { %v3984_v58 = vpop.trf.xlu1  ;;  %v3952_v56 = vpop.trf.xlu0 }
 0x31b   : > { %v4144_v47 = vcombine.low %v3920_v53, %v3984_v58  ;;  %v4128_v39 = vcombine.low %v3888_v38, %v3952_v56  ;;  %v4145_v60 = vcombine.high %v3920_v53, %v3984_v58  ;;  %v4129_v42 = vcombine.high %v3888_v38, %v3952_v56 }
 0x31d   : > { %v4152_v28 = vrot.slane %v4144_v47, %v15499_v12  ;;  %v4136_v19 = vrot.slane %v4128_v39, %v15499_v12  ;;  %v4159_v10 = vrot.slane %v4145_v60, %v15499_v12  ;;  %v4143_v49 = vrot.slane %v4129_v42, %v15499_v12 }
 0x31f   : > { %v4193_v33 = vcombine.high %v4136_v19, %v4152_v28  ;;  %v4208_v47 = vcombine.low %v4143_v49, %v4159_v10  ;;  %v4209_v39 = vcombine.high %v4143_v49, %v4159_v10 }
 0x321   : > { %v4223_v10 = vrot.slane %v4209_v39, %v12565_v55 }
 0x328   : > { %v14511_v43 = vpop.f32.mrb[38].mxu0 }
 0x329   : > { %v11216_v4 = vpop.f32.mrb[39].mxu0 }
 0x32c   : > { %v14513_v23 = vpop.f32.mrb[38].mxu1 }
 0x32d   : > { %v11235_v44 = vpop.f32.mrb[39].mxu1 }
 0x32e   : > { %v4192_v44 = vcombine.low %v4136_v19, %v4152_v28 }
 0x330   : > { %v4200_v42 = vrot.slane %v4192_v44, %v12565_v55 }
 0x33a   : > { %v4048_v5 = vpop.trf.xlu1  ;;  %v4016_v48 = vpop.trf.xlu0 }
 0x348   : > { %v14519_v25 = vpop.f32.mrb[40].mxu0 }
 0x349   : > { %v14521_v52 = vpop.f32.mrb[41].mxu0 }
 0x34c   : > { %v14523_v32 = vpop.f32.mrb[42].mxu0 }
 0x34d   : > { %v14525_v61 = vpop.f32.mrb[43].mxu0 }
 0x350   : > { %v14527_v40 = vpop.f32.mrb[44].mxu0 }
 0x351   : > { %v14529_v16 = vpop.f32.mrb[45].mxu0 }
 0x354   : > { %v11263_v0 = vpop.f32.mrb[46].mxu0 }
 0x355   : > { %v5160_v34 = vpop.f32.mrb[47].mxu0 }
 0x35a   : > { %v14531_v54 = vpop.trf.xlu1  ;;  %v4080_v18 = vpop.trf.xlu0 }
 0x35b   : > { %v4160_v26 = vcombine.low %v4016_v48, %v4080_v18  ;;  %v4161_v3 = vcombine.high %v4016_v48, %v4080_v18 }
 0x35d   : > { %v4168_v53 = vrot.slane %v4160_v26, %v15499_v12  ;;  %v4175_v38 = vrot.slane %v4161_v3, %v15499_v12 }
 0x35e   : > { %v14533_v31 = vpop.trf.xlu1 }
 0x362   : > { %v4112_v15 = vpop.trf.xlu1 }
 0x363   : > { %v4176_v2 = vcombine.low %v4048_v5, %v4112_v15  ;;  %v4177_v4 = vcombine.high %v4048_v5, %v4112_v15  ;;  %v4207_v5 = vrot.slane %v4193_v33, %v12565_v55  ;;  %v4216_v15 = vrot.slane %v4208_v47, %v12565_v55 }
 0x365   : > { %v4184_v58 = vrot.slane %v4176_v2, %v15499_v12  ;;  %v4191_v56 = vrot.slane %v4177_v4, %v15499_v12 }
 0x367   : > { %v4224_v48 = vcombine.low %v4168_v53, %v4184_v58  ;;  %v4225_v18 = vcombine.high %v4168_v53, %v4184_v58  ;;  %v4240_v60 = vcombine.low %v4175_v38, %v4191_v56  ;;  %v4241_v57 = vcombine.high %v4175_v38, %v4191_v56 }
 0x369   : > { %v4232_v28 = vrot.slane %v4224_v48, %v12565_v55  ;;  %v4239_v19 = vrot.slane %v4225_v18, %v12565_v55  ;;  %v4248_v26 = vrot.slane %v4240_v60, %v12565_v55  ;;  %v4255_v3 = vrot.slane %v4241_v57, %v12565_v55 }
 0x36b   : > { %v4257_v49 = vcombine.high %v4200_v42, %v4232_v28  ;;  %v4256_v2 = vcombine.low %v4200_v42, %v4232_v28  ;;  %v4259_v4 = vcombine.high %v4207_v5, %v4239_v19  ;;  %v4258_v53 = vcombine.low %v4207_v5, %v4239_v19 }
 0x36c   : > { %v4261_v44 = vcombine.high %v4216_v15, %v4248_v26  ;;  %v4263_v38 = vcombine.high %v4223_v10, %v4255_v3  ;;  %v4260_v33 = vcombine.low %v4216_v15, %v4248_v26  ;;  %v4262_v58 = vcombine.low %v4223_v10, %v4255_v3 }
 0x36d   : > { %v4455_v56 = vadd.f32 %v14468_v36, %v4257_v49  ;;  %v4358_v48 = vadd.f32 %v14448_v14, %v4256_v2  ;;  %v4649_v18 = vadd.f32 %v14495_v41, %v4259_v4  ;;  %v4552_v57 = vadd.f32 %v14491_v11, %v4258_v53 }
 0x36e   : > { %v4843_v47 = vadd.f32 %v14509_v8, %v4261_v44  ;;  %v5037_v39 = vadd.f32 %v14513_v23, %v4263_v38  ;;  %v4746_v60 = vadd.f32 %v14507_v7, %v4260_v33  ;;  %v4940_v42 = vadd.f32 %v14511_v43, %v4262_v58 }
 0x36f   : > { %v5136_v5 = vadd.f32 %v14519_v25, %v4455_v56  ;;  %v5131_v28 = vadd.f32 %v14521_v52, %v4358_v48  ;;  %v5146_v36 = vadd.f32 %v14523_v32, %v4649_v18  ;;  %v5141_v14 = vadd.f32 %v14525_v61, %v4552_v57  ;;  %v15500_v56 = vld [vmem:[#allocation13_spill] sm:$0xff]  ;;  %v15501_v48 = vld [vmem:[#allocation14_spill] sm:$0xff] }
 0x370   : > { %v5156_v41 = vadd.f32 %v14527_v40, %v4843_v47  ;;  %v5151_v11 = vadd.f32 %v14529_v16, %v4746_v60  ;;  %v5166_v19 = vadd.f32 %v11263_v0, %v5037_v39  ;;  %v5161_v8 = vadd.f32 %v5160_v34, %v4940_v42 }
 0x371   : > { %v5170_v26 = vmul.f32 0.17677669, %v5136_v5  ;;  %v5169_v23 = vmul.f32 0.17677669, %v5131_v28  ;;  %v5172_v3 = vmul.f32 0.17677669, %v5146_v36  ;;  %v7679_v16 = vcombine.high %v14515_v27, %v14531_v54 }
 0x372   : > { %v5171_v7 = vmul.f32 0.17677669, %v5141_v14  ;;  %v5174_v52 = vmul.f32 0.17677669, %v5156_v41  ;;  %v5175_v32 = vmul.f32 0.17677669, %v5161_v8  ;;  %v15502_v18 = vcombine.low %v15500_v56, %v15501_v48 }
 0x373   : > { %v5181_v43 = vsel %vm5177_vm3, %v5170_v26, -inf  ;;  %v5178_v25 = vsel %vm5177_vm3, %v5169_v23, -inf  ;;  %v5187_v61 = vsel %vm5177_vm3, %v5172_v3, -inf  ;;  %v5173_v34 = vmul.f32 0.17677669, %v5151_v11 }
 0x374   : > { %5182 = vmax.xlane.f32.xlu1 %v5181_v43  ;;  %5179 = vmax.xlane.f32.xlu0 %v5178_v25  ;;  %v5184_v40 = vsel %vm5177_vm3, %v5171_v7, -inf  ;;  %v5193_v10 = vsel %vm5177_vm3, %v5174_v52, -inf  ;;  %v5196_v49 = vsel %vm5177_vm3, %v5175_v32, -inf  ;;  %v14578_v2 = vrot.slane %v7679_v16, %v15499_v12 }
 0x375   : > { %v5176_v53 = vmul.f32 0.17677669, %v5166_v19  ;;  %v5190_v33 = vsel %vm5177_vm3, %v5173_v34, -inf  ;;  %v15503_v57 = vcombine.high %v15500_v56, %v15501_v48 }
 0x377   : > { %v5199_v58 = vsel %vm5177_vm3, %v5176_v53, -inf }
 0x378   : > { %5188 = vmax.xlane.f32.xlu1 %v5187_v61  ;;  %5185 = vmax.xlane.f32.xlu0 %v5184_v40 }
 0x37a   : > { %v14571_v0 = vpop.trf.xlu0 }
 0x37b   : > { %v7663_v15 = vcombine.high %v14517_v37, %v14571_v0 }
 0x37c   : > { %5194 = vmax.xlane.f32.xlu1 %v5193_v10  ;;  %5197 = vmax.xlane.f32.xlu0 %v5196_v49 }
 0x37d   : > { %v14581_v4 = vrot.slane %v7663_v15, %v15499_v12 }
 0x37e   : > { %v14595_v47 = vpop.trf.xlu0 }
 0x37f   : > { %v7742_v44 = vcombine.low %v14581_v4, %v14578_v2  ;;  %v7743_v38 = vcombine.high %v14581_v4, %v14578_v2 }
 0x380   : > { %5191 = vmax.xlane.f32.xlu1 %v5190_v33 }
 0x384   : > { %5200 = vmax.xlane.f32.xlu1 %v5199_v58 }
 0x3a9   : > { %7190 = vxpose.xlu0.b32.start.end [1/1] (short) (narrow) %v15502_v18, 8 }
 0x3b7   : > { %7222 = vxpose.xlu1.b32.start.end [1/1] (short) (narrow) %v15503_v57, 8 }
 0x401   : > { %v5183_v39 = vpop.xlane.xlu1 %5182  ;;  %v5180_v60 = vpop.xlane.xlu0 %5179 }
 0x402   : > { %v5203_v42 = vsub.f32 %v5170_v26, %v5183_v39  ;;  %v5202_v5 = vsub.f32 %v5169_v23, %v5180_v60  ;;  %v12260_v39 = vld [vmem:[%s15381_s3] sm:$0xff]  ;;  %v7662_v60 = vcombine.low %v14517_v37, %v14571_v0 }
 0x404   : > { %v5212_v28 = vmul.f32 1.442695, %v5203_v42  ;;  %v5210_v36 = vmul.f32 1.442695, %v5202_v5  ;;  %v7678_v42 = vcombine.low %v14515_v27, %v14531_v54 }
 0x405   : > { %v5189_v14 = vpop.xlane.xlu1 %5188  ;;  %v5186_v41 = vpop.xlane.xlu0 %5185 }
 0x406   : > { %12187 = vpow2.f32 %v5212_v28  ;;  %v5205_v11 = vsub.f32 %v5172_v3, %v5189_v14  ;;  %v5204_v19 = vsub.f32 %v5171_v7, %v5186_v41  ;;  %v7670_v28 = vrot.slane %v7662_v60, %v15499_v12 }
 0x407   : > { %12189 = vpow2.f32 %v5210_v36  ;;  %v7686_v41 = vrot.slane %v7678_v42, %v15499_v12 }
 0x408   : > { %v5216_v8 = vmul.f32 1.442695, %v5205_v11  ;;  %v5214_v43 = vmul.f32 1.442695, %v5204_v19 }
 0x409   : > { %v5195_v25 = vpop.xlane.xlu1 %5194  ;;  %v5198_v61 = vpop.xlane.xlu0 %5197 }
 0x40a   : > { %12191 = vpow2.f32 %v5216_v8  ;;  %v5207_v40 = vsub.f32 %v5174_v52, %v5195_v25  ;;  %v5208_v16 = vsub.f32 %v5175_v32, %v5198_v61  ;;  %v7727_v25 = vcombine.high %v7670_v28, %v7686_v41 }
 0x40b   : > { %12193 = vpow2.f32 %v5214_v43  ;;  %v7726_v43 = vcombine.low %v7670_v28, %v7686_v41  ;;  %v12270_v41 = vld [vmem:[%s15381_s3 + $0x68] sm:$0xff] }
 0x40c   : > { %v5220_v26 = vmul.f32 1.442695, %v5207_v40  ;;  %v5222_v49 = vmul.f32 1.442695, %v5208_v16 }
 0x40d   : > { %v5192_v15 = vpop.xlane.xlu1 %5191 }
 0x40e   : > { %v5206_v10 = vsub.f32 %v5173_v34, %v5192_v15  ;;  %v15504_v34 = vld [vmem:[#allocation41_spill] sm:$0xff]  ;;  %v7734_v15 = vrot.slane %v7726_v43, %v12565_v55  ;;  %v12274_v43 = vld [vmem:[%s15381_s3 + $0x78] sm:$0xff] }
 0x410   : > { %v14597_v23 = vpop.eup %12187  ;;  %v5218_v33 = vmul.f32 1.442695, %v5206_v10  ;;  %v7741_v10 = vrot.slane %v7727_v25, %v12565_v55  ;;  %v12275_v25 = vld [vmem:[%s15381_s3 + $0x80] sm:$0xff] }
 0x411   : > { %v14599_v58 = vpop.eup %12189  ;;  %v5201_v3 = vpop.xlane.xlu1 %5200 }
 0x412   : > { %12195 = vpow2.f32 %v5218_v33  ;;  %v5209_v7 = vsub.f32 %v5176_v53, %v5201_v3  ;;  %11280 = vmatprep.mubr.msk.f32.mxu1 %vm5177_vm3, %v14599_v58  ;;  %v7750_v3 = vrot.slane %v7742_v44, %v12565_v55 }
 0x413   : > { %12197 = vpow2.f32 %v5220_v26  ;;  %11281 = vmatmul.mubr.msk.f32.vlgmr.msra.gmra.mrb[40].mxu1 %vm5177_vm3, %v14597_v23 }
 0x414   : > { %v14605_v52 = vpop.eup %12191  ;;  %12199 = vpow2.f32 %v5222_v49  ;;  %v5224_v32 = vmul.f32 1.442695, %v5209_v7  ;;  %11895 = vmatpush3.bf16.msra.mxu1 %v15504_v34  ;;  %v7757_v7 = vrot.slane %v7743_v38, %v12565_v55 }
 0x415   : > { %v14608_v56 = vpop.eup %12193 }
 0x416   : > { %12201 = vpow2.f32 %v5224_v32  ;;  %11283 = vmatprep.mubr.msk.f32.mxu1 %vm5177_vm3, %v14608_v56 }
 0x417   : > { %11284 = vmatmul.mubr.msk.f32.gmra.mrb[42].mxu1 %vm5177_vm3, %v14605_v52 }
 0x41c   : > { %v14614_v53 = vpop.eup %12195 }
 0x41d   : > { %v14616_v48 = vpop.eup %12197  ;;  %11286 = vmatprep.mubr.msk.f32.mxu1 %vm5177_vm3, %v14614_v53 }
 0x41e   : > { %v14620_v18 = vpop.eup %12199  ;;  %11287 = vmatmul.mubr.msk.f32.gmra.mrb[44].mxu1 %vm5177_vm3, %v14616_v48 }
 0x41f   : > { %11289 = vmatprep.mubr.msk.f32.mxu1 %vm5177_vm3, %v14620_v18 }
 0x420   : > { %v14626_v57 = vpop.eup %12201 }
 0x422   : > { %11290 = vmatmul.mubr.msk.f32.gmra.mrb[46].mxu1 %vm5177_vm3, %v14626_v57 }
 0x423   : > { %11300 = vmatprep.mubr.msk.f32.mxu1 %vm2839_vm0, %v12260_v39 }
 0x429   : > { %v7206_v5 = vpop.trf.xlu0 }
 0x42a   : > { %v7694_v36 = vcombine.low %v14595_v47, %v7206_v5  ;;  %v7695_v14 = vcombine.high %v14595_v47, %v7206_v5 }
 0x42c   : > { %v7702_v37 = vrot.slane %v7694_v36, %v15499_v12  ;;  %v7709_v27 = vrot.slane %v7695_v14, %v15499_v12 }
 0x437   : > { %v7238_v11 = vpop.trf.xlu1 }
 0x438   : > { %v7710_v19 = vcombine.low %v14533_v31, %v7238_v11  ;;  %v7711_v8 = vcombine.high %v14533_v31, %v7238_v11  ;;  %v12271_v11 = vld [vmem:[%s15381_s3 + $0x30] sm:$0xff] }
 0x43a   : > { %v7718_v54 = vrot.slane %v7710_v19, %v15499_v12  ;;  %v7725_v0 = vrot.slane %v7711_v8, %v15499_v12  ;;  %v12272_v19 = vld [vmem:[%s15381_s3 + $0x70] sm:$0xff]  ;;  %v12273_v8 = vld [vmem:[%s15381_s3 + $0x38] sm:$0xff] }
 0x43c   : > { %v7758_v61 = vcombine.low %v7702_v37, %v7718_v54  ;;  %v7759_v40 = vcombine.high %v7702_v37, %v7718_v54  ;;  %v7774_v47 = vcombine.low %v7709_v27, %v7725_v0  ;;  %v7775_v16 = vcombine.high %v7709_v27, %v7725_v0  ;;  %v12276_v37 = vld [vmem:[%s15381_s3 + $0xc0] sm:$0xff]  ;;  %v12277_v27 = vld [vmem:[%s15381_s3 + $0x88] sm:$0xff]  ;;  %v12279_v0 = vld [vmem:[%s15381_s3 + $0x90] sm:$0xff] }
 0x43d   : > { %v12278_v54 = vld [vmem:[%s15381_s3 + $0xc8] sm:$0xff] }
 0x43e   : > { %v7766_v31 = vrot.slane %v7758_v61, %v12565_v55  ;;  %v7773_v26 = vrot.slane %v7759_v40, %v12565_v55  ;;  %v7782_v49 = vrot.slane %v7774_v47, %v12565_v55  ;;  %v7789_v33 = vrot.slane %v7775_v16, %v12565_v55  ;;  %v12280_v61 = vld [vmem:[%s15381_s3 + $0xd0] sm:$0xff]  ;;  %v12283_v40 = vld [vmem:[%s15381_s3 + $0xa0] sm:$0xff]  ;;  %v12285_v16 = vld [vmem:[%s15381_s3 + $0xa8] sm:$0xff] }
 0x43f   : > { %v12284_v47 = vld [vmem:[%s15381_s3 + $0xe0] sm:$0xff] }
 0x440   : > { %v7790_v32 = vcombine.low %v7734_v15, %v7766_v31  ;;  %v7791_v34 = vcombine.high %v7734_v15, %v7766_v31  ;;  %v7792_v39 = vcombine.low %v7741_v10, %v7773_v26  ;;  %v7793_v60 = vcombine.high %v7741_v10, %v7773_v26  ;;  %v12286_v15 = vld [vmem:[%s15381_s3 + $0xe8] sm:$0xff]  ;;  %v12287_v10 = vld [vmem:[%s15381_s3 + $0xb0] sm:$0xff]  ;;  %v12289_v26 = vld [vmem:[%s15381_s3 + $0xb8] sm:$0xff] }
 0x441   : > { %v7794_v42 = vcombine.low %v7750_v3, %v7782_v49  ;;  %v7795_v5 = vcombine.high %v7750_v3, %v7782_v49  ;;  %v7796_v28 = vcombine.low %v7757_v7, %v7789_v33  ;;  %v7797_v36 = vcombine.high %v7757_v7, %v7789_v33  ;;  %v12288_v31 = vld [vmem:[%s15381_s3 + $0xf0] sm:$0xff]  ;;  %v12290_v49 = vld [vmem:[%s15381_s3 + $0xf8] sm:$0xff]  ;;  %v12291_v33 = vld [vmem:[%s15381_s3 + $0x100] sm:$0xff] }
 0x442   : > { %v11896_v14 = vpack.c.bf16 %v7790_v32, %v7654_v63  ;;  %v11904_v44 = vpack.c.bf16 %v7791_v34, %v7655_v24  ;;  %v11912_v2 = vpack.c.bf16 %v7792_v39, %v7656_v17  ;;  %v11920_v4 = vpack.c.bf16 %v7793_v60, %v7657_v62  ;;  %v12265_v17 = vld [vmem:[%s15381_s3 + $0x18] sm:$0xff]  ;;  %v12267_v62 = vld [vmem:[%s15381_s3 + $0x20] sm:$0xff]  ;;  %v12293_v7 = vld [vmem:[%s15381_s3 + $0x108] sm:$0xff] }
 0x443   : > { %v14677_v38 = vpack.c.bf16 %v7794_v42, %v7658_v21  ;;  %v14682_v63 = vpack.c.bf16 %v7795_v5, %v7659_v35  ;;  %v14687_v51 = vpack.c.bf16 %v7796_v28, %v15505_v22  ;;  %v15506_v24 = vcombine.high %v14440_v45, %v14446_v20  ;;  %v12262_v45 = vld [vmem:[%s15381_s3 + $0x48] sm:$0xff]  ;;  %v12264_v20 = vld [vmem:[%s15381_s3 + $0x50] sm:$0xff]  ;;  %v12268_v21 = vld [vmem:[%s15381_s3 + $0x60] sm:$0xff] }
 0x444   : > { %11897 = vmatprep.subr.bf16.mxu1 %v11896_v14  ;;  %11905 = vmatprep.subr.bf16.mxu0 %v11904_v44  ;;  %v12269_v35 = vld [vmem:[%s15381_s3 + $0x28] sm:$0xff]  ;;  %v12292_v3 = vld [vmem:[%s15381_s3 + $0x140] sm:$0xff]  ;;  %v12295_v34 = vld [vmem:[%s15381_s3 + $0x110] sm:$0xff]  ;;  %v15508_v42 = vmov 0.0|0.0  }
 0x445   : > { %v14692_v13 = vpack.c.bf16 %v7797_v36, %v15506_v24  ;;  %11899 = vmatpush3.bf16.msra.mxu1 %v11896_v14  ;;  %11907 = vmatpush3.bf16.msra.mxu0 %v11904_v44  ;;  %v12294_v32 = vld [vmem:[%s15381_s3 + $0x148] sm:$0xff]  ;;  %v12296_v39 = vld [vmem:[%s15381_s3 + $0x150] sm:$0xff]  ;;  %v12299_v60 = vld [vmem:[%s15381_s3 + $0x120] sm:$0xff] }
 0x446   : > { %11909 = vmatprep.subr.bf16.mxu1 %v15507_v46  ;;  %11917 = vmatprep.subr.bf16.mxu0 %v14382_v29  ;;  %v12300_v5 = vld [vmem:[%s15381_s3 + $0x160] sm:$0xff]  ;;  %v12301_v28 = vld [vmem:[%s15381_s3 + $0x128] sm:$0xff]  ;;  %v12303_v14 = vld [vmem:[%s15381_s3 + $0x130] sm:$0xff] }
 0x447   : > { %v12302_v36 = vld [vmem:[%s15381_s3 + $0x168] sm:$0xff]  ;;  %v12304_v44 = vld [vmem:[%s15381_s3 + $0x170] sm:$0xff] }
 0x448   : > { %11301 = vmatmul.mubr.msk.f32.vlgmr.msra.gmra.mrb[48].mxu1 %vm2839_vm0, %v12261_v9  ;;  %11321 = vmatmul.mubr.msk.f32.vlgmr.msra.gmra.mrb[48].mxu0 %vm2839_vm0, %v12262_v45  ;;  %v12309_v22 = vld [vmem:[%s15381_s3 + $0x188] sm:$0xff]  ;;  %v12312_v9 = vld [vmem:[%s15381_s3 + $0x1d0] sm:$0xff]  ;;  %v15511_v45 = vld [vmem:[#allocation9_spill] sm:$0xff] }
 0x449   : > { %11911 = vmatpush3.bf16.msra.mxu1 %v15507_v46  ;;  %11919 = vmatpush3.bf16.msra.mxu0 %v14382_v29  ;;  %v12266_v29 = vld [vmem:[%s15381_s3 + $0x58] sm:$0xff]  ;;  %v15509_v24 = vld [vmem:[#allocation6_spill] sm:$0xff]  ;;  %v12311_v46 = vld [vmem:[%s15381_s3 + $0x190] sm:$0xff] }
 0x44a   : > { %11913 = vmatprep.subr.bf16.mxu1 %v11912_v2  ;;  %11921 = vmatprep.subr.bf16.mxu0 %v11920_v4 }
 0x44b   : > { %11303 = vmatprep.mubr.msk.f32.mxu1 %vm2839_vm0, %v12263_v6  ;;  %11323 = vmatprep.mubr.msk.f32.mxu0 %vm2839_vm0, %v12264_v20  ;;  %v12313_v6 = vld [vmem:[%s15381_s3 + $0x198] sm:$0xff] }
 0x44c   : > { %11304 = vmatmul.mubr.msk.f32.gmra.mrb[50].mxu1 %vm2839_vm0, %v12265_v17  ;;  %11324 = vmatmul.mubr.msk.f32.gmra.mrb[50].mxu0 %vm2839_vm0, %v12266_v29  ;;  %v12314_v20 = vld [vmem:[%s15381_s3 + $0x1d8] sm:$0xff]  ;;  %v12315_v17 = vld [vmem:[%s15381_s3 + $0x1a0] sm:$0xff] }
 0x44d   : > { %11915 = vmatpush3.bf16.msra.mxu1 %v11912_v2  ;;  %11923 = vmatpush3.bf16.msra.mxu0 %v11920_v4  ;;  %v12305_v2 = vld [vmem:[%s15381_s3 + $0x138] sm:$0xff]  ;;  %v12316_v29 = vld [vmem:[%s15381_s3 + $0x1e0] sm:$0xff] }
 0x44e   : > { %11925 = vmatprep.subr.bf16.mxu1 %v14384_v1  ;;  %11933 = vmatprep.subr.bf16.mxu0 %v14394_v50  ;;  %v12306_v4 = vld [vmem:[%s15381_s3 + $0x178] sm:$0xff] }
 0x44f   : > { %11306 = vmatprep.mubr.msk.f32.mxu1 %vm2839_vm0, %v12267_v62  ;;  %11326 = vmatprep.mubr.msk.f32.mxu0 %vm2839_vm0, %v12268_v21  ;;  %v12317_v62 = vld [vmem:[%s15381_s3 + $0x1a8] sm:$0xff] }
 0x450   : > { %11307 = vmatmul.mubr.msk.f32.gmra.mrb[52].mxu1 %vm2839_vm0, %v12269_v35  ;;  %11327 = vmatmul.mubr.msk.f32.gmra.mrb[52].mxu0 %vm2839_vm0, %v12270_v41  ;;  %v12318_v21 = vld [vmem:[%s15381_s3 + $0x1e8] sm:$0xff]  ;;  %v15512_v35 = vld [vmem:[#allocation7_spill] sm:$0xff] }
 0x451   : > { %11309 = vmatprep.mubr.msk.f32.mxu1 %vm2839_vm0, %v12271_v11  ;;  %11329 = vmatprep.mubr.msk.f32.mxu0 %vm2839_vm0, %v12272_v19  ;;  %v12319_v41 = vld [vmem:[%s15381_s3 + $0x1b0] sm:$0xff]  ;;  %v15513_v19 = vld [vmem:[#allocation10_spill] sm:$0xff] }
 0x452   : > { %v12320_v11 = vld [vmem:[%s15381_s3 + $0x1f0] sm:$0xff] }
 0x454   : > { %11310 = vmatmul.mubr.msk.f32.gmra.mrb[54].mxu1 %vm2839_vm0, %v12273_v8  ;;  %11330 = vmatmul.mubr.msk.f32.gmra.mrb[54].mxu0 %vm2839_vm0, %v12274_v43  ;;  %v12321_v8 = vld [vmem:[%s15381_s3 + $0x1b8] sm:$0xff] }
 0x455   : > { %11340 = vmatprep.mubr.msk.f32.mxu1 %vm2839_vm0, %v12275_v25  ;;  %11360 = vmatprep.mubr.msk.f32.mxu0 %vm2839_vm0, %v12276_v37  ;;  %v12322_v43 = vld [vmem:[%s15381_s3 + $0x1f8] sm:$0xff]  ;;  %v15514_v25 = vmov 0.0  }
 0x456   : > { %v15515_v37 = vld [vmem:[#allocation8_spill] sm:$0xff] }
 0x458   : > { %11341 = vmatmul.mubr.msk.f32.vlgmr.msra.gmra.mrb[56].mxu1 %vm2839_vm0, %v12277_v27  ;;  %11361 = vmatmul.mubr.msk.f32.vlgmr.msra.gmra.mrb[56].mxu0 %vm2839_vm0, %v12278_v54  ;;  %v15516_v27 = vld [vmem:[#allocation11_spill] sm:$0xff] }
 0x459   : > { %11927 = vmatpush3.bf16.msra.mxu1 %v14384_v1  ;;  %11935 = vmatpush3.bf16.msra.mxu0 %v14394_v50  ;;  %v12281_v1 = vld [vmem:[%s15381_s3 + $0x98] sm:$0xff]  ;;  %v15517_v54 = vld [vmem:[#allocation15_spill] sm:$0xff] }
 0x45a   : > { %11929 = vmatprep.subr.bf16.mxu1 %v14677_v38  ;;  %11937 = vmatprep.subr.bf16.mxu0 %v14682_v63  ;;  %v12282_v50 = vld [vmem:[%s15381_s3 + $0xd8] sm:$0xff] }
 0x45b   : > { %11343 = vmatprep.mubr.msk.f32.mxu1 %vm2839_vm0, %v12279_v0  ;;  %11363 = vmatprep.mubr.msk.f32.mxu0 %vm2839_vm0, %v12280_v61  ;;  %v15518_v0 = vld [vmem:[#allocation16_spill] sm:$0xff]  ;;  %v15001_v61 = vld [vmem:[%s12513_s11 + $0x40] sm:$0xff] }
 0x45c   : > { %11344 = vmatmul.mubr.msk.f32.gmra.mrb[58].mxu1 %vm2839_vm0, %v12281_v1  ;;  %11364 = vmatmul.mubr.msk.f32.gmra.mrb[58].mxu0 %vm2839_vm0, %v12282_v50  ;;  %v15519_v1 = vld [vmem:[#allocation17_spill] sm:$0xff]  ;;  %v15012_v50 = vld [vmem:[%s12513_s11 + $0x48] sm:$0xff] }
 0x45d   : > { %11931 = vmatpush3.bf16.msra.mxu1 %v14677_v38  ;;  %11939 = vmatpush3.bf16.msra.mxu0 %v14682_v63  ;;  %v12307_v38 = vld [vmem:[%s15381_s3 + $0x180] sm:$0xff] }
 0x45e   : > { %11941 = vmatprep.subr.bf16.mxu1 %v14396_v30  ;;  %11949 = vmatprep.subr.bf16.mxu0 %v14400_v59  ;;  %v12308_v63 = vld [vmem:[%s15381_s3 + $0x1c0] sm:$0xff] }
 0x45f   : > { %11346 = vmatprep.mubr.msk.f32.mxu1 %vm2839_vm0, %v12283_v40  ;;  %11366 = vmatprep.mubr.msk.f32.mxu0 %vm2839_vm0, %v12284_v47  ;;  %v15520_v40 = vld [vmem:[#allocation18_spill] sm:$0xff]  ;;  %v15521_v47 = vld [vmem:[#allocation19_spill] sm:$0xff] }
 0x460   : > { %11347 = vmatmul.mubr.msk.f32.gmra.mrb[60].mxu1 %vm2839_vm0, %v12285_v16  ;;  %11367 = vmatmul.mubr.msk.f32.gmra.mrb[60].mxu0 %vm2839_vm0, %v12286_v15  ;;  %v15522_v16 = vld [vmem:[#allocation20_spill] sm:$0xff]  ;;  %v15523_v15 = vld [vmem:[#allocation21_spill] sm:$0xff] }
 0x461   : > { %11349 = vmatprep.mubr.msk.f32.mxu1 %vm2839_vm0, %v12287_v10  ;;  %11369 = vmatprep.mubr.msk.f32.mxu0 %vm2839_vm0, %v12288_v31  ;;  %v15524_v10 = vld [vmem:[#allocation22_spill] sm:$0xff]  ;;  %v15525_v31 = vld [vmem:[#allocation23_spill] sm:$0xff] }
 0x464   : > { %11350 = vmatmul.mubr.msk.f32.gmra.mrb[62].mxu1 %vm2839_vm0, %v12289_v26  ;;  %11370 = vmatmul.mubr.msk.f32.gmra.mrb[62].mxu0 %vm2839_vm0, %v12290_v49  ;;  %v15526_v26 = vld [vmem:[#allocation24_spill] sm:$0xff]  ;;  %v15047_v49 = vld [vmem:[%s12513_s11 + $0x50] sm:$0xff] }
 0x465   : > { %11380 = vmatprep.mubr.msk.f32.mxu1 %vm2839_vm0, %v12291_v33  ;;  %11400 = vmatprep.mubr.msk.f32.mxu0 %vm2839_vm0, %v12292_v3  ;;  %v15527_v33 = vld [vmem:[#allocation25_spill] sm:$0xff]  ;;  %v15058_v3 = vld [vmem:[%s12513_s11 + $0x58] sm:$0xff] }
 0x468   : > { %11381 = vmatmul.mubr.msk.f32.vlgmr.msra.gmra.mrb[64].mxu1 %vm2839_vm0, %v12293_v7  ;;  %11401 = vmatmul.mubr.msk.f32.vlgmr.msra.gmra.mrb[64].mxu0 %vm2839_vm0, %v12294_v32  ;;  %v15528_v7 = vld [vmem:[#allocation26_spill] sm:$0xff]  ;;  %v15529_v32 = vld [vmem:[#allocation27_spill] sm:$0xff] }
 0x469   : > { %11943 = vmatpush3.bf16.msra.mxu1 %v14396_v30  ;;  %11951 = vmatpush3.bf16.msra.mxu0 %v14400_v59  ;;  %v12297_v30 = vld [vmem:[%s15381_s3 + $0x118] sm:$0xff] }
 0x46a   : > { %11945 = vmatprep.subr.bf16.mxu1 %v14687_v51  ;;  %11953 = vmatprep.subr.bf16.mxu0 %v14692_v13  ;;  %v12298_v59 = vld [vmem:[%s15381_s3 + $0x158] sm:$0xff] }
 0x46b   : > { %11383 = vmatprep.mubr.msk.f32.mxu1 %vm2839_vm0, %v12295_v34  ;;  %11403 = vmatprep.mubr.msk.f32.mxu0 %vm2839_vm0, %v12296_v39  ;;  %v15530_v34 = vld [vmem:[#allocation28_spill] sm:$0xff]  ;;  %v15531_v39 = vld [vmem:[#allocation29_spill] sm:$0xff] }
 0x46c   : > { %11384 = vmatmul.mubr.msk.f32.gmra.mrb[66].mxu1 %vm2839_vm0, %v12297_v30  ;;  %11404 = vmatmul.mubr.msk.f32.gmra.mrb[66].mxu0 %vm2839_vm0, %v12298_v59  ;;  %v15532_v30 = vld [vmem:[#allocation30_spill] sm:$0xff]  ;;  %v15533_v59 = vld [vmem:[#allocation31_spill] sm:$0xff] }
 0x46d   : > { %11947 = vmatpush3.bf16.msra.mxu1 %v14687_v51  ;;  %11955 = vmatpush3.bf16.msra.mxu0 %v14692_v13  ;;  %v12310_v51 = vld [vmem:[%s15381_s3 + $0x1c8] sm:$0xff] }
 0x46e   : > { %11386 = vmatprep.mubr.msk.f32.mxu1 %vm2839_vm0, %v12299_v60  ;;  %11956 = vmatprep.subr.bf16.mxu1 %v15508_v42  ;;  %v15534_v60 = vld [vmem:[#allocation32_spill] sm:$0xff] }
 0x46f   : > { %11406 = vmatprep.mubr.msk.f32.mxu0 %vm2839_vm0, %v12300_v5  ;;  %11972 = vmatprep.subr.bf16.mxu0 %v15508_v42  ;;  %v12327_v5 = vld [vmem:[%s12513_s11 + $0x60] sm:$0xff] }
 0x470   : > { %11387 = vmatmul.mubr.msk.f32.gmra.mrb[68].mxu1 %vm2839_vm0, %v12301_v28  ;;  %11407 = vmatmul.mubr.msk.f32.gmra.mrb[68].mxu0 %vm2839_vm0, %v12302_v36  ;;  %v15535_v28 = vld [vmem:[#allocation33_spill] sm:$0xff]  ;;  %v12328_v36 = vld [vmem:[%s12513_s11 + $0x68] sm:$0xff] }
 0x471   : > { %11389 = vmatprep.mubr.msk.f32.mxu1 %vm2839_vm0, %v12303_v14  ;;  %11409 = vmatprep.mubr.msk.f32.mxu0 %vm2839_vm0, %v12304_v44  ;;  %v15536_v14 = vld [vmem:[#allocation34_spill] sm:$0xff]  ;;  %v15537_v44 = vld [vmem:[#allocation35_spill] sm:$0xff] }
 0x474   : > { %11390 = vmatmul.mubr.msk.f32.gmra.mrb[70].mxu1 %vm2839_vm0, %v12305_v2  ;;  %11410 = vmatmul.mubr.msk.f32.gmra.mrb[70].mxu0 %vm2839_vm0, %v12306_v4  ;;  %v15538_v2 = vld [vmem:[#allocation36_spill] sm:$0xff] }
 0x475   : > { %11420 = vmatprep.mubr.msk.f32.mxu1 %vm2839_vm0, %v12307_v38  ;;  %11440 = vmatprep.mubr.msk.f32.mxu0 %vm2839_vm0, %v12308_v63  ;;  %v15539_v63 = vld [vmem:[#allocation37_spill] sm:$0xff] }
 0x478   : > { %11421 = vmatmul.mubr.msk.f32.vlgmr.msra.gmra.mrb[72].mxu1 %vm2839_vm0, %v12309_v22  ;;  %11441 = vmatmul.mubr.msk.f32.vlgmr.msra.gmra.mrb[72].mxu0 %vm2839_vm0, %v12310_v51 }
 0x479   : > { %11959 = vmatpush3.bf16.xpose.msk.msra.mxu1 %vm13417_vm1, %v15509_v24  ;;  %11423 = vmatprep.mubr.msk.f32.mxu1 %vm2839_vm0, %v12311_v46  ;;  %v10339_v24 = vld [vmem:[%s14015_s15 + $0x40] sm:$0xff]  ;;  %v10340_v46 = vld [vmem:[%s14015_s15 + $0x48] sm:$0xff] }
 0x47a   : > { %11960 = vmatprep.subr.bf16.mxu1 %v15508_v42  ;;  %11443 = vmatprep.mubr.msk.f32.mxu0 %vm2839_vm0, %v12312_v9  ;;  %v15540_v9 = vld [vmem:[#allocation38_spill] sm:$0xff] }
 0x47b   : > { %11975 = vmatpush3.bf16.xpose.msk.msra.mxu0 %vm13417_vm1, %v15511_v45  ;;  %v12084_v45 = vpack.c.bf16 %v10340_v46, %v10339_v24 }
 0x47c   : > { %11424 = vmatmul.mubr.msk.f32.gmra.mrb[74].mxu1 %vm2839_vm0, %v12313_v6  ;;  %11444 = vmatmul.mubr.msk.f32.gmra.mrb[74].mxu0 %vm2839_vm0, %v12314_v20  ;;  %v15541_v20 = vld [vmem:[#allocation39_spill] sm:$0xff] }
 0x47d   : > { %11426 = vmatprep.mubr.msk.f32.mxu1 %vm2839_vm0, %v12315_v17  ;;  %11446 = vmatprep.mubr.msk.f32.mxu0 %vm2839_vm0, %v12316_v29  ;;  %v10341_v29 = vld [vmem:[%s14015_s15 + $0x50] sm:$0xff] }
 0x47e   : > { %11976 = vmatprep.subr.bf16.mxu0 %v15508_v42 }
 0x480   : > { %11427 = vmatmul.mubr.msk.f32.gmra.mrb[76].mxu1 %vm2839_vm0, %v12317_v62  ;;  %11447 = vmatmul.mubr.msk.f32.gmra.mrb[76].mxu0 %vm2839_vm0, %v12318_v21  ;;  %v10342_v62 = vld [vmem:[%s14015_s15 + $0x58] sm:$0xff] }
 0x481   : > { %11963 = vmatpush3.bf16.xpose.msk.msra.mxu1 %vm13417_vm1, %v15512_v35  ;;  %11429 = vmatprep.mubr.msk.f32.mxu1 %vm2839_vm0, %v12319_v41  ;;  %v15542_v21 = vld [vmem:[#allocation40_spill] sm:$0xff]  ;;  %v12090_v41 = vpack.c.bf16 %v10342_v62, %v10341_v29 }
 0x482   : > { %11964 = vmatprep.subr.bf16.mxu1 %v15508_v42  ;;  %11449 = vmatprep.mubr.msk.f32.mxu0 %vm2839_vm0, %v12320_v11  ;;  %v12329_v11 = vld [vmem:[%s12513_s11 + $0x70] sm:$0xff] }
 0x483   : > { %11979 = vmatpush3.bf16.xpose.msk.msra.mxu0 %vm13417_vm1, %v15513_v19  ;;  %v12330_v19 = vld [vmem:[%s12513_s11 + $0x78] sm:$0xff]  ;;  %s12416_s11 = smov 32  }
 0x484   : > { %11430 = vmatmul.mubr.msk.f32.gmra.mrb[78].mxu1 %vm2839_vm0, %v12321_v8  ;;  %11450 = vmatmul.mubr.msk.f32.gmra.mrb[78].mxu0 %vm2839_vm0, %v12322_v43  ;;  %v10343_v8 = vld [vmem:[%s14015_s15 + $0x60] sm:$0xff]  ;;  %v10344_v43 = vld [vmem:[%s14015_s15 + $0x68] sm:$0xff] }
 0x485   : > { %11468 = vmatprep.mubr.msk.f32.mxu1 %vm12414_vm2, %v15514_v25  ;;  %11980 = vmatprep.subr.bf16.mxu0 %v15508_v42 }
 0x486   : > { %11487 = vmatprep.mubr.msk.f32.mxu0 %vm12414_vm2, %v15514_v25 }
 0x489   : > { %11967 = vmatpush3.bf16.xpose.msk.msra.mxu1 %vm13417_vm1, %v15515_v37  ;;  %v10345_v37 = vld [vmem:[%s14015_s15 + $0x70] sm:$0xff] }
 0x48a   : > { %11968 = vmatprep.subr.bf16.mxu1 %v15508_v42 }
 0x48b   : > { %11983 = vmatpush3.bf16.xpose.msk.msra.mxu0 %vm13417_vm1, %v15516_v27  ;;  %v10346_v27 = vld [vmem:[%s14015_s15 + $0x78] sm:$0xff]  ;;  %s288_s15 = sand.u32 1, %s12393_s19  }
 0x48c   : > { %11984 = vmatprep.subr.bf16.mxu0 %v15508_v42  ;;  %s15332_s21 = scalar_lea.sflag [#allocation3], %s288_s15 }
 0x491   : > { %11971 = vmatpush3.bf16.xpose.msk.msra.mxu1 %vm13417_vm1, %v15517_v54  ;;  %v12102_v54 = vpack.c.bf16 %v10346_v27, %v10345_v37 }
 0x492   : > { %11988 = vmatprep.subr.bf16.mxu1 %v15508_v42 }
 0x493   : > { %11987 = vmatpush3.bf16.xpose.msk.msra.mxu0 %vm13417_vm1, %v15518_v0 }
 0x494   : > { %12004 = vmatprep.subr.bf16.mxu0 %v15508_v42 }
 0x498   : > { %11469 = vmatmul.mubr.msk.f32.vlgmr.msra.gmra.mrb[80].mxu1 %vm2839_vm0, %v15001_v61 }
 0x499   : > { %11991 = vmatpush3.bf16.xpose.msk.msra.mxu1 %vm13417_vm1, %v15519_v1  ;;  %11506 = vmatprep.mubr.msk.f32.mxu1 %vm12414_vm2, %v15514_v25 }
 0x49a   : > { %11992 = vmatprep.subr.bf16.mxu1 %v15508_v42  ;;  %11488 = vmatmul.mubr.msk.f32.vlgmr.msra.gmra.mrb[80].mxu0 %vm2839_vm0, %v15012_v50 }
 0x49b   : > { %12007 = vmatpush3.bf16.xpose.msk.msra.mxu0 %vm13417_vm1, %v15520_v40  ;;  %11525 = vmatprep.mubr.msk.f32.mxu0 %vm12414_vm2, %v15514_v25 }
 0x49c   : > { %12008 = vmatprep.subr.bf16.mxu0 %v15508_v42 }
 0x4a1   : > { %11995 = vmatpush3.bf16.xpose.msk.msra.mxu1 %vm13417_vm1, %v15521_v47 }
 0x4a2   : > { %11996 = vmatprep.subr.bf16.mxu1 %v15508_v42 }
 0x4a3   : > { %12011 = vmatpush3.bf16.xpose.msk.msra.mxu0 %vm13417_vm1, %v15522_v16 }
 0x4a4   : > { %12012 = vmatprep.subr.bf16.mxu0 %v15508_v42 }
 0x4a9   : > { %11999 = vmatpush3.bf16.xpose.msk.msra.mxu1 %vm13417_vm1, %v15523_v15 }
 0x4aa   : > { %12000 = vmatprep.subr.bf16.mxu1 %v15508_v42 }
 0x4ab   : > { %12015 = vmatpush3.bf16.xpose.msk.msra.mxu0 %vm13417_vm1, %v15524_v10 }
 0x4ac   : > { %12016 = vmatprep.subr.bf16.mxu0 %v15508_v42 }
 0x4b1   : > { %12003 = vmatpush3.bf16.xpose.msk.msra.mxu1 %vm13417_vm1, %v15525_v31 }
 0x4b2   : > { %12020 = vmatprep.subr.bf16.mxu1 %v15508_v42 }
 0x4b3   : > { %12019 = vmatpush3.bf16.xpose.msk.msra.mxu0 %vm13417_vm1, %v15526_v26 }
 0x4b4   : > { %12036 = vmatprep.subr.bf16.mxu0 %v15508_v42 }
 0x4b8   : > { %11507 = vmatmul.mubr.msk.f32.vlgmr.msra.gmra.mrb[82].mxu1 %vm2839_vm0, %v15047_v49 }
 0x4b9   : > { %12023 = vmatpush3.bf16.xpose.msk.msra.mxu1 %vm13417_vm1, %v15527_v33  ;;  %11544 = vmatprep.mubr.msk.f32.mxu1 %vm12414_vm2, %v15514_v25 }
 0x4ba   : > { %12024 = vmatprep.subr.bf16.mxu1 %v15508_v42  ;;  %11526 = vmatmul.mubr.msk.f32.vlgmr.msra.gmra.mrb[82].mxu0 %vm2839_vm0, %v15058_v3 }
 0x4bb   : > { %12039 = vmatpush3.bf16.xpose.msk.msra.mxu0 %vm13417_vm1, %v15528_v7  ;;  %11563 = vmatprep.mubr.msk.f32.mxu0 %vm12414_vm2, %v15514_v25 }
 0x4bc   : > { %12040 = vmatprep.subr.bf16.mxu0 %v15508_v42 }
 0x4c1   : > { %12027 = vmatpush3.bf16.xpose.msk.msra.mxu1 %vm13417_vm1, %v15529_v32 }
 0x4c2   : > { %12028 = vmatprep.subr.bf16.mxu1 %v15508_v42 }
 0x4c3   : > { %12043 = vmatpush3.bf16.xpose.msk.msra.mxu0 %vm13417_vm1, %v15530_v34 }
 0x4c4   : > { %12044 = vmatprep.subr.bf16.mxu0 %v15508_v42 }
 0x4c9   : > { %12031 = vmatpush3.bf16.xpose.msk.msra.mxu1 %vm13417_vm1, %v15531_v39 }
 0x4ca   : > { %12032 = vmatprep.subr.bf16.mxu1 %v15508_v42 }
 0x4cb   : > { %12047 = vmatpush3.bf16.xpose.msk.msra.mxu0 %vm13417_vm1, %v15532_v30 }
 0x4cc   : > { %12048 = vmatprep.subr.bf16.mxu0 %v15508_v42 }
 0x4d1   : > { %12035 = vmatpush3.bf16.xpose.msk.msra.mxu1 %vm13417_vm1, %v15533_v59 }
 0x4d2   : > { %12052 = vmatprep.subr.bf16.mxu1 %v15508_v42 }
 0x4d3   : > { %12051 = vmatpush3.bf16.xpose.msk.msra.mxu0 %vm13417_vm1, %v15534_v60 }
 0x4d4   : > { %12068 = vmatprep.subr.bf16.mxu0 %v15508_v42 }
 0x4d8   : > { %11545 = vmatmul.mubr.msk.f32.vlgmr.msra.gmra.mrb[84].mxu1 %vm2839_vm0, %v12327_v5 }
 0x4d9   : > { %12055 = vmatpush3.bf16.xpose.msk.msra.mxu1 %vm13417_vm1, %v15535_v28  ;;  %11582 = vmatprep.mubr.msk.f32.mxu1 %vm12414_vm2, %v15514_v25 }
 0x4da   : > { %12056 = vmatprep.subr.bf16.mxu1 %v15508_v42  ;;  %11564 = vmatmul.mubr.msk.f32.vlgmr.msra.gmra.mrb[84].mxu0 %vm2839_vm0, %v12328_v36 }
 0x4db   : > { %12071 = vmatpush3.bf16.xpose.msk.msra.mxu0 %vm13417_vm1, %v15536_v14  ;;  %11601 = vmatprep.mubr.msk.f32.mxu0 %vm12414_vm2, %v15514_v25  ;;  %v12096_v25 = vpack.c.bf16 %v10344_v43, %v10343_v8 }
 0x4dc   : > { %12072 = vmatprep.subr.bf16.mxu0 %v15508_v42 }
 0x4e1   : > { %12059 = vmatpush3.bf16.xpose.msk.msra.mxu1 %vm13417_vm1, %v15537_v44 }
 0x4e2   : > { %12060 = vmatprep.subr.bf16.mxu1 %v15508_v42 }
 0x4e3   : > { %12075 = vmatpush3.bf16.xpose.msk.msra.mxu0 %vm13417_vm1, %v15538_v2 }
 0x4e4   : > { %12076 = vmatprep.subr.bf16.mxu0 %v15508_v42 }
 0x4e6   : > { %v15116_v4 = vpop.f32.mrb[40].mxu1 }
 0x4e7   : > { %v15118_v38 = vpop.f32.mrb[41].mxu1 }
 0x4e9   : > { %12063 = vmatpush3.bf16.xpose.msk.msra.mxu1 %vm13417_vm1, %v15539_v63 }
 0x4ea   : > { %v15123_v22 = vpop.f32.mrb[42].mxu1  ;;  %12064 = vmatprep.subr.bf16.mxu1 %v15508_v42 }
 0x4eb   : > { %v15126_v51 = vpop.f32.mrb[43].mxu1  ;;  %12079 = vmatpush3.bf16.xpose.msk.msra.mxu0 %vm13417_vm1, %v15540_v9 }
 0x4ec   : > { %12080 = vmatprep.subr.bf16.mxu0 %v15508_v42 }
 0x4f1   : > { %v15134_v6 = vpop.f32.mrb[44].mxu1  ;;  %12067 = vmatpush3.bf16.xpose.msk.msra.mxu1 %vm13417_vm1, %v15541_v20 }
 0x4f2   : > { %v15139_v17 = vpop.f32.mrb[45].mxu1  ;;  %12086 = vmatprep.subr.msk.bf16.mxu1 %vm13417_vm1, %v12084_v45 }
 0x4f3   : > { %12083 = vmatpush3.bf16.xpose.msk.msra.mxu0 %vm13417_vm1, %v15542_v21 }
 0x4f5   : > { %v15148_v42 = vpop.f32.mrb[46].mxu1 }
 0x4f6   : > { %v15150_v35 = vpop.f32.mrb[47].mxu1 }
 0x4f8   : > { %11583 = vmatmul.mubr.msk.f32.vlgmr.msra.gmra.mrb[86].mxu1 %vm2839_vm0, %v12329_v11 }
 0x4f9   : > { %12089 = vmatpush3.bf16.xpose.msk.msra.mxu1 %vm13417_vm1, %v12084_v45  ;;  %11620 = vmatprep.mubr.msk.f32.mxu1 %vm2839_vm0, %v15001_v61 }
 0x4fa   : > { %12092 = vmatprep.subr.msk.bf16.mxu1 %vm13417_vm1, %v12090_v41  ;;  %11602 = vmatmul.mubr.msk.f32.vlgmr.msra.gmra.mrb[86].mxu0 %vm2839_vm0, %v12330_v19 }
 0x501   : > { %12095 = vmatpush3.bf16.xpose.msk.msra.mxu1 %vm13417_vm1, %v12090_v41 }
 0x502   : > { %12098 = vmatprep.subr.msk.bf16.mxu1 %vm13417_vm1, %v12096_v25 }
 0x509   : > { %12101 = vmatpush3.bf16.xpose.msk.msra.mxu1 %vm13417_vm1, %v12096_v25 }
 0x50a   : > { %12104 = vmatprep.subr.msk.bf16.mxu1 %vm13417_vm1, %v12102_v54 }
 0x511   : > { %12107 = vmatpush3.bf16.xpose.msk.msra.mxu1 %vm13417_vm1, %v12102_v54 }
 0x518   : > { %11621 = vmatmul.mubr.msk.f32.vlgmr.msra.gmra.mrb[88].mxu1 %vm2839_vm0, %v15012_v50 }
 0x519   : > { %11623 = vmatprep.mubr.msk.f32.mxu1 %vm2839_vm0, %v15047_v49 }
 0x51b   : > { %v11302_v0 = vpop.f32.mrb[48].mxu1  ;;  %v11322_v61 = vpop.f32.mrb[48].mxu0 }
 0x51c   : > { %v7864_v1 = vpop.f32.mrb[49].mxu1  ;;  %v7969_v40 = vpop.f32.mrb[49].mxu0  ;;  %11624 = vmatmul.mubr.msk.f32.gmra.mrb[90].mxu1 %vm2839_vm0, %v15058_v3 }
 0x51d   : > { %8670 = vxpose.xlu1.b32.start [1/8] (short) (narrow) %v7969_v40, 8  ;;  %8638 = vxpose.xlu0.b32.start [1/8] (short) (narrow) %v7864_v1, 8 }
 0x51e   : > { %11626 = vmatprep.mubr.msk.f32.mxu1 %vm2839_vm0, %v12327_v5 }
 0x51f   : > { %v11305_v47 = vpop.f32.mrb[50].mxu1  ;;  %v11325_v13 = vpop.f32.mrb[50].mxu0 }
 0x520   : > { %v7874_v16 = vpop.f32.mrb[51].mxu1  ;;  %v7979_v15 = vpop.f32.mrb[51].mxu0  ;;  %11627 = vmatmul.mubr.msk.f32.gmra.mrb[92].mxu1 %vm2839_vm0, %v12328_v36 }
 0x521   : > { %8671 = vxpose.xlu1.b32.cont [2/8] (short) (narrow) %v11322_v61, 8  ;;  %8639 = vxpose.xlu0.b32.cont [2/8] (short) (narrow) %v11302_v0, 8 }
 0x522   : > { %11629 = vmatprep.mubr.msk.f32.mxu1 %vm2839_vm0, %v12329_v11 }
 0x523   : > { %v11308_v50 = vpop.f32.mrb[52].mxu1  ;;  %v11328_v10 = vpop.f32.mrb[52].mxu0 }
 0x524   : > { %v7884_v31 = vpop.f32.mrb[53].mxu1  ;;  %v7989_v26 = vpop.f32.mrb[53].mxu0  ;;  %11630 = vmatmul.mubr.msk.f32.gmra.mrb[94].mxu1 %vm2839_vm0, %v12330_v19 }
 0x525   : > { %8672 = vxpose.xlu1.b32.cont [3/8] (short) (narrow) %v7979_v15, 8  ;;  %8640 = vxpose.xlu0.b32.cont [3/8] (short) (narrow) %v7874_v16, 8 }
 0x527   : > { %v11311_v49 = vpop.f32.mrb[54].mxu1  ;;  %v11331_v33 = vpop.f32.mrb[54].mxu0 }
 0x528   : > { %v7894_v3 = vpop.f32.mrb[55].mxu1  ;;  %v7999_v7 = vpop.f32.mrb[55].mxu0 }
 0x529   : > { %8673 = vxpose.xlu1.b32.cont [4/8] (short) (narrow) %v11325_v13, 8  ;;  %8641 = vxpose.xlu0.b32.cont [4/8] (short) (narrow) %v11305_v47, 8 }
 0x52b   : > { %v11342_v32 = vpop.f32.mrb[56].mxu1  ;;  %v11362_v34 = vpop.f32.mrb[56].mxu0 }
 0x52c   : > { %v8074_v39 = vpop.f32.mrb[57].mxu1  ;;  %v8179_v30 = vpop.f32.mrb[57].mxu0 }
 0x52d   : > { %8674 = vxpose.xlu1.b32.cont [5/8] (short) (narrow) %v7989_v26, 8  ;;  %8642 = vxpose.xlu0.b32.cont [5/8] (short) (narrow) %v7884_v31, 8 }
 0x52f   : > { %v11345_v59 = vpop.f32.mrb[58].mxu1  ;;  %v11365_v60 = vpop.f32.mrb[58].mxu0 }
 0x530   : > { %v8084_v5 = vpop.f32.mrb[59].mxu1  ;;  %v8189_v28 = vpop.f32.mrb[59].mxu0 }
 0x531   : > { %8675 = vxpose.xlu1.b32.cont [6/8] (short) (narrow) %v11328_v10, 8  ;;  %8643 = vxpose.xlu0.b32.cont [6/8] (short) (narrow) %v11308_v50, 8 }
 0x533   : > { %v11348_v36 = vpop.f32.mrb[60].mxu1  ;;  %v11368_v14 = vpop.f32.mrb[60].mxu0 }
 0x534   : > { %v8094_v44 = vpop.f32.mrb[61].mxu1  ;;  %v8199_v2 = vpop.f32.mrb[61].mxu0 }
 0x535   : > { %8676 = vxpose.xlu1.b32.cont [7/8] (short) (narrow) %v7999_v7, 8  ;;  %8644 = vxpose.xlu0.b32.cont [7/8] (short) (narrow) %v7894_v3, 8 }
 0x537   : > { %v11351_v63 = vpop.f32.mrb[62].mxu1  ;;  %v11371_v24 = vpop.f32.mrb[62].mxu0 }
 0x538   : > { %v8104_v46 = vpop.f32.mrb[63].mxu1  ;;  %v8209_v9 = vpop.f32.mrb[63].mxu0 }
 0x539   : > { %8677 = vxpose.xlu1.b32.end [8/8] (short) (narrow) %v11331_v33, 8  ;;  %8645 = vxpose.xlu0.b32.end [8/8] (short) (narrow) %v11311_v49, 8 }
 0x53b   : > { %v11382_v45 = vpop.f32.mrb[64].mxu1  ;;  %v11402_v20 = vpop.f32.mrb[64].mxu0 }
 0x53c   : > { %v8284_v29 = vpop.f32.mrb[65].mxu1  ;;  %v8389_v62 = vpop.f32.mrb[65].mxu0 }
 0x53d   : > { %8734 = vxpose.xlu1.b32.start [1/8] (short) (narrow) %v8179_v30, 8  ;;  %8702 = vxpose.xlu0.b32.start [1/8] (short) (narrow) %v8074_v39, 8 }
 0x53f   : > { %v11385_v21 = vpop.f32.mrb[66].mxu1  ;;  %v11405_v41 = vpop.f32.mrb[66].mxu0 }
 0x540   : > { %v8294_v11 = vpop.f32.mrb[67].mxu1  ;;  %v8399_v19 = vpop.f32.mrb[67].mxu0 }
 0x541   : > { %8735 = vxpose.xlu1.b32.cont [2/8] (short) (narrow) %v11362_v34, 8  ;;  %8703 = vxpose.xlu0.b32.cont [2/8] (short) (narrow) %v11342_v32, 8 }
 0x543   : > { %v11388_v8 = vpop.f32.mrb[68].mxu1  ;;  %v11408_v43 = vpop.f32.mrb[68].mxu0 }
 0x544   : > { %v8304_v25 = vpop.f32.mrb[69].mxu1  ;;  %v8409_v37 = vpop.f32.mrb[69].mxu0 }
 0x545   : > { %8736 = vxpose.xlu1.b32.cont [3/8] (short) (narrow) %v8189_v28, 8  ;;  %8704 = vxpose.xlu0.b32.cont [3/8] (short) (narrow) %v8084_v5, 8 }
 0x547   : > { %v11391_v27 = vpop.f32.mrb[70].mxu1  ;;  %v11411_v54 = vpop.f32.mrb[70].mxu0 }
 0x548   : > { %v8314_v0 = vpop.f32.mrb[71].mxu1  ;;  %v8419_v61 = vpop.f32.mrb[71].mxu0 }
 0x549   : > { %8737 = vxpose.xlu1.b32.cont [4/8] (short) (narrow) %v11365_v60, 8  ;;  %8705 = vxpose.xlu0.b32.cont [4/8] (short) (narrow) %v11345_v59, 8 }
 0x54b   : > { %v11422_v1 = vpop.f32.mrb[72].mxu1  ;;  %v11442_v40 = vpop.f32.mrb[72].mxu0 }
 0x54c   : > { %v8494_v47 = vpop.f32.mrb[73].mxu1  ;;  %v8599_v13 = vpop.f32.mrb[73].mxu0 }
 0x54d   : > { %8738 = vxpose.xlu1.b32.cont [5/8] (short) (narrow) %v8199_v2, 8  ;;  %8706 = vxpose.xlu0.b32.cont [5/8] (short) (narrow) %v8094_v44, 8 }
 0x54f   : > { %v11425_v16 = vpop.f32.mrb[74].mxu1  ;;  %v11445_v15 = vpop.f32.mrb[74].mxu0 }
 0x550   : > { %v8504_v50 = vpop.f32.mrb[75].mxu1  ;;  %v8609_v10 = vpop.f32.mrb[75].mxu0 }
 0x551   : > { %8739 = vxpose.xlu1.b32.cont [6/8] (short) (narrow) %v11368_v14, 8  ;;  %8707 = vxpose.xlu0.b32.cont [6/8] (short) (narrow) %v11348_v36, 8 }
 0x553   : > { %v11428_v31 = vpop.f32.mrb[76].mxu1  ;;  %v11448_v26 = vpop.f32.mrb[76].mxu0 }
 0x554   : > { %v8514_v49 = vpop.f32.mrb[77].mxu1  ;;  %v8619_v33 = vpop.f32.mrb[77].mxu0 }
 0x555   : > { %8740 = vxpose.xlu1.b32.cont [7/8] (short) (narrow) %v8209_v9, 8  ;;  %8708 = vxpose.xlu0.b32.cont [7/8] (short) (narrow) %v8104_v46, 8 }
 0x557   : > { %v11431_v3 = vpop.f32.mrb[78].mxu1  ;;  %v11451_v7 = vpop.f32.mrb[78].mxu0 }
 0x558   : > { %v8524_v32 = vpop.f32.mrb[79].mxu1  ;;  %v8629_v34 = vpop.f32.mrb[79].mxu0 }
 0x559   : > { %8741 = vxpose.xlu1.b32.end [8/8] (short) (narrow) %v11371_v24, 8  ;;  %8709 = vxpose.xlu0.b32.end [8/8] (short) (narrow) %v11351_v63, 8 }
 0x55d   : > { %8798 = vxpose.xlu1.b32.start [1/8] (short) (narrow) %v8389_v62, 8  ;;  %8766 = vxpose.xlu0.b32.start [1/8] (short) (narrow) %v8284_v29, 8 }
 0x561   : > { %8799 = vxpose.xlu1.b32.cont [2/8] (short) (narrow) %v11402_v20, 8  ;;  %8767 = vxpose.xlu0.b32.cont [2/8] (short) (narrow) %v11382_v45, 8 }
 0x565   : > { %8800 = vxpose.xlu1.b32.cont [3/8] (short) (narrow) %v8399_v19, 8  ;;  %8768 = vxpose.xlu0.b32.cont [3/8] (short) (narrow) %v8294_v11, 8 }
 0x569   : > { %8801 = vxpose.xlu1.b32.cont [4/8] (short) (narrow) %v11405_v41, 8  ;;  %8769 = vxpose.xlu0.b32.cont [4/8] (short) (narrow) %v11385_v21, 8 }
 0x56b   : > { %v15186_v39 = vpop.f32.mrb[80].mxu1 }
 0x56c   : > { %v11470_v30 = vpop.f32.mrb[81].mxu1 }
 0x56d   : > { %8802 = vxpose.xlu1.b32.cont [5/8] (short) (narrow) %v8409_v37, 8  ;;  %8770 = vxpose.xlu0.b32.cont [5/8] (short) (narrow) %v8304_v25, 8  ;;  %v15188_v59 = vpop.f32.mrb[80].mxu0 }
 0x56e   : > { %v11489_v60 = vpop.f32.mrb[81].mxu0 }
 0x571   : > { %8803 = vxpose.xlu1.b32.cont [6/8] (short) (narrow) %v11408_v43, 8  ;;  %8771 = vxpose.xlu0.b32.cont [6/8] (short) (narrow) %v11388_v8, 8 }
 0x575   : > { %8804 = vxpose.xlu1.b32.cont [7/8] (short) (narrow) %v8419_v61, 8  ;;  %8772 = vxpose.xlu0.b32.cont [7/8] (short) (narrow) %v8314_v0, 8 }
 0x579   : > { %8805 = vxpose.xlu1.b32.end [8/8] (short) (narrow) %v11411_v54, 8  ;;  %8773 = vxpose.xlu0.b32.end [8/8] (short) (narrow) %v11391_v27, 8 }
 0x57d   : > { %8862 = vxpose.xlu1.b32.start [1/8] (short) (narrow) %v8599_v13, 8  ;;  %8830 = vxpose.xlu0.b32.start [1/8] (short) (narrow) %v8494_v47, 8 }
 0x581   : > { %8863 = vxpose.xlu1.b32.cont [2/8] (short) (narrow) %v11442_v40, 8  ;;  %8831 = vxpose.xlu0.b32.cont [2/8] (short) (narrow) %v11422_v1, 8 }
 0x585   : > { %8864 = vxpose.xlu1.b32.cont [3/8] (short) (narrow) %v8609_v10, 8  ;;  %8832 = vxpose.xlu0.b32.cont [3/8] (short) (narrow) %v8504_v50, 8 }
 0x589   : > { %8865 = vxpose.xlu1.b32.cont [4/8] (short) (narrow) %v11445_v15, 8  ;;  %8833 = vxpose.xlu0.b32.cont [4/8] (short) (narrow) %v11425_v16, 8 }
 0x58b   : > { %v15190_v5 = vpop.f32.mrb[82].mxu1 }
 0x58c   : > { %v11508_v28 = vpop.f32.mrb[83].mxu1 }
 0x58d   : > { %8866 = vxpose.xlu1.b32.cont [5/8] (short) (narrow) %v8619_v33, 8  ;;  %8834 = vxpose.xlu0.b32.cont [5/8] (short) (narrow) %v8514_v49, 8  ;;  %v15192_v36 = vpop.f32.mrb[82].mxu0 }
 0x58e   : > { %v11527_v14 = vpop.f32.mrb[83].mxu0 }
 0x591   : > { %8867 = vxpose.xlu1.b32.cont [6/8] (short) (narrow) %v11448_v26, 8  ;;  %8835 = vxpose.xlu0.b32.cont [6/8] (short) (narrow) %v11428_v31, 8 }
 0x595   : > { %8868 = vxpose.xlu1.b32.cont [7/8] (short) (narrow) %v8629_v34, 8  ;;  %8836 = vxpose.xlu0.b32.cont [7/8] (short) (narrow) %v8524_v32, 8 }
 0x599   : > { %8869 = vxpose.xlu1.b32.end [8/8] (short) (narrow) %v11451_v7, 8  ;;  %8837 = vxpose.xlu0.b32.end [8/8] (short) (narrow) %v11431_v3, 8 }
 0x59d   : > { %v8686_v62 = vpop.trf.xlu1  ;;  %v8654_v41 = vpop.trf.xlu0 }
 0x5ab   : > { %v15194_v44 = vpop.f32.mrb[84].mxu1 }
 0x5ac   : > { %v11546_v2 = vpop.f32.mrb[85].mxu1 }
 0x5ad   : > { %v15196_v63 = vpop.f32.mrb[84].mxu0 }
 0x5ae   : > { %v11565_v24 = vpop.f32.mrb[85].mxu0 }
 0x5bd   : > { %v8750_v8 = vpop.trf.xlu1  ;;  %v8718_v43 = vpop.trf.xlu0 }
 0x5be   : > { %v8910_v54 = vcombine.low %v8686_v62, %v8750_v8  ;;  %v8894_v0 = vcombine.low %v8654_v41, %v8718_v43  ;;  %v8911_v47 = vcombine.high %v8686_v62, %v8750_v8  ;;  %v8895_v13 = vcombine.high %v8654_v41, %v8718_v43 }
 0x5c0   : > { %v8918_v16 = vrot.slane %v8910_v54, %v15499_v12  ;;  %v8902_v15 = vrot.slane %v8894_v0, %v15499_v12  ;;  %v8925_v50 = vrot.slane %v8911_v47, %v15499_v12  ;;  %v8909_v10 = vrot.slane %v8895_v13, %v15499_v12 }
 0x5c2   : > { %v8958_v32 = vcombine.low %v8902_v15, %v8918_v16  ;;  %v8959_v34 = vcombine.high %v8902_v15, %v8918_v16  ;;  %v8974_v2 = vcombine.low %v8909_v10, %v8925_v50  ;;  %v8975_v24 = vcombine.high %v8909_v10, %v8925_v50 }
 0x5c4   : > { %v8966_v8 = vrot.slane %v8958_v32, %v12565_v55  ;;  %v8973_v43 = vrot.slane %v8959_v34, %v12565_v55  ;;  %v8989_v47 = vrot.slane %v8975_v24, %v12565_v55 }
 0x5cb   : > { %v15198_v46 = vpop.f32.mrb[86].mxu1 }
 0x5cc   : > { %v11584_v9 = vpop.f32.mrb[87].mxu1 }
 0x5cd   : > { %v15200_v45 = vpop.f32.mrb[86].mxu0 }
 0x5ce   : > { %v11603_v20 = vpop.f32.mrb[87].mxu0 }
 0x5dd   : > { %v8814_v27 = vpop.trf.xlu1  ;;  %v8782_v61 = vpop.trf.xlu0 }
 0x5eb   : > { %v15202_v29 = vpop.f32.mrb[88].mxu1 }
 0x5ec   : > { %v15204_v21 = vpop.f32.mrb[89].mxu1 }
 0x5ef   : > { %v11625_v11 = vpop.f32.mrb[90].mxu1 }
 0x5f0   : > { %v9714_v19 = vpop.f32.mrb[91].mxu1 }
 0x5f3   : > { %v11628_v25 = vpop.f32.mrb[92].mxu1 }
 0x5f4   : > { %v9724_v37 = vpop.f32.mrb[93].mxu1 }
 0x5f7   : > { %v11631_v1 = vpop.f32.mrb[94].mxu1 }
 0x5f8   : > { %v9734_v40 = vpop.f32.mrb[95].mxu1 }
 0x5fd   : > { %v8878_v31 = vpop.trf.xlu1  ;;  %v8846_v26 = vpop.trf.xlu0 }
 0x5fe   : > { %v8942_v49 = vcombine.low %v8814_v27, %v8878_v31  ;;  %v8943_v33 = vcombine.high %v8814_v27, %v8878_v31  ;;  %v8926_v3 = vcombine.low %v8782_v61, %v8846_v26  ;;  %v8927_v7 = vcombine.high %v8782_v61, %v8846_v26 }
 0x600   : > { %v8950_v30 = vrot.slane %v8942_v49, %v15499_v12  ;;  %v8957_v60 = vrot.slane %v8943_v33, %v15499_v12  ;;  %v8934_v28 = vrot.slane %v8926_v3, %v15499_v12  ;;  %v8941_v14 = vrot.slane %v8927_v7, %v15499_v12 }
 0x601   : > { %v8982_v12 = vrot.slane %v8974_v2, %v12565_v55 }
 0x602   : > { %v8990_v9 = vcombine.low %v8934_v28, %v8950_v30  ;;  %v8991_v20 = vcombine.high %v8934_v28, %v8950_v30  ;;  %v9006_v62 = vcombine.low %v8941_v14, %v8957_v60  ;;  %v9007_v41 = vcombine.high %v8941_v14, %v8957_v60 }
 0x604   : > { %v8998_v27 = vrot.slane %v8990_v9, %v12565_v55  ;;  %v9005_v54 = vrot.slane %v8991_v20, %v12565_v55  ;;  %v9014_v0 = vrot.slane %v9006_v62, %v12565_v55  ;;  %v9021_v61 = vrot.slane %v9007_v41, %v12565_v55 }
 0x606   : > { %v9023_v13 = vcombine.high %v8966_v8, %v8998_v27  ;;  %v9022_v16 = vcombine.low %v8966_v8, %v8998_v27  ;;  %v9025_v15 = vcombine.high %v8973_v43, %v9005_v54  ;;  %v9024_v50 = vcombine.low %v8973_v43, %v9005_v54  ;;  %v10347_v8 = vld [vmem:[%s14093_s13 + $0x40] sm:$0xff]  ;;  %v10348_v43 = vld [vmem:[%s14093_s13 + $0x48] sm:$0xff]  ;;  %v10349_v54 = vld [vmem:[%s14093_s13 + $0x50] sm:$0xff] }
 0x607   : > { %v9027_v10 = vcombine.high %v8982_v12, %v9014_v0  ;;  %v9029_v31 = vcombine.high %v8989_v47, %v9021_v61  ;;  %v9026_v26 = vcombine.low %v8982_v12, %v9014_v0  ;;  %v9028_v49 = vcombine.low %v8989_v47, %v9021_v61  ;;  %v10350_v0 = vld [vmem:[%s14093_s13 + $0x58] sm:$0xff]  ;;  %v10351_v12 = vld [vmem:[%s14093_s13 + $0x60] sm:$0xff]  ;;  %v10352_v47 = vld [vmem:[%s14093_s13 + $0x68] sm:$0xff] }
 0x608   : > { %v9173_v33 = vadd.f32 %v15188_v59, %v9023_v13  ;;  %v9100_v3 = vadd.f32 %v15186_v39, %v9022_v16  ;;  %v9319_v7 = vadd.f32 %v15192_v36, %v9025_v15  ;;  %v9246_v32 = vadd.f32 %v15190_v5, %v9024_v50  ;;  %v10353_v16 = vld [vmem:[%s14093_s13 + $0x70] sm:$0xff]  ;;  %v10354_v15 = vld [vmem:[%s14093_s13 + $0x78] sm:$0xff]  ;;  %s10164_s13 = sshll.u32 %s288_s15, 6 }
 0x609   : > { %v9465_v34 = vadd.f32 %v15196_v63, %v9027_v10  ;;  %v9611_v55 = vadd.f32 %v15200_v45, %v9029_v31  ;;  %v9392_v30 = vadd.f32 %v15194_v44, %v9026_v26  ;;  %v9538_v60 = vadd.f32 %v15198_v46, %v9028_v49  ;;  %s15290_s7 = scalar_lea.vmem [#allocation2], %s10164_s13 }
 0x60a   : > { %v9710_v28 = vadd.f32 %v15202_v29, %v9173_v33  ;;  %v9705_v14 = vadd.f32 %v15204_v21, %v9100_v3  ;;  %v9720_v2 = vadd.f32 %v11625_v11, %v9319_v7  ;;  %v9715_v59 = vadd.f32 %v9714_v19, %v9246_v32  ;;  %s10040_s10 = sshll.u32 %s15290_s7, 4  ;;  %s15322_s10 = int_to_ptr.vmem [resolvable:$true] %s10040_s10 }
 0x60b   : > { %v9730_v24 = vadd.f32 %v11628_v25, %v9465_v34  ;;  %v9725_v39 = vadd.f32 %v9724_v37, %v9392_v30  ;;  %v9740_v9 = vadd.f32 %v11631_v1, %v9611_v55  ;;  %v9735_v36 = vadd.f32 %v9734_v40, %v9538_v60  ;;  %s12331_s16 = scalar_lea.vmem %s15322_s10, 1024  ;;  %p12338_p1 = scmp.lt.s32.totalorder %s15322_s10, %s12336_s24 }
 0x60c   : > { %v9744_v20 = vmul.f32 0.17677669, %v9710_v28  ;;  %v9743_v5 = vmul.f32 0.17677669, %v9705_v14  ;;  %v9745_v62 = vmul.f32 0.17677669, %v9715_v59  ;;  %v12108_v27 = vpack.c.bf16 %v10348_v43, %v10347_v8  ;;  %p12332_p12 = scmp.ne.s32.totalorder %s15322_s10, %s12331_s16  ;;  %p12339_p2 = scmp.lt.s32.totalorder %s12337_s25, %s12331_s16 }
 0x60d   : > { %v9747_v63 = vmul.f32 0.17677669, %v9725_v39  ;;  %v9746_v46 = vmul.f32 0.17677669, %v9720_v2  ;;  %v9749_v29 = vmul.f32 0.17677669, %v9735_v36  ;;  %v12112_v61 = vpack.c.bf16 %v10350_v0, %v10349_v54 }
 0x60e   : > { %v9754_v45 = vsel %vm5177_vm3, %v9744_v20, -inf  ;;  %v9751_v44 = vsel %vm5177_vm3, %v9743_v5, -inf  ;;  %v9757_v21 = vsel %vm5177_vm3, %v9745_v62, -inf  ;;  %v9748_v19 = vmul.f32 0.17677669, %v9730_v24  ;;  %12109 = vmatprep.subr.bf16.mxu0 %v12108_v27  ;;  %p12333_p13 = pnand %p12332_p12, %p12490_p4  ;;  %p12340_p3 = por %p12339_p2, %p12338_p1 }
 0x60f   : > { %9755 = vmax.xlane.f32.xlu1 %v9754_v45  ;;  %9752 = vmax.xlane.f32.xlu0 %v9751_v44  ;;  %v9763_v11 = vsel %vm5177_vm3, %v9747_v63, -inf  ;;  %v9760_v25 = vsel %vm5177_vm3, %v9746_v46, -inf  ;;  %v9769_v37 = vsel %vm5177_vm3, %v9749_v29, -inf  ;;  %v15238_v1 = vmul.f32 0.17677669, %v9740_v9 }
 0x610   : > { %v9766_v40 = vsel %vm5177_vm3, %v9748_v19, -inf  ;;  %12111 = vmatpush3.bf16.msra.mxu0 %v12108_v27  ;;  %v12116_v13 = vpack.c.bf16 %v10352_v47, %v10351_v12  ;;  %v12120_v50 = vpack.c.bf16 %v10354_v15, %v10353_v16  ;;  %v5226_v0 = vsel %vm5177_vm3, %v14599_v58, 0.0  ;;  %p12334_p0 = pneg %p12333_p13 }
 0x611   : > { %v9772_v41 = vsel %vm5177_vm3, %v15238_v1, -inf  ;;  %12113 = vmatprep.subr.bf16.mxu0 %v12112_v61  ;;  %v5232_v12 = vsel %vm5177_vm3, %v14608_v56, 0.0  ;;  %v5235_v47 = vsel %vm5177_vm3, %v14605_v52, 0.0  ;;  %v5241_v58 = vsel %vm5177_vm3, %v14616_v48, 0.0 }
 0x612   : > { %v5247_v56 = vsel %vm5177_vm3, %v14626_v57, 0.0  ;;  %p12341_p5 = pnand %p12340_p3, %p12334_p0 }
 0x613   : > { %9758 = vmax.xlane.f32.xlu1 %v9757_v21  ;;  %9764 = vmax.xlane.f32.xlu0 %v9763_v11 }
 0x614   : > { %12115 = vmatpush3.bf16.msra.mxu0 %v12112_v61  ;;  %v5229_v61 = vsel %vm5177_vm3, %v14597_v23, 0.0  ;;  %v5244_v23 = vsel %vm5177_vm3, %v14620_v18, 0.0 }
 0x615   : > { %12117 = vmatprep.subr.bf16.mxu0 %v12116_v13 }
 0x617   : > { %9761 = vmax.xlane.f32.xlu1 %v9760_v25  ;;  %9770 = vmax.xlane.f32.xlu0 %v9769_v37 }
 0x618   : > { %12119 = vmatpush3.bf16.msra.mxu0 %v12116_v13  ;;  %v5238_v13 = vsel %vm5177_vm3, %v14614_v53, 0.0 }
 0x619   : > { %12121 = vmatprep.subr.bf16.mxu0 %v12120_v50 }
 0x61b   : > { %9767 = vmax.xlane.f32.xlu1 %v9766_v40 }
 0x61c   : > { %12123 = vmatpush3.bf16.msra.mxu0 %v12120_v50 }
 0x61f   : > { %9773 = vmax.xlane.f32.xlu1 %v9772_v41 }
 0x69c   : > { %v9756_v10 = vpop.xlane.xlu1 %9755  ;;  %v9753_v31 = vpop.xlane.xlu0 %9752 }
 0x69d   : > { %v9776_v26 = vsub.f32 %v9744_v20, %v9756_v10  ;;  %v9775_v49 = vsub.f32 %v9743_v5, %v9753_v31 }
 0x69f   : > { %v9785_v33 = vmul.f32 1.442695, %v9776_v26  ;;  %v9783_v3 = vmul.f32 1.442695, %v9775_v49 }
 0x6a0   : > { %v9759_v7 = vpop.xlane.xlu1 %9758  ;;  %v9765_v32 = vpop.xlane.xlu0 %9764 }
 0x6a1   : > { %12203 = vpow2.f32 %v9785_v33  ;;  %v9777_v34 = vsub.f32 %v9745_v62, %v9759_v7  ;;  %v9779_v55 = vsub.f32 %v9747_v63, %v9765_v32 }
 0x6a2   : > { %12205 = vpow2.f32 %v9783_v3 }
 0x6a3   : > { %v9787_v30 = vmul.f32 1.442695, %v9777_v34  ;;  %v9791_v60 = vmul.f32 1.442695, %v9779_v55 }
 0x6a4   : > { %v9762_v28 = vpop.xlane.xlu1 %9761  ;;  %v9771_v14 = vpop.xlane.xlu0 %9770 }
 0x6a5   : > { %12207 = vpow2.f32 %v9787_v30  ;;  %v9778_v2 = vsub.f32 %v9746_v46, %v9762_v28  ;;  %v9781_v59 = vsub.f32 %v9749_v29, %v9771_v14 }
 0x6a6   : > { %12209 = vpow2.f32 %v9791_v60 }
 0x6a7   : > { %v9789_v24 = vmul.f32 1.442695, %v9778_v2  ;;  %v9795_v39 = vmul.f32 1.442695, %v9781_v59 }
 0x6a8   : > { %v9768_v9 = vpop.xlane.xlu1 %9767 }
 0x6a9   : > { %12211 = vpow2.f32 %v9789_v24  ;;  %v9780_v36 = vsub.f32 %v9748_v19, %v9768_v9 }
 0x6aa   : > { %12213 = vpow2.f32 %v9795_v39 }
 0x6ab   : > { %v12204_v20 = vpop.eup %12203  ;;  %v9793_v5 = vmul.f32 1.442695, %v9780_v36 }
 0x6ac   : > { %v12206_v45 = vpop.eup %12205  ;;  %v9774_v62 = vpop.xlane.xlu1 %9773  ;;  %v9802_v63 = vsel %vm5177_vm3, %v12204_v20, 0.0 }
 0x6ad   : > { %12215 = vpow2.f32 %v9793_v5  ;;  %v9782_v44 = vsub.f32 %v15238_v1, %v9774_v62  ;;  %11648 = vmatprep.mubr.msk.f32.mxu0 %vm5177_vm3, %v12206_v45  ;;  %9803 = vadd.xlane.f32.xlu1 %v9802_v63  ;;  %v9799_v46 = vsel %vm5177_vm3, %v12206_v45, 0.0 }
 0x6ae   : > { %11649 = vmatmul.mubr.msk.f32.vlgmr.msra.gmra.mrb[88].mxu0 %vm5177_vm3, %v12204_v20  ;;  %9800 = vadd.xlane.f32.xlu0 %v9799_v46 }
 0x6af   : > { %v12208_v29 = vpop.eup %12207  ;;  %v9797_v21 = vmul.f32 1.442695, %v9782_v44 }
 0x6b0   : > { %11651 = vmatprep.mubr.msk.f32.mxu0 %vm5177_vm3, %v12208_v29  ;;  %v9805_v11 = vsel %vm5177_vm3, %v12208_v29, 0.0  ;;  %v12210_v19 = vpop.eup %12209 }
 0x6b1   : > { %12217 = vpow2.f32 %v9797_v21  ;;  %v9811_v1 = vsel %vm5177_vm3, %v12210_v19, 0.0 }
 0x6b2   : > { %9806 = vadd.xlane.f32.xlu0 %v9805_v11 }
 0x6b3   : > { %v12212_v25 = vpop.eup %12211 }
 0x6b4   : > { %11652 = vmatmul.mubr.msk.f32.gmra.mrb[90].mxu0 %vm5177_vm3, %v12212_v25  ;;  %v9808_v37 = vsel %vm5177_vm3, %v12212_v25, 0.0  ;;  %v12214_v40 = vpop.eup %12213 }
 0x6b5   : > { %9809 = vadd.xlane.f32.xlu1 %v9808_v37  ;;  %11654 = vmatprep.mubr.msk.f32.mxu0 %vm5177_vm3, %v12210_v19  ;;  %v9817_v43 = vsel %vm5177_vm3, %v12214_v40, 0.0 }
 0x6b6   : > { %9812 = vadd.xlane.f32.xlu0 %v9811_v1 }
 0x6b7   : > { %v12216_v41 = vpop.eup %12215 }
 0x6b8   : > { %11655 = vmatmul.mubr.msk.f32.gmra.mrb[92].mxu0 %vm5177_vm3, %v12216_v41  ;;  %v9814_v8 = vsel %vm5177_vm3, %v12216_v41, 0.0 }
 0x6b9   : > { %9815 = vadd.xlane.f32.xlu1 %v9814_v8  ;;  %11657 = vmatprep.mubr.msk.f32.mxu0 %vm5177_vm3, %v12214_v40 }
 0x6ba   : > { %9818 = vadd.xlane.f32.xlu0 %v9817_v43 }
 0x6bb   : > { %v12218_v27 = vpop.eup %12217 }
 0x6bc   : > { %11658 = vmatmul.mubr.msk.f32.gmra.mrb[94].mxu0 %vm5177_vm3, %v12218_v27  ;;  %v9820_v54 = vsel %vm5177_vm3, %v12218_v27, 0.0 }
 0x6bd   : > { %9821 = vadd.xlane.f32.xlu1 %v9820_v54 }
 0x6be   : > { %5227 = vadd.xlane.f32.xlu0 %v5226_v0 }
 0x6c1   : > { %5230 = vadd.xlane.f32.xlu1 %v5229_v61 }
 0x6c2   : > { %5233 = vadd.xlane.f32.xlu0 %v5232_v12 }
 0x6c5   : > { %5236 = vadd.xlane.f32.xlu1 %v5235_v47 }
 0x6c6   : > { %5239 = vadd.xlane.f32.xlu0 %v5238_v13 }
 0x6c9   : > { %5242 = vadd.xlane.f32.xlu1 %v5241_v58 }
 0x6ca   : > { %5245 = vadd.xlane.f32.xlu0 %v5244_v23 }
 0x6cd   : > { %5248 = vadd.xlane.f32.xlu1 %v5247_v56 }
 0x73a   : > { %v9804_v15 = vpop.xlane.xlu1 %9803 }
 0x73b   : > { %v9801_v16 = vpop.xlane.xlu0 %9800  ;;  %12219 = vrcp.f32 %v9804_v15 }
 0x73c   : > { %12221 = vrcp.f32 %v9801_v16 }
 0x73f   : > { %v9807_v50 = vpop.xlane.xlu0 %9806 }
 0x742   : > { %v9810_v52 = vpop.xlane.xlu1 %9809 }
 0x743   : > { %12223 = vrcp.f32 %v9810_v52  ;;  %v9813_v10 = vpop.xlane.xlu0 %9812 }
 0x744   : > { %12225 = vrcp.f32 %v9807_v50 }
 0x745   : > { %v12220_v48 = vpop.eup %12219 }
 0x746   : > { %v9816_v53 = vpop.xlane.xlu1 %9815  ;;  %v12222_v26 = vpop.eup %12221 }
 0x747   : > { %12227 = vrcp.f32 %v9816_v53  ;;  %v9819_v57 = vpop.xlane.xlu0 %9818 }
 0x748   : > { %12229 = vrcp.f32 %v9813_v10 }
 0x74a   : > { %v9822_v18 = vpop.xlane.xlu1 %9821 }
 0x74b   : > { %12231 = vrcp.f32 %v9822_v18  ;;  %v5228_v44 = vpop.xlane.xlu0 %5227 }
 0x74c   : > { %12233 = vrcp.f32 %v9819_v57 }
 0x74d   : > { %v12224_v7 = vpop.eup %12223 }
 0x74e   : > { %v12226_v34 = vpop.eup %12225  ;;  %v5231_v63 = vpop.xlane.xlu1 %5230 }
 0x74f   : > { %v5234_v29 = vpop.xlane.xlu0 %5233  ;;  %12235 = vrcp.f32 %v5231_v63 }
 0x750   : > { %12237 = vrcp.f32 %v5228_v44 }
 0x751   : > { %v12228_v28 = vpop.eup %12227 }
 0x752   : > { %v12230_v2 = vpop.eup %12229  ;;  %v5237_v46 = vpop.xlane.xlu1 %5236 }
 0x753   : > { %v5240_v11 = vpop.xlane.xlu0 %5239  ;;  %12239 = vrcp.f32 %v5237_v46 }
 0x754   : > { %12241 = vrcp.f32 %v5234_v29 }
 0x755   : > { %v12232_v9 = vpop.eup %12231 }
 0x756   : > { %v12234_v20 = vpop.eup %12233  ;;  %v5243_v21 = vpop.xlane.xlu1 %5242 }
 0x757   : > { %12243 = vrcp.f32 %v5243_v21  ;;  %v5246_v1 = vpop.xlane.xlu0 %5245 }
 0x758   : > { %12245 = vrcp.f32 %v5240_v11 }
 0x759   : > { %v12236_v19 = vpop.eup %12235 }
 0x75a   : > { %v5249_v25 = vpop.xlane.xlu1 %5248  ;;  %v12238_v37 = vpop.eup %12237  ;;  %v5396_v40 = vmul.f32 %v12236_v19, %v15116_v4 }
 0x75b   : > { %12247 = vrcp.f32 %v5249_v25  ;;  %v5395_v8 = vmul.f32 %v12238_v37, %v15118_v38 }
 0x75c   : > { %12249 = vrcp.f32 %v5246_v1 }
 0x75d   : > { %v12240_v54 = vpop.eup %12239 }
 0x75e   : > { %v12242_v4 = vpop.eup %12241  ;;  %v5398_v38 = vmul.f32 %v12240_v54, %v15123_v22 }
 0x75f   : > { %v5397_v47 = vmul.f32 %v12242_v4, %v15126_v51 }
 0x761   : > { %v12244_v61 = vpop.eup %12243 }
 0x762   : > { %v12246_v13 = vpop.eup %12245  ;;  %v5400_v22 = vmul.f32 %v12244_v61, %v15134_v6 }
 0x763   : > { %v5399_v52 = vmul.f32 %v12246_v13, %v15139_v17 }
 0x765   : > { %v12248_v16 = vpop.eup %12247 }
 0x766   : > { %v12250_v51 = vpop.eup %12249  ;;  %v5402_v6 = vmul.f32 %v12248_v16, %v15148_v42 }
 0x767   : > { %v5401_v17 = vmul.f32 %v12250_v51, %v15150_v35 }
 0x781   : > { %v11650_v31 = vpop.f32.mrb[88].mxu0 }
 0x782   : > { %v9969_v49 = vmul.f32 %v12220_v48, %v11650_v31  ;;  %v9913_v33 = vpop.f32.mrb[89].mxu0 }
 0x783   : > { %v9968_v3 = vmul.f32 %v12222_v26, %v9913_v33 }
 0x784   : > { %9986 = vrot.lane.b32.xlu1 %v9969_v49, %s12416_s11 }
 0x785   : > { %9984 = vrot.lane.b32.xlu0 %v9968_v3, %s12416_s11 }
 0x787   : > { %v11653_v32 = vpop.f32.mrb[90].mxu0 }
 0x788   : > { %v9971_v55 = vmul.f32 %v12224_v7, %v11653_v32  ;;  %v9923_v30 = vpop.f32.mrb[91].mxu0 }
 0x789   : > { %v9970_v60 = vmul.f32 %v12226_v34, %v9923_v30 }
 0x78a   : > { %9990 = vrot.lane.b32.xlu0 %v9971_v55, %s12416_s11 }
 0x78b   : > { %v11656_v14 = vpop.f32.mrb[92].mxu0  ;;  %9988 = vrot.lane.b32.xlu1 %v9970_v60, %s12416_s11 }
 0x78c   : > { %v9973_v59 = vmul.f32 %v12228_v28, %v11656_v14  ;;  %v9933_v24 = vpop.f32.mrb[93].mxu0 }
 0x78d   : > { %v9972_v39 = vmul.f32 %v12230_v2, %v9933_v24 }
 0x78e   : > { %9994 = vrot.lane.b32.xlu0 %v9973_v59, %s12416_s11 }
 0x78f   : > { %v11659_v36 = vpop.f32.mrb[94].mxu0  ;;  %9992 = vrot.lane.b32.xlu1 %v9972_v39, %s12416_s11 }
 0x790   : > { %v9975_v5 = vmul.f32 %v12232_v9, %v11659_v36  ;;  %v9943_v45 = vpop.f32.mrb[95].mxu0 }
 0x791   : > { %v9974_v62 = vmul.f32 %v12234_v20, %v9943_v45 }
 0x792   : > { %9998 = vrot.lane.b32.xlu0 %v9975_v5, %s12416_s11 }
 0x793   : > { %9996 = vrot.lane.b32.xlu1 %v9974_v62, %s12416_s11 }
 0x7f6   : > { %v9987_v41 = vpop.permute.xlu1 %9986 }
 0x7f7   : > { %v10009_v43 = vsel %vm2839_vm0, %v5396_v40, %v9987_v41  ;;  %v9985_v27 = vpop.permute.xlu0 %9984 }
 0x7f8   : > { %10017 = vst.msk [vmem:[%s15290_s7 + $0x8] sm:$0xff] %vm5177_vm3, %v10009_v43  ;;  %v10008_v0 = vsel %vm2839_vm0, %v5395_v8, %v9985_v27 }
 0x7f9   : > { %10016 = vst.msk [vmem:[%s15290_s7] sm:$0xff] %vm5177_vm3, %v10008_v0 }
 0x7fc   : > { %v9991_v12 = vpop.permute.xlu0 %9990 }
 0x7fd   : > { %v10011_v58 = vsel %vm2839_vm0, %v5398_v38, %v9991_v12  ;;  %v9989_v23 = vpop.permute.xlu1 %9988 }
 0x7fe   : > { %10019 = vst.msk [vmem:[%s15290_s7 + $0x18] sm:$0xff] %vm5177_vm3, %v10011_v58  ;;  %v10010_v56 = vsel %vm2839_vm0, %v5397_v47, %v9989_v23 }
 0x7ff   : > { %10018 = vst.msk [vmem:[%s15290_s7 + $0x10] sm:$0xff] %vm5177_vm3, %v10010_v56 }
 0x800   : > { %v9995_v15 = vpop.permute.xlu0 %9994 }
 0x801   : > { %v10013_v50 = vsel %vm2839_vm0, %v5400_v22, %v9995_v15  ;;  %v9993_v53 = vpop.permute.xlu1 %9992 }
 0x802   : > { %10021 = vst.msk [vmem:[%s15290_s7 + $0x28] sm:$0xff] %vm5177_vm3, %v10013_v50  ;;  %v10012_v10 = vsel %vm2839_vm0, %v5399_v52, %v9993_v53 }
 0x803   : > { %10020 = vst.msk [vmem:[%s15290_s7 + $0x20] sm:$0xff] %vm5177_vm3, %v10012_v10 }
 0x804   : > { %v9999_v48 = vpop.permute.xlu0 %9998 }
 0x805   : > { %v10015_v31 = vsel %vm2839_vm0, %v5402_v6, %v9999_v48  ;;  %v9997_v26 = vpop.permute.xlu1 %9996 }
 0x806   : > { %10023 = vst.msk [vmem:[%s15290_s7 + $0x38] sm:$0xff] %vm5177_vm3, %v10015_v31  ;;  %v10014_v42 = vsel %vm2839_vm0, %v5401_v17, %v9997_v26 }
 0x807   : > { %10022 = vst.msk [vmem:[%s15290_s7 + $0x30] sm:$0xff] %vm5177_vm3, %v10014_v42 }
 0x808   : > { %12344 = shalt.err (!%p12341_p5)
}
 0x809   : > { %s12345_s27 = scalar_lea.hbm %s15320_s14, 1024  ;;  %s12349_s15 = scalar_lea.hbm %s15383_s5, 2048 }
 0x80a   : > { %p12346_p6 = scmp.ne.s32.totalorder %s15320_s14, %s12345_s27  ;;  %p12350_p10 = scmp.lt.u32.totalorder %s15320_s14, %s15383_s5 }
 0x80b   : > { %p12351_p11 = scmp.lt.u32.totalorder %s12349_s15, %s12345_s27  ;;  %p12353_p13 = scmp.lt.u32.totalorder %s12345_s27, %s15320_s14 }
 0x80c   : > { %p12347_p7 = pnand %p12346_p6, %p12490_p4 }
 0x80d   : > { %p12352_p12 = por %p12351_p11, %p12350_p10 }
 0x80e   : > { %p12348_p9 = pneg %p12347_p7 }
 0x80f   : > { %p12354_p0 = por %p12353_p13, %p12352_p12 }
 0x811   : > { %p12355_p1 = pnand %p12354_p0, %p12348_p9 }
 0x813   : > { %12358 = shalt.err (!%p12355_p1)
}
 0x814   : > { %s12418_s9 = smov 128   ;;  %s12419_s12 = smov 8  }
 0x815   : > { %12124 = dma.vmem_to_hbm [thread:$0]  (%p12490_p4), %s15322_s10, 1024, %s15320_s14, %s15332_s21, %s12418_s9, %s12418_s9, %s12419_s12  }
 0x816 PF: > { %p12130_p2 = scmp.ge.s32.totalorder %s12409_s23, 2  ;;  %s10055_s8 = sand.u32 1, %s12389_s18  }
 0x817   : > { %s10056_s16 = scalar_lea.sflag [#allocation3], %s10055_s8 }
 0x818   : > { %p12127_p3 = pnand %p12130_p2, %p12497_p8 }
 0x81a   : > { %12384 = dma.done.wait (!%p12127_p3), %s10056_s16, 1024  }
 0x81b   : > { %12386 = vsyncadd (!%p12127_p3), %s10056_s16, 4294966272  ;;  %s18_s23 = sadd.s32 1, %s12409_s23   ;;  %s15543_s18 = smov %s12393_s19 }
 0x81c   : > { %p15_p5 = scmp.ge.s32.totalorder %s18_s23, 4   ;;  %s15544_s19 = smov %s12397_s20 }
 0x81d   : > { %s15545_s20 = smov %s12503_s6  ;;  %s15546_s21 = smov %s12405_s22 }
 0x81e   : > { %s15547_s22 = smov %s15549_s26  ;;  %17 = sbr.rel (!%p15_p5) target bundleno = 4 (0x4), region = 87 }
 0x825   :  { %10061 = vsyncpa [#allocation3], 1 }
 0x826   :  { %10063 = vsyncpa [#allocation3 + $0x1], 1 }

</bundles_post_ra>
